<compile_context>
chip_gen: v7x
topology: tpu7x:2x2x1
jax: 0.10.0
libtpu: 0.0.40
codegen_flags: <defaults>
</compile_context>

<pallas_src>
import functools

import numpy as np

import jax
import jax.numpy as jnp
from jax.experimental import pallas as pl
from jax.experimental.pallas import tpu as pltpu


# ---------------------------------------------------------------------------
# Fused Pallas kernel: one grid step == one sample
# ---------------------------------------------------------------------------
def _lenet_kernel(x_ref, w1_ref, b1_ref, s1_ref, w2_ref, b2_ref, s2_ref,
                  fc1w_ref, fc1b_ref, fc2w_ref, fc2b_ref, fc3w_ref, fc3b_ref,
                  out_ref, *, w_in, hw_in, w_mid, hw_mid):
    f32 = jnp.float32
    x = x_ref[0]                                    # (Cin, hw_in + pad), zero tail

    # ---- conv1 (3x3, valid): 9 per-tap matmuls on the flattened image -------
    # conv output stays "same-indexed" on the input grid; junk columns (right /
    # bottom borders) are finite and never selected by the pooling matrices.
    c1 = None
    for t in range(9):
        ki, kj = divmod(t, 3)
        off = ki * w_in + kj
        term = jnp.dot(w1_ref[t], x[:, off:off + hw_in],
                       preferred_element_type=f32)          # (6, hw_in)
        c1 = term if c1 is None else c1 + term

    # ---- maxpool 2x2/2 via 4 constant column-selection matmuls, bias, relu --
    p1 = None
    for d in range(4):
        v = jnp.dot(c1, s1_ref[d], preferred_element_type=f32)   # (6, hw_mid+pad)
        p1 = v if p1 is None else jnp.maximum(p1, v)
    p1 = jnp.maximum(p1 + b1_ref[...], 0.0)         # relu(max + b) == pool(relu(.+b))

    # ---- conv2 (3x3, valid) on the pooled 13x13 grid -------------------------
    c2 = None
    for t in range(9):
        ki, kj = divmod(t, 3)
        off = ki * w_mid + kj
        term = jnp.dot(w2_ref[t], p1[:, off:off + hw_mid],
                       preferred_element_type=f32)          # (16, hw_mid)
        c2 = term if c2 is None else c2 + term

    # ---- pool2 + bias + relu -> (16, 25) -------------------------------------
    p2 = None
    for d in range(4):
        v = jnp.dot(c2, s2_ref[d], preferred_element_type=f32)   # (16, 25)
        p2 = v if p2 is None else jnp.maximum(p2, v)
    p2 = jnp.maximum(p2 + b2_ref[...], 0.0)

    # ---- fc1: torch.flatten(NCHW) order folded in as per-channel matmuls -----
    n_ch = fc1w_ref.shape[0]                        # 16
    y = fc1b_ref[...]                               # (1, 120)
    for c in range(n_ch):
        y = y + jnp.dot(p2[c:c + 1, :], fc1w_ref[c],
                        preferred_element_type=f32)         # (1,25)@(25,120)
    y = jnp.maximum(y, 0.0)

    # ---- fc2 / fc3 ------------------------------------------------------------
    y = jnp.maximum(jnp.dot(y, fc2w_ref[...], preferred_element_type=f32)
                    + fc2b_ref[...], 0.0)           # (1, 84)
    y = jnp.dot(y, fc3w_ref[...], preferred_element_type=f32) + fc3b_ref[...]  # (1,10)
    out_ref[0] = y


# ---------------------------------------------------------------------------
# Parameter / constant preparation (done once, outside the forward)
# ---------------------------------------------------------------------------
def _pool_selectors(src_h, src_w, out_h, out_w, pad_cols):
    """4 constant 0/1 matrices; column m=i*out_w+j picks conv pixel (2i+d, 2j+d)."""
    sel = np.zeros((4, src_h * src_w, out_h * out_w + pad_cols), np.float32)
    for d, (di, dj) in enumerate(((0, 0), (0, 1), (1, 0), (1, 1))):
        for i in range(out_h):
            for j in range(out_w):
                sel[d, (2 * i + di) * src_w + (2 * j + dj), i * out_w + j] = 1.0
    return jnp.asarray(sel)


def prepare_params(params, height=28, width=28):
    """Pre-transpose / pre-flatten weights and build pooling selection matrices."""
    H, W = height, width
    Hp1, Wp1 = (H - 2) // 2, (W - 2) // 2           # 13, 13
    Hp2, Wp2 = (Hp1 - 2) // 2, (Wp1 - 2) // 2       # 5, 5
    c1w, c2w = params['conv1_w'], params['conv2_w']
    cout1, cin = c1w.shape[0], c1w.shape[1]
    cout2, cin2 = c2w.shape[0], c2w.shape[1]
    fc1_w = params['fc1_w']                         # (120, cout2*Hp2*Wp2)
    nhid1 = fc1_w.shape[0]
    return {
        'w1': jnp.transpose(c1w, (2, 3, 0, 1)).reshape(9, cout1, cin),
        'b1': params['conv1_b'].reshape(cout1, 1),
        'w2': jnp.transpose(c2w, (2, 3, 0, 1)).reshape(9, cout2, cin2),
        'b2': params['conv2_b'].reshape(cout2, 1),
        'sel1': _pool_selectors(H, W, Hp1, Wp1, 2 * Wp1 + 2),
        'sel2': _pool_selectors(Hp1, Wp1, Hp2, Wp2, 0),
        'fc1_w': fc1_w.T.reshape(cout2, Hp2 * Wp2, nhid1),   # (16, 25, 120)
        'fc1_b': params['fc1_b'].reshape(1, -1),
        'fc2_w': params['fc2_w'].T,
        'fc2_b': params['fc2_b'].reshape(1, -1),
        'fc3_w': params['fc3_w'].T,
        'fc3_b': params['fc3_b'].reshape(1, -1),
    }


# ---------------------------------------------------------------------------
# Forward pass (single fused pallas_call, jitted)
# ---------------------------------------------------------------------------
@jax.jit
def cnn_forward(x, kp):
    if x.ndim == 3:
        x = x[None]
    x = x.astype(jnp.float32)
    N, Cin, H, W = x.shape
    Wp1 = (W - 2) // 2
    hw_in, hw_mid = H * W, ((H - 2) // 2) * Wp1
    pad_in = 2 * W + 2                              # max conv1 tap offset

    xf = jnp.pad(x.reshape(N, Cin, hw_in), ((0, 0), (0, 0), (0, pad_in)))

    kernel = functools.partial(_lenet_kernel, w_in=W, hw_in=hw_in,
                               w_mid=Wp1, hw_mid=hw_mid)
    num_cls = kp['fc3_w'].shape[1]

    def full(a):
        return pl.BlockSpec(a.shape, lambda n, nd=a.ndim: (0,) * nd)

    out = pl.pallas_call(
        kernel,
        out_shape=jax.ShapeDtypeStruct((N, 1, num_cls), jnp.float32),
        grid=(N,),
        in_specs=[
            pl.BlockSpec((1, Cin, hw_in + pad_in), lambda n: (n, 0, 0)),  # x
            full(kp['w1']), full(kp['b1']), full(kp['sel1']),
            full(kp['w2']), full(kp['b2']), full(kp['sel2']),
            full(kp['fc1_w']), full(kp['fc1_b']),
            full(kp['fc2_w']), full(kp['fc2_b']),
            full(kp['fc3_w']), full(kp['fc3_b']),
        ],
        out_specs=pl.BlockSpec((1, 1, num_cls), lambda n: (n, 0, 0)),
        compiler_params=pltpu.CompilerParams(dimension_semantics=("parallel",)),
    )(xf, kp['w1'], kp['b1'], kp['sel1'], kp['w2'], kp['b2'], kp['sel2'],
      kp['fc1_w'], kp['fc1_b'], kp['fc2_w'], kp['fc2_b'], kp['fc3_w'], kp['fc3_b'])
    return out.reshape(N, num_cls)


# ---------------------------------------------------------------------------
# Pure-JAX reference (matches the PyTorch forward) and init
# ---------------------------------------------------------------------------
def _reference_forward(x, params):
    if x.ndim == 3:
        x = x[None]

    def conv(h, w, b):
        o = jax.lax.conv_general_dilated(h, w, (1, 1), 'VALID',
                                         dimension_numbers=('NCHW', 'OIHW', 'NCHW'))
        return o + b.reshape(1, -1, 1, 1)

    def pool(h):
        return jax.lax.reduce_window(h, -jnp.inf, jax.lax.max,
                                     (1, 1, 2, 2), (1, 1, 2, 2), 'VALID')

    h = pool(jax.nn.relu(conv(x, params['conv1_w'], params['conv1_b'])))
    h = pool(jax.nn.relu(conv(h, params['conv2_w'], params['conv2_b'])))
    h = h.reshape(h.shape[0], -1)
    h = jax.nn.relu(h @ params['fc1_w'].T + params['fc1_b'])
    h = jax.nn.relu(h @ params['fc2_w'].T + params['fc2_b'])
    return h @ params['fc3_w'].T + params['fc3_b']


def init_params(key):
    """Deterministic PyTorch-default-style (uniform +/- 1/sqrt(fan_in)) init."""
    ks = jax.random.split(key, 10)

    def u(k, shape, fan_in):
        bound = 1.0 / (fan_in ** 0.5)
        return jax.random.uniform(k, shape, jnp.float32, -bound, bound)

    return {
        'conv1_w': u(ks[0], (6, 1, 3, 3), 1 * 3 * 3),
        'conv1_b': u(ks[1], (6,), 1 * 3 * 3),
        'conv2_w': u(ks[2], (16, 6, 3, 3), 6 * 3 * 3),
        'conv2_b': u(ks[3], (16,), 6 * 3 * 3),
        'fc1_w': u(ks[4], (120, 400), 400),
        'fc1_b': u(ks[5], (120,), 400),
        'fc2_w': u(ks[6], (84, 120), 120),
        'fc2_b': u(ks[7], (84,), 120),
        'fc3_w': u(ks[8], (10, 84), 84),
        'fc3_b': u(ks[9], (10,), 84),
    }


if __name__ == "__main__":
    key = jax.random.PRNGKey(0)
    pkey, xkey = jax.random.split(key)
    params = init_params(pkey)
    kparams = prepare_params(params)

    # MNIST-style input implied by fc1 (16*5*5): batch=2, channels=1, 28x28.
    x = jax.random.normal(xkey, (2, 1, 28, 28), dtype=jnp.float32)

    logits = cnn_forward(x, kparams)
    jax.block_until_ready(logits)
    assert logits.shape == (2, 10), logits.shape

    ref = _reference_forward(x, params)
    max_err = float(jnp.max(jnp.abs(logits - ref)))
    assert jnp.allclose(logits, ref, atol=1e-3, rtol=1e-3), max_err

    print("KERNEL_OK")
</pallas_src>

<mosaic_0001>
module attributes {stable_mosaic.version = 11 : i64} {
  func.func @_lenet_kernel(%arg0: i32, %arg1: memref<1x1x842xf32, #tpu.memory_space<vmem>>, %arg2: memref<9x6x1xf32, #tpu.memory_space<vmem>>, %arg3: memref<6x1xf32, #tpu.memory_space<vmem>>, %arg4: memref<4x784x197xf32, #tpu.memory_space<vmem>>, %arg5: memref<9x16x6xf32, #tpu.memory_space<vmem>>, %arg6: memref<16x1xf32, #tpu.memory_space<vmem>>, %arg7: memref<4x169x25xf32, #tpu.memory_space<vmem>>, %arg8: memref<16x25x120xf32, #tpu.memory_space<vmem>>, %arg9: memref<1x120xf32, #tpu.memory_space<vmem>>, %arg10: memref<120x84xf32, #tpu.memory_space<vmem>>, %arg11: memref<1x84xf32, #tpu.memory_space<vmem>>, %arg12: memref<84x10xf32, #tpu.memory_space<vmem>>, %arg13: memref<1x10xf32, #tpu.memory_space<vmem>>, %arg14: memref<1x1x10xf32, #tpu.memory_space<vmem>>) attributes {dimension_semantics = [#tpu.dimension_semantics<parallel>], iteration_bounds = array<i64: 2>, scalar_prefetch = 0 : i64, scratch_operands = 0 : i64, tpu.core_type = #tpu.core_type<tc>, window_params = [{transform_indices = @transform_0, window_bounds = array<i64: 1, 1, 842>}, {pipeline_mode = #tpu.pipeline_mode<synchronous>, transform_indices = @transform_1, window_bounds = array<i64: 9, 6, 1>}, {pipeline_mode = #tpu.pipeline_mode<synchronous>, transform_indices = @transform_2, window_bounds = array<i64: 6, 1>}, {pipeline_mode = #tpu.pipeline_mode<synchronous>, transform_indices = @transform_3, window_bounds = array<i64: 4, 784, 197>}, {pipeline_mode = #tpu.pipeline_mode<synchronous>, transform_indices = @transform_4, window_bounds = array<i64: 9, 16, 6>}, {pipeline_mode = #tpu.pipeline_mode<synchronous>, transform_indices = @transform_5, window_bounds = array<i64: 16, 1>}, {pipeline_mode = #tpu.pipeline_mode<synchronous>, transform_indices = @transform_6, window_bounds = array<i64: 4, 169, 25>}, {pipeline_mode = #tpu.pipeline_mode<synchronous>, transform_indices = @transform_7, window_bounds = array<i64: 16, 25, 120>}, {pipeline_mode = #tpu.pipeline_mode<synchronous>, transform_indices = @transform_8, window_bounds = array<i64: 1, 120>}, {pipeline_mode = #tpu.pipeline_mode<synchronous>, transform_indices = @transform_9, window_bounds = array<i64: 120, 84>}, {pipeline_mode = #tpu.pipeline_mode<synchronous>, transform_indices = @transform_10, window_bounds = array<i64: 1, 84>}, {pipeline_mode = #tpu.pipeline_mode<synchronous>, transform_indices = @transform_11, window_bounds = array<i64: 84, 10>}, {pipeline_mode = #tpu.pipeline_mode<synchronous>, transform_indices = @transform_12, window_bounds = array<i64: 1, 10>}, {transform_indices = @transform_13, window_bounds = array<i64: 1, 1, 10>}]} {
    %c0 = arith.constant 0 : index
    %c0_0 = arith.constant 0 : index
    %c0_1 = arith.constant 0 : index
    %0 = vector.load %arg1[%c0, %c0_0, %c0_1] : memref<1x1x842xf32, #tpu.memory_space<vmem>>, vector<1x1x842xf32>
    %1 = vector.shape_cast %0 : vector<1x1x842xf32> to vector<1x842xf32>
    %c0_2 = arith.constant 0 : index
    %c0_3 = arith.constant 0 : index
    %c0_4 = arith.constant 0 : index
    %2 = vector.load %arg2[%c0_2, %c0_3, %c0_4] : memref<9x6x1xf32, #tpu.memory_space<vmem>>, vector<1x6x1xf32>
    %3 = vector.shape_cast %2 : vector<1x6x1xf32> to vector<6x1xf32>
    %4 = vector.extract_strided_slice %1 {offsets = [0, 0], sizes = [1, 784], strides = [1, 1]} : vector<1x842xf32> to vector<1x784xf32>
    %cst = arith.constant dense<0.000000e+00> : vector<6x784xf32>
    %5 = tpu.matmul %3, %4, %cst {dimension_numbers = #tpu.dot_dimension_numbers<[1], [0], [0], [1], [0, 0, 1, 1], [], []>} : vector<6x1xf32>, vector<1x784xf32>, vector<6x784xf32> -> vector<6x784xf32>
    %c1 = arith.constant 1 : index
    %c0_5 = arith.constant 0 : index
    %c0_6 = arith.constant 0 : index
    %6 = vector.load %arg2[%c1, %c0_5, %c0_6] : memref<9x6x1xf32, #tpu.memory_space<vmem>>, vector<1x6x1xf32>
    %7 = vector.shape_cast %6 : vector<1x6x1xf32> to vector<6x1xf32>
    %8 = vector.extract_strided_slice %1 {offsets = [0, 1], sizes = [1, 784], strides = [1, 1]} : vector<1x842xf32> to vector<1x784xf32>
    %cst_7 = arith.constant dense<0.000000e+00> : vector<6x784xf32>
    %9 = tpu.matmul %7, %8, %cst_7 {dimension_numbers = #tpu.dot_dimension_numbers<[1], [0], [0], [1], [0, 0, 1, 1], [], []>} : vector<6x1xf32>, vector<1x784xf32>, vector<6x784xf32> -> vector<6x784xf32>
    %10 = arith.addf %5, %9 : vector<6x784xf32>
    %c2 = arith.constant 2 : index
    %c0_8 = arith.constant 0 : index
    %c0_9 = arith.constant 0 : index
    %11 = vector.load %arg2[%c2, %c0_8, %c0_9] : memref<9x6x1xf32, #tpu.memory_space<vmem>>, vector<1x6x1xf32>
    %12 = vector.shape_cast %11 : vector<1x6x1xf32> to vector<6x1xf32>
    %13 = vector.extract_strided_slice %1 {offsets = [0, 2], sizes = [1, 784], strides = [1, 1]} : vector<1x842xf32> to vector<1x784xf32>
    %cst_10 = arith.constant dense<0.000000e+00> : vector<6x784xf32>
    %14 = tpu.matmul %12, %13, %cst_10 {dimension_numbers = #tpu.dot_dimension_numbers<[1], [0], [0], [1], [0, 0, 1, 1], [], []>} : vector<6x1xf32>, vector<1x784xf32>, vector<6x784xf32> -> vector<6x784xf32>
    %15 = arith.addf %10, %14 : vector<6x784xf32>
    %c3 = arith.constant 3 : index
    %c0_11 = arith.constant 0 : index
    %c0_12 = arith.constant 0 : index
    %16 = vector.load %arg2[%c3, %c0_11, %c0_12] : memref<9x6x1xf32, #tpu.memory_space<vmem>>, vector<1x6x1xf32>
    %17 = vector.shape_cast %16 : vector<1x6x1xf32> to vector<6x1xf32>
    %18 = vector.extract_strided_slice %1 {offsets = [0, 28], sizes = [1, 784], strides = [1, 1]} : vector<1x842xf32> to vector<1x784xf32>
    %cst_13 = arith.constant dense<0.000000e+00> : vector<6x784xf32>
    %19 = tpu.matmul %17, %18, %cst_13 {dimension_numbers = #tpu.dot_dimension_numbers<[1], [0], [0], [1], [0, 0, 1, 1], [], []>} : vector<6x1xf32>, vector<1x784xf32>, vector<6x784xf32> -> vector<6x784xf32>
    %20 = arith.addf %15, %19 : vector<6x784xf32>
    %c4 = arith.constant 4 : index
    %c0_14 = arith.constant 0 : index
    %c0_15 = arith.constant 0 : index
    %21 = vector.load %arg2[%c4, %c0_14, %c0_15] : memref<9x6x1xf32, #tpu.memory_space<vmem>>, vector<1x6x1xf32>
    %22 = vector.shape_cast %21 : vector<1x6x1xf32> to vector<6x1xf32>
    %23 = vector.extract_strided_slice %1 {offsets = [0, 29], sizes = [1, 784], strides = [1, 1]} : vector<1x842xf32> to vector<1x784xf32>
    %cst_16 = arith.constant dense<0.000000e+00> : vector<6x784xf32>
    %24 = tpu.matmul %22, %23, %cst_16 {dimension_numbers = #tpu.dot_dimension_numbers<[1], [0], [0], [1], [0, 0, 1, 1], [], []>} : vector<6x1xf32>, vector<1x784xf32>, vector<6x784xf32> -> vector<6x784xf32>
    %25 = arith.addf %20, %24 : vector<6x784xf32>
    %c5 = arith.constant 5 : index
    %c0_17 = arith.constant 0 : index
    %c0_18 = arith.constant 0 : index
    %26 = vector.load %arg2[%c5, %c0_17, %c0_18] : memref<9x6x1xf32, #tpu.memory_space<vmem>>, vector<1x6x1xf32>
    %27 = vector.shape_cast %26 : vector<1x6x1xf32> to vector<6x1xf32>
    %28 = vector.extract_strided_slice %1 {offsets = [0, 30], sizes = [1, 784], strides = [1, 1]} : vector<1x842xf32> to vector<1x784xf32>
    %cst_19 = arith.constant dense<0.000000e+00> : vector<6x784xf32>
    %29 = tpu.matmul %27, %28, %cst_19 {dimension_numbers = #tpu.dot_dimension_numbers<[1], [0], [0], [1], [0, 0, 1, 1], [], []>} : vector<6x1xf32>, vector<1x784xf32>, vector<6x784xf32> -> vector<6x784xf32>
    %30 = arith.addf %25, %29 : vector<6x784xf32>
    %c6 = arith.constant 6 : index
    %c0_20 = arith.constant 0 : index
    %c0_21 = arith.constant 0 : index
    %31 = vector.load %arg2[%c6, %c0_20, %c0_21] : memref<9x6x1xf32, #tpu.memory_space<vmem>>, vector<1x6x1xf32>
    %32 = vector.shape_cast %31 : vector<1x6x1xf32> to vector<6x1xf32>
    %33 = vector.extract_strided_slice %1 {offsets = [0, 56], sizes = [1, 784], strides = [1, 1]} : vector<1x842xf32> to vector<1x784xf32>
    %cst_22 = arith.constant dense<0.000000e+00> : vector<6x784xf32>
    %34 = tpu.matmul %32, %33, %cst_22 {dimension_numbers = #tpu.dot_dimension_numbers<[1], [0], [0], [1], [0, 0, 1, 1], [], []>} : vector<6x1xf32>, vector<1x784xf32>, vector<6x784xf32> -> vector<6x784xf32>
    %35 = arith.addf %30, %34 : vector<6x784xf32>
    %c7 = arith.constant 7 : index
    %c0_23 = arith.constant 0 : index
    %c0_24 = arith.constant 0 : index
    %36 = vector.load %arg2[%c7, %c0_23, %c0_24] : memref<9x6x1xf32, #tpu.memory_space<vmem>>, vector<1x6x1xf32>
    %37 = vector.shape_cast %36 : vector<1x6x1xf32> to vector<6x1xf32>
    %38 = vector.extract_strided_slice %1 {offsets = [0, 57], sizes = [1, 784], strides = [1, 1]} : vector<1x842xf32> to vector<1x784xf32>
    %cst_25 = arith.constant dense<0.000000e+00> : vector<6x784xf32>
    %39 = tpu.matmul %37, %38, %cst_25 {dimension_numbers = #tpu.dot_dimension_numbers<[1], [0], [0], [1], [0, 0, 1, 1], [], []>} : vector<6x1xf32>, vector<1x784xf32>, vector<6x784xf32> -> vector<6x784xf32>
    %40 = arith.addf %35, %39 : vector<6x784xf32>
    %c8 = arith.constant 8 : index
    %c0_26 = arith.constant 0 : index
    %c0_27 = arith.constant 0 : index
    %41 = vector.load %arg2[%c8, %c0_26, %c0_27] : memref<9x6x1xf32, #tpu.memory_space<vmem>>, vector<1x6x1xf32>
    %42 = vector.shape_cast %41 : vector<1x6x1xf32> to vector<6x1xf32>
    %43 = vector.extract_strided_slice %1 {offsets = [0, 58], sizes = [1, 784], strides = [1, 1]} : vector<1x842xf32> to vector<1x784xf32>
    %cst_28 = arith.constant dense<0.000000e+00> : vector<6x784xf32>
    %44 = tpu.matmul %42, %43, %cst_28 {dimension_numbers = #tpu.dot_dimension_numbers<[1], [0], [0], [1], [0, 0, 1, 1], [], []>} : vector<6x1xf32>, vector<1x784xf32>, vector<6x784xf32> -> vector<6x784xf32>
    %45 = arith.addf %40, %44 : vector<6x784xf32>
    %c0_29 = arith.constant 0 : index
    %c0_30 = arith.constant 0 : index
    %c0_31 = arith.constant 0 : index
    %46 = vector.load %arg4[%c0_29, %c0_30, %c0_31] : memref<4x784x197xf32, #tpu.memory_space<vmem>>, vector<1x784x197xf32>
    %47 = vector.shape_cast %46 : vector<1x784x197xf32> to vector<784x197xf32>
    %cst_32 = arith.constant dense<0.000000e+00> : vector<6x197xf32>
    %48 = tpu.matmul %45, %47, %cst_32 {dimension_numbers = #tpu.dot_dimension_numbers<[1], [0], [0], [1], [0, 0, 1, 1], [], []>} : vector<6x784xf32>, vector<784x197xf32>, vector<6x197xf32> -> vector<6x197xf32>
    %c1_33 = arith.constant 1 : index
    %c0_34 = arith.constant 0 : index
    %c0_35 = arith.constant 0 : index
    %49 = vector.load %arg4[%c1_33, %c0_34, %c0_35] : memref<4x784x197xf32, #tpu.memory_space<vmem>>, vector<1x784x197xf32>
    %50 = vector.shape_cast %49 : vector<1x784x197xf32> to vector<784x197xf32>
    %cst_36 = arith.constant dense<0.000000e+00> : vector<6x197xf32>
    %51 = tpu.matmul %45, %50, %cst_36 {dimension_numbers = #tpu.dot_dimension_numbers<[1], [0], [0], [1], [0, 0, 1, 1], [], []>} : vector<6x784xf32>, vector<784x197xf32>, vector<6x197xf32> -> vector<6x197xf32>
    %52 = arith.maximumf %48, %51 : vector<6x197xf32>
    %c2_37 = arith.constant 2 : index
    %c0_38 = arith.constant 0 : index
    %c0_39 = arith.constant 0 : index
    %53 = vector.load %arg4[%c2_37, %c0_38, %c0_39] : memref<4x784x197xf32, #tpu.memory_space<vmem>>, vector<1x784x197xf32>
    %54 = vector.shape_cast %53 : vector<1x784x197xf32> to vector<784x197xf32>
    %cst_40 = arith.constant dense<0.000000e+00> : vector<6x197xf32>
    %55 = tpu.matmul %45, %54, %cst_40 {dimension_numbers = #tpu.dot_dimension_numbers<[1], [0], [0], [1], [0, 0, 1, 1], [], []>} : vector<6x784xf32>, vector<784x197xf32>, vector<6x197xf32> -> vector<6x197xf32>
    %56 = arith.maximumf %52, %55 : vector<6x197xf32>
    %c3_41 = arith.constant 3 : index
    %c0_42 = arith.constant 0 : index
    %c0_43 = arith.constant 0 : index
    %57 = vector.load %arg4[%c3_41, %c0_42, %c0_43] : memref<4x784x197xf32, #tpu.memory_space<vmem>>, vector<1x784x197xf32>
    %58 = vector.shape_cast %57 : vector<1x784x197xf32> to vector<784x197xf32>
    %cst_44 = arith.constant dense<0.000000e+00> : vector<6x197xf32>
    %59 = tpu.matmul %45, %58, %cst_44 {dimension_numbers = #tpu.dot_dimension_numbers<[1], [0], [0], [1], [0, 0, 1, 1], [], []>} : vector<6x784xf32>, vector<784x197xf32>, vector<6x197xf32> -> vector<6x197xf32>
    %60 = arith.maximumf %56, %59 : vector<6x197xf32>
    %c0_45 = arith.constant 0 : index
    %c0_46 = arith.constant 0 : index
    %61 = vector.load %arg3[%c0_45, %c0_46] : memref<6x1xf32, #tpu.memory_space<vmem>>, vector<6x1xf32>
    %62 = vector.broadcast %61 : vector<6x1xf32> to vector<6x197xf32>
    %63 = arith.addf %60, %62 : vector<6x197xf32>
    %cst_47 = arith.constant 0.000000e+00 : f32
    %64 = vector.broadcast %cst_47 : f32 to vector<6x197xf32>
    %65 = arith.maximumf %63, %64 : vector<6x197xf32>
    %c0_48 = arith.constant 0 : index
    %c0_49 = arith.constant 0 : index
    %c0_50 = arith.constant 0 : index
    %66 = vector.load %arg5[%c0_48, %c0_49, %c0_50] : memref<9x16x6xf32, #tpu.memory_space<vmem>>, vector<1x16x6xf32>
    %67 = vector.shape_cast %66 : vector<1x16x6xf32> to vector<16x6xf32>
    %68 = vector.extract_strided_slice %65 {offsets = [0, 0], sizes = [6, 169], strides = [1, 1]} : vector<6x197xf32> to vector<6x169xf32>
    %cst_51 = arith.constant dense<0.000000e+00> : vector<16x169xf32>
    %69 = tpu.matmul %67, %68, %cst_51 {dimension_numbers = #tpu.dot_dimension_numbers<[1], [0], [0], [1], [0, 0, 1, 1], [], []>} : vector<16x6xf32>, vector<6x169xf32>, vector<16x169xf32> -> vector<16x169xf32>
    %c1_52 = arith.constant 1 : index
    %c0_53 = arith.constant 0 : index
    %c0_54 = arith.constant 0 : index
    %70 = vector.load %arg5[%c1_52, %c0_53, %c0_54] : memref<9x16x6xf32, #tpu.memory_space<vmem>>, vector<1x16x6xf32>
    %71 = vector.shape_cast %70 : vector<1x16x6xf32> to vector<16x6xf32>
    %72 = vector.extract_strided_slice %65 {offsets = [0, 1], sizes = [6, 169], strides = [1, 1]} : vector<6x197xf32> to vector<6x169xf32>
    %cst_55 = arith.constant dense<0.000000e+00> : vector<16x169xf32>
    %73 = tpu.matmul %71, %72, %cst_55 {dimension_numbers = #tpu.dot_dimension_numbers<[1], [0], [0], [1], [0, 0, 1, 1], [], []>} : vector<16x6xf32>, vector<6x169xf32>, vector<16x169xf32> -> vector<16x169xf32>
    %74 = arith.addf %69, %73 : vector<16x169xf32>
    %c2_56 = arith.constant 2 : index
    %c0_57 = arith.constant 0 : index
    %c0_58 = arith.constant 0 : index
    %75 = vector.load %arg5[%c2_56, %c0_57, %c0_58] : memref<9x16x6xf32, #tpu.memory_space<vmem>>, vector<1x16x6xf32>
    %76 = vector.shape_cast %75 : vector<1x16x6xf32> to vector<16x6xf32>
    %77 = vector.extract_strided_slice %65 {offsets = [0, 2], sizes = [6, 169], strides = [1, 1]} : vector<6x197xf32> to vector<6x169xf32>
    %cst_59 = arith.constant dense<0.000000e+00> : vector<16x169xf32>
    %78 = tpu.matmul %76, %77, %cst_59 {dimension_numbers = #tpu.dot_dimension_numbers<[1], [0], [0], [1], [0, 0, 1, 1], [], []>} : vector<16x6xf32>, vector<6x169xf32>, vector<16x169xf32> -> vector<16x169xf32>
    %79 = arith.addf %74, %78 : vector<16x169xf32>
    %c3_60 = arith.constant 3 : index
    %c0_61 = arith.constant 0 : index
    %c0_62 = arith.constant 0 : index
    %80 = vector.load %arg5[%c3_60, %c0_61, %c0_62] : memref<9x16x6xf32, #tpu.memory_space<vmem>>, vector<1x16x6xf32>
    %81 = vector.shape_cast %80 : vector<1x16x6xf32> to vector<16x6xf32>
    %82 = vector.extract_strided_slice %65 {offsets = [0, 13], sizes = [6, 169], strides = [1, 1]} : vector<6x197xf32> to vector<6x169xf32>
    %cst_63 = arith.constant dense<0.000000e+00> : vector<16x169xf32>
    %83 = tpu.matmul %81, %82, %cst_63 {dimension_numbers = #tpu.dot_dimension_numbers<[1], [0], [0], [1], [0, 0, 1, 1], [], []>} : vector<16x6xf32>, vector<6x169xf32>, vector<16x169xf32> -> vector<16x169xf32>
    %84 = arith.addf %79, %83 : vector<16x169xf32>
    %c4_64 = arith.constant 4 : index
    %c0_65 = arith.constant 0 : index
    %c0_66 = arith.constant 0 : index
    %85 = vector.load %arg5[%c4_64, %c0_65, %c0_66] : memref<9x16x6xf32, #tpu.memory_space<vmem>>, vector<1x16x6xf32>
    %86 = vector.shape_cast %85 : vector<1x16x6xf32> to vector<16x6xf32>
    %87 = vector.extract_strided_slice %65 {offsets = [0, 14], sizes = [6, 169], strides = [1, 1]} : vector<6x197xf32> to vector<6x169xf32>
    %cst_67 = arith.constant dense<0.000000e+00> : vector<16x169xf32>
    %88 = tpu.matmul %86, %87, %cst_67 {dimension_numbers = #tpu.dot_dimension_numbers<[1], [0], [0], [1], [0, 0, 1, 1], [], []>} : vector<16x6xf32>, vector<6x169xf32>, vector<16x169xf32> -> vector<16x169xf32>
    %89 = arith.addf %84, %88 : vector<16x169xf32>
    %c5_68 = arith.constant 5 : index
    %c0_69 = arith.constant 0 : index
    %c0_70 = arith.constant 0 : index
    %90 = vector.load %arg5[%c5_68, %c0_69, %c0_70] : memref<9x16x6xf32, #tpu.memory_space<vmem>>, vector<1x16x6xf32>
    %91 = vector.shape_cast %90 : vector<1x16x6xf32> to vector<16x6xf32>
    %92 = vector.extract_strided_slice %65 {offsets = [0, 15], sizes = [6, 169], strides = [1, 1]} : vector<6x197xf32> to vector<6x169xf32>
    %cst_71 = arith.constant dense<0.000000e+00> : vector<16x169xf32>
    %93 = tpu.matmul %91, %92, %cst_71 {dimension_numbers = #tpu.dot_dimension_numbers<[1], [0], [0], [1], [0, 0, 1, 1], [], []>} : vector<16x6xf32>, vector<6x169xf32>, vector<16x169xf32> -> vector<16x169xf32>
    %94 = arith.addf %89, %93 : vector<16x169xf32>
    %c6_72 = arith.constant 6 : index
    %c0_73 = arith.constant 0 : index
    %c0_74 = arith.constant 0 : index
    %95 = vector.load %arg5[%c6_72, %c0_73, %c0_74] : memref<9x16x6xf32, #tpu.memory_space<vmem>>, vector<1x16x6xf32>
    %96 = vector.shape_cast %95 : vector<1x16x6xf32> to vector<16x6xf32>
    %97 = vector.extract_strided_slice %65 {offsets = [0, 26], sizes = [6, 169], strides = [1, 1]} : vector<6x197xf32> to vector<6x169xf32>
    %cst_75 = arith.constant dense<0.000000e+00> : vector<16x169xf32>
    %98 = tpu.matmul %96, %97, %cst_75 {dimension_numbers = #tpu.dot_dimension_numbers<[1], [0], [0], [1], [0, 0, 1, 1], [], []>} : vector<16x6xf32>, vector<6x169xf32>, vector<16x169xf32> -> vector<16x169xf32>
    %99 = arith.addf %94, %98 : vector<16x169xf32>
    %c7_76 = arith.constant 7 : index
    %c0_77 = arith.constant 0 : index
    %c0_78 = arith.constant 0 : index
    %100 = vector.load %arg5[%c7_76, %c0_77, %c0_78] : memref<9x16x6xf32, #tpu.memory_space<vmem>>, vector<1x16x6xf32>
    %101 = vector.shape_cast %100 : vector<1x16x6xf32> to vector<16x6xf32>
    %102 = vector.extract_strided_slice %65 {offsets = [0, 27], sizes = [6, 169], strides = [1, 1]} : vector<6x197xf32> to vector<6x169xf32>
    %cst_79 = arith.constant dense<0.000000e+00> : vector<16x169xf32>
    %103 = tpu.matmul %101, %102, %cst_79 {dimension_numbers = #tpu.dot_dimension_numbers<[1], [0], [0], [1], [0, 0, 1, 1], [], []>} : vector<16x6xf32>, vector<6x169xf32>, vector<16x169xf32> -> vector<16x169xf32>
    %104 = arith.addf %99, %103 : vector<16x169xf32>
    %c8_80 = arith.constant 8 : index
    %c0_81 = arith.constant 0 : index
    %c0_82 = arith.constant 0 : index
    %105 = vector.load %arg5[%c8_80, %c0_81, %c0_82] : memref<9x16x6xf32, #tpu.memory_space<vmem>>, vector<1x16x6xf32>
    %106 = vector.shape_cast %105 : vector<1x16x6xf32> to vector<16x6xf32>
    %107 = vector.extract_strided_slice %65 {offsets = [0, 28], sizes = [6, 169], strides = [1, 1]} : vector<6x197xf32> to vector<6x169xf32>
    %cst_83 = arith.constant dense<0.000000e+00> : vector<16x169xf32>
    %108 = tpu.matmul %106, %107, %cst_83 {dimension_numbers = #tpu.dot_dimension_numbers<[1], [0], [0], [1], [0, 0, 1, 1], [], []>} : vector<16x6xf32>, vector<6x169xf32>, vector<16x169xf32> -> vector<16x169xf32>
    %109 = arith.addf %104, %108 : vector<16x169xf32>
    %c0_84 = arith.constant 0 : index
    %c0_85 = arith.constant 0 : index
    %c0_86 = arith.constant 0 : index
    %110 = vector.load %arg7[%c0_84, %c0_85, %c0_86] : memref<4x169x25xf32, #tpu.memory_space<vmem>>, vector<1x169x25xf32>
    %111 = vector.shape_cast %110 : vector<1x169x25xf32> to vector<169x25xf32>
    %cst_87 = arith.constant dense<0.000000e+00> : vector<16x25xf32>
    %112 = tpu.matmul %109, %111, %cst_87 {dimension_numbers = #tpu.dot_dimension_numbers<[1], [0], [0], [1], [0, 0, 1, 1], [], []>} : vector<16x169xf32>, vector<169x25xf32>, vector<16x25xf32> -> vector<16x25xf32>
    %c1_88 = arith.constant 1 : index
    %c0_89 = arith.constant 0 : index
    %c0_90 = arith.constant 0 : index
    %113 = vector.load %arg7[%c1_88, %c0_89, %c0_90] : memref<4x169x25xf32, #tpu.memory_space<vmem>>, vector<1x169x25xf32>
    %114 = vector.shape_cast %113 : vector<1x169x25xf32> to vector<169x25xf32>
    %cst_91 = arith.constant dense<0.000000e+00> : vector<16x25xf32>
    %115 = tpu.matmul %109, %114, %cst_91 {dimension_numbers = #tpu.dot_dimension_numbers<[1], [0], [0], [1], [0, 0, 1, 1], [], []>} : vector<16x169xf32>, vector<169x25xf32>, vector<16x25xf32> -> vector<16x25xf32>
    %116 = arith.maximumf %112, %115 : vector<16x25xf32>
    %c2_92 = arith.constant 2 : index
    %c0_93 = arith.constant 0 : index
    %c0_94 = arith.constant 0 : index
    %117 = vector.load %arg7[%c2_92, %c0_93, %c0_94] : memref<4x169x25xf32, #tpu.memory_space<vmem>>, vector<1x169x25xf32>
    %118 = vector.shape_cast %117 : vector<1x169x25xf32> to vector<169x25xf32>
    %cst_95 = arith.constant dense<0.000000e+00> : vector<16x25xf32>
    %119 = tpu.matmul %109, %118, %cst_95 {dimension_numbers = #tpu.dot_dimension_numbers<[1], [0], [0], [1], [0, 0, 1, 1], [], []>} : vector<16x169xf32>, vector<169x25xf32>, vector<16x25xf32> -> vector<16x25xf32>
    %120 = arith.maximumf %116, %119 : vector<16x25xf32>
    %c3_96 = arith.constant 3 : index
    %c0_97 = arith.constant 0 : index
    %c0_98 = arith.constant 0 : index
    %121 = vector.load %arg7[%c3_96, %c0_97, %c0_98] : memref<4x169x25xf32, #tpu.memory_space<vmem>>, vector<1x169x25xf32>
    %122 = vector.shape_cast %121 : vector<1x169x25xf32> to vector<169x25xf32>
    %cst_99 = arith.constant dense<0.000000e+00> : vector<16x25xf32>
    %123 = tpu.matmul %109, %122, %cst_99 {dimension_numbers = #tpu.dot_dimension_numbers<[1], [0], [0], [1], [0, 0, 1, 1], [], []>} : vector<16x169xf32>, vector<169x25xf32>, vector<16x25xf32> -> vector<16x25xf32>
    %124 = arith.maximumf %120, %123 : vector<16x25xf32>
    %c0_100 = arith.constant 0 : index
    %c0_101 = arith.constant 0 : index
    %125 = vector.load %arg6[%c0_100, %c0_101] : memref<16x1xf32, #tpu.memory_space<vmem>>, vector<16x1xf32>
    %126 = vector.broadcast %125 : vector<16x1xf32> to vector<16x25xf32>
    %127 = arith.addf %124, %126 : vector<16x25xf32>
    %cst_102 = arith.constant 0.000000e+00 : f32
    %128 = vector.broadcast %cst_102 : f32 to vector<16x25xf32>
    %129 = arith.maximumf %127, %128 : vector<16x25xf32>
    %c0_103 = arith.constant 0 : index
    %c0_104 = arith.constant 0 : index
    %130 = vector.load %arg9[%c0_103, %c0_104] : memref<1x120xf32, #tpu.memory_space<vmem>>, vector<1x120xf32>
    %131 = vector.extract_strided_slice %129 {offsets = [0, 0], sizes = [1, 25], strides = [1, 1]} : vector<16x25xf32> to vector<1x25xf32>
    %c0_105 = arith.constant 0 : index
    %c0_106 = arith.constant 0 : index
    %c0_107 = arith.constant 0 : index
    %132 = vector.load %arg8[%c0_105, %c0_106, %c0_107] : memref<16x25x120xf32, #tpu.memory_space<vmem>>, vector<1x25x120xf32>
    %133 = vector.shape_cast %132 : vector<1x25x120xf32> to vector<25x120xf32>
    %cst_108 = arith.constant dense<0.000000e+00> : vector<1x120xf32>
    %134 = tpu.matmul %131, %133, %cst_108 {dimension_numbers = #tpu.dot_dimension_numbers<[1], [0], [0], [1], [0, 0, 1, 1], [], []>} : vector<1x25xf32>, vector<25x120xf32>, vector<1x120xf32> -> vector<1x120xf32>
    %135 = arith.addf %130, %134 : vector<1x120xf32>
    %136 = vector.extract_strided_slice %129 {offsets = [1, 0], sizes = [1, 25], strides = [1, 1]} : vector<16x25xf32> to vector<1x25xf32>
    %c1_109 = arith.constant 1 : index
    %c0_110 = arith.constant 0 : index
    %c0_111 = arith.constant 0 : index
    %137 = vector.load %arg8[%c1_109, %c0_110, %c0_111] : memref<16x25x120xf32, #tpu.memory_space<vmem>>, vector<1x25x120xf32>
    %138 = vector.shape_cast %137 : vector<1x25x120xf32> to vector<25x120xf32>
    %cst_112 = arith.constant dense<0.000000e+00> : vector<1x120xf32>
    %139 = tpu.matmul %136, %138, %cst_112 {dimension_numbers = #tpu.dot_dimension_numbers<[1], [0], [0], [1], [0, 0, 1, 1], [], []>} : vector<1x25xf32>, vector<25x120xf32>, vector<1x120xf32> -> vector<1x120xf32>
    %140 = arith.addf %135, %139 : vector<1x120xf32>
    %141 = vector.extract_strided_slice %129 {offsets = [2, 0], sizes = [1, 25], strides = [1, 1]} : vector<16x25xf32> to vector<1x25xf32>
    %c2_113 = arith.constant 2 : index
    %c0_114 = arith.constant 0 : index
    %c0_115 = arith.constant 0 : index
    %142 = vector.load %arg8[%c2_113, %c0_114, %c0_115] : memref<16x25x120xf32, #tpu.memory_space<vmem>>, vector<1x25x120xf32>
    %143 = vector.shape_cast %142 : vector<1x25x120xf32> to vector<25x120xf32>
    %cst_116 = arith.constant dense<0.000000e+00> : vector<1x120xf32>
    %144 = tpu.matmul %141, %143, %cst_116 {dimension_numbers = #tpu.dot_dimension_numbers<[1], [0], [0], [1], [0, 0, 1, 1], [], []>} : vector<1x25xf32>, vector<25x120xf32>, vector<1x120xf32> -> vector<1x120xf32>
    %145 = arith.addf %140, %144 : vector<1x120xf32>
    %146 = vector.extract_strided_slice %129 {offsets = [3, 0], sizes = [1, 25], strides = [1, 1]} : vector<16x25xf32> to vector<1x25xf32>
    %c3_117 = arith.constant 3 : index
    %c0_118 = arith.constant 0 : index
    %c0_119 = arith.constant 0 : index
    %147 = vector.load %arg8[%c3_117, %c0_118, %c0_119] : memref<16x25x120xf32, #tpu.memory_space<vmem>>, vector<1x25x120xf32>
    %148 = vector.shape_cast %147 : vector<1x25x120xf32> to vector<25x120xf32>
    %cst_120 = arith.constant dense<0.000000e+00> : vector<1x120xf32>
    %149 = tpu.matmul %146, %148, %cst_120 {dimension_numbers = #tpu.dot_dimension_numbers<[1], [0], [0], [1], [0, 0, 1, 1], [], []>} : vector<1x25xf32>, vector<25x120xf32>, vector<1x120xf32> -> vector<1x120xf32>
    %150 = arith.addf %145, %149 : vector<1x120xf32>
    %151 = vector.extract_strided_slice %129 {offsets = [4, 0], sizes = [1, 25], strides = [1, 1]} : vector<16x25xf32> to vector<1x25xf32>
    %c4_121 = arith.constant 4 : index
    %c0_122 = arith.constant 0 : index
    %c0_123 = arith.constant 0 : index
    %152 = vector.load %arg8[%c4_121, %c0_122, %c0_123] : memref<16x25x120xf32, #tpu.memory_space<vmem>>, vector<1x25x120xf32>
    %153 = vector.shape_cast %152 : vector<1x25x120xf32> to vector<25x120xf32>
    %cst_124 = arith.constant dense<0.000000e+00> : vector<1x120xf32>
    %154 = tpu.matmul %151, %153, %cst_124 {dimension_numbers = #tpu.dot_dimension_numbers<[1], [0], [0], [1], [0, 0, 1, 1], [], []>} : vector<1x25xf32>, vector<25x120xf32>, vector<1x120xf32> -> vector<1x120xf32>
    %155 = arith.addf %150, %154 : vector<1x120xf32>
    %156 = vector.extract_strided_slice %129 {offsets = [5, 0], sizes = [1, 25], strides = [1, 1]} : vector<16x25xf32> to vector<1x25xf32>
    %c5_125 = arith.constant 5 : index
    %c0_126 = arith.constant 0 : index
    %c0_127 = arith.constant 0 : index
    %157 = vector.load %arg8[%c5_125, %c0_126, %c0_127] : memref<16x25x120xf32, #tpu.memory_space<vmem>>, vector<1x25x120xf32>
    %158 = vector.shape_cast %157 : vector<1x25x120xf32> to vector<25x120xf32>
    %cst_128 = arith.constant dense<0.000000e+00> : vector<1x120xf32>
    %159 = tpu.matmul %156, %158, %cst_128 {dimension_numbers = #tpu.dot_dimension_numbers<[1], [0], [0], [1], [0, 0, 1, 1], [], []>} : vector<1x25xf32>, vector<25x120xf32>, vector<1x120xf32> -> vector<1x120xf32>
    %160 = arith.addf %155, %159 : vector<1x120xf32>
    %161 = vector.extract_strided_slice %129 {offsets = [6, 0], sizes = [1, 25], strides = [1, 1]} : vector<16x25xf32> to vector<1x25xf32>
    %c6_129 = arith.constant 6 : index
    %c0_130 = arith.constant 0 : index
    %c0_131 = arith.constant 0 : index
    %162 = vector.load %arg8[%c6_129, %c0_130, %c0_131] : memref<16x25x120xf32, #tpu.memory_space<vmem>>, vector<1x25x120xf32>
    %163 = vector.shape_cast %162 : vector<1x25x120xf32> to vector<25x120xf32>
    %cst_132 = arith.constant dense<0.000000e+00> : vector<1x120xf32>
    %164 = tpu.matmul %161, %163, %cst_132 {dimension_numbers = #tpu.dot_dimension_numbers<[1], [0], [0], [1], [0, 0, 1, 1], [], []>} : vector<1x25xf32>, vector<25x120xf32>, vector<1x120xf32> -> vector<1x120xf32>
    %165 = arith.addf %160, %164 : vector<1x120xf32>
    %166 = vector.extract_strided_slice %129 {offsets = [7, 0], sizes = [1, 25], strides = [1, 1]} : vector<16x25xf32> to vector<1x25xf32>
    %c7_133 = arith.constant 7 : index
    %c0_134 = arith.constant 0 : index
    %c0_135 = arith.constant 0 : index
    %167 = vector.load %arg8[%c7_133, %c0_134, %c0_135] : memref<16x25x120xf32, #tpu.memory_space<vmem>>, vector<1x25x120xf32>
    %168 = vector.shape_cast %167 : vector<1x25x120xf32> to vector<25x120xf32>
    %cst_136 = arith.constant dense<0.000000e+00> : vector<1x120xf32>
    %169 = tpu.matmul %166, %168, %cst_136 {dimension_numbers = #tpu.dot_dimension_numbers<[1], [0], [0], [1], [0, 0, 1, 1], [], []>} : vector<1x25xf32>, vector<25x120xf32>, vector<1x120xf32> -> vector<1x120xf32>
    %170 = arith.addf %165, %169 : vector<1x120xf32>
    %171 = vector.extract_strided_slice %129 {offsets = [8, 0], sizes = [1, 25], strides = [1, 1]} : vector<16x25xf32> to vector<1x25xf32>
    %c8_137 = arith.constant 8 : index
    %c0_138 = arith.constant 0 : index
    %c0_139 = arith.constant 0 : index
    %172 = vector.load %arg8[%c8_137, %c0_138, %c0_139] : memref<16x25x120xf32, #tpu.memory_space<vmem>>, vector<1x25x120xf32>
    %173 = vector.shape_cast %172 : vector<1x25x120xf32> to vector<25x120xf32>
    %cst_140 = arith.constant dense<0.000000e+00> : vector<1x120xf32>
    %174 = tpu.matmul %171, %173, %cst_140 {dimension_numbers = #tpu.dot_dimension_numbers<[1], [0], [0], [1], [0, 0, 1, 1], [], []>} : vector<1x25xf32>, vector<25x120xf32>, vector<1x120xf32> -> vector<1x120xf32>
    %175 = arith.addf %170, %174 : vector<1x120xf32>
    %176 = vector.extract_strided_slice %129 {offsets = [9, 0], sizes = [1, 25], strides = [1, 1]} : vector<16x25xf32> to vector<1x25xf32>
    %c9 = arith.constant 9 : index
    %c0_141 = arith.constant 0 : index
    %c0_142 = arith.constant 0 : index
    %177 = vector.load %arg8[%c9, %c0_141, %c0_142] : memref<16x25x120xf32, #tpu.memory_space<vmem>>, vector<1x25x120xf32>
    %178 = vector.shape_cast %177 : vector<1x25x120xf32> to vector<25x120xf32>
    %cst_143 = arith.constant dense<0.000000e+00> : vector<1x120xf32>
    %179 = tpu.matmul %176, %178, %cst_143 {dimension_numbers = #tpu.dot_dimension_numbers<[1], [0], [0], [1], [0, 0, 1, 1], [], []>} : vector<1x25xf32>, vector<25x120xf32>, vector<1x120xf32> -> vector<1x120xf32>
    %180 = arith.addf %175, %179 : vector<1x120xf32>
    %181 = vector.extract_strided_slice %129 {offsets = [10, 0], sizes = [1, 25], strides = [1, 1]} : vector<16x25xf32> to vector<1x25xf32>
    %c10 = arith.constant 10 : index
    %c0_144 = arith.constant 0 : index
    %c0_145 = arith.constant 0 : index
    %182 = vector.load %arg8[%c10, %c0_144, %c0_145] : memref<16x25x120xf32, #tpu.memory_space<vmem>>, vector<1x25x120xf32>
    %183 = vector.shape_cast %182 : vector<1x25x120xf32> to vector<25x120xf32>
    %cst_146 = arith.constant dense<0.000000e+00> : vector<1x120xf32>
    %184 = tpu.matmul %181, %183, %cst_146 {dimension_numbers = #tpu.dot_dimension_numbers<[1], [0], [0], [1], [0, 0, 1, 1], [], []>} : vector<1x25xf32>, vector<25x120xf32>, vector<1x120xf32> -> vector<1x120xf32>
    %185 = arith.addf %180, %184 : vector<1x120xf32>
    %186 = vector.extract_strided_slice %129 {offsets = [11, 0], sizes = [1, 25], strides = [1, 1]} : vector<16x25xf32> to vector<1x25xf32>
    %c11 = arith.constant 11 : index
    %c0_147 = arith.constant 0 : index
    %c0_148 = arith.constant 0 : index
    %187 = vector.load %arg8[%c11, %c0_147, %c0_148] : memref<16x25x120xf32, #tpu.memory_space<vmem>>, vector<1x25x120xf32>
    %188 = vector.shape_cast %187 : vector<1x25x120xf32> to vector<25x120xf32>
    %cst_149 = arith.constant dense<0.000000e+00> : vector<1x120xf32>
    %189 = tpu.matmul %186, %188, %cst_149 {dimension_numbers = #tpu.dot_dimension_numbers<[1], [0], [0], [1], [0, 0, 1, 1], [], []>} : vector<1x25xf32>, vector<25x120xf32>, vector<1x120xf32> -> vector<1x120xf32>
    %190 = arith.addf %185, %189 : vector<1x120xf32>
    %191 = vector.extract_strided_slice %129 {offsets = [12, 0], sizes = [1, 25], strides = [1, 1]} : vector<16x25xf32> to vector<1x25xf32>
    %c12 = arith.constant 12 : index
    %c0_150 = arith.constant 0 : index
    %c0_151 = arith.constant 0 : index
    %192 = vector.load %arg8[%c12, %c0_150, %c0_151] : memref<16x25x120xf32, #tpu.memory_space<vmem>>, vector<1x25x120xf32>
    %193 = vector.shape_cast %192 : vector<1x25x120xf32> to vector<25x120xf32>
    %cst_152 = arith.constant dense<0.000000e+00> : vector<1x120xf32>
    %194 = tpu.matmul %191, %193, %cst_152 {dimension_numbers = #tpu.dot_dimension_numbers<[1], [0], [0], [1], [0, 0, 1, 1], [], []>} : vector<1x25xf32>, vector<25x120xf32>, vector<1x120xf32> -> vector<1x120xf32>
    %195 = arith.addf %190, %194 : vector<1x120xf32>
    %196 = vector.extract_strided_slice %129 {offsets = [13, 0], sizes = [1, 25], strides = [1, 1]} : vector<16x25xf32> to vector<1x25xf32>
    %c13 = arith.constant 13 : index
    %c0_153 = arith.constant 0 : index
    %c0_154 = arith.constant 0 : index
    %197 = vector.load %arg8[%c13, %c0_153, %c0_154] : memref<16x25x120xf32, #tpu.memory_space<vmem>>, vector<1x25x120xf32>
    %198 = vector.shape_cast %197 : vector<1x25x120xf32> to vector<25x120xf32>
    %cst_155 = arith.constant dense<0.000000e+00> : vector<1x120xf32>
    %199 = tpu.matmul %196, %198, %cst_155 {dimension_numbers = #tpu.dot_dimension_numbers<[1], [0], [0], [1], [0, 0, 1, 1], [], []>} : vector<1x25xf32>, vector<25x120xf32>, vector<1x120xf32> -> vector<1x120xf32>
    %200 = arith.addf %195, %199 : vector<1x120xf32>
    %201 = vector.extract_strided_slice %129 {offsets = [14, 0], sizes = [1, 25], strides = [1, 1]} : vector<16x25xf32> to vector<1x25xf32>
    %c14 = arith.constant 14 : index
    %c0_156 = arith.constant 0 : index
    %c0_157 = arith.constant 0 : index
    %202 = vector.load %arg8[%c14, %c0_156, %c0_157] : memref<16x25x120xf32, #tpu.memory_space<vmem>>, vector<1x25x120xf32>
    %203 = vector.shape_cast %202 : vector<1x25x120xf32> to vector<25x120xf32>
    %cst_158 = arith.constant dense<0.000000e+00> : vector<1x120xf32>
    %204 = tpu.matmul %201, %203, %cst_158 {dimension_numbers = #tpu.dot_dimension_numbers<[1], [0], [0], [1], [0, 0, 1, 1], [], []>} : vector<1x25xf32>, vector<25x120xf32>, vector<1x120xf32> -> vector<1x120xf32>
    %205 = arith.addf %200, %204 : vector<1x120xf32>
    %206 = vector.extract_strided_slice %129 {offsets = [15, 0], sizes = [1, 25], strides = [1, 1]} : vector<16x25xf32> to vector<1x25xf32>
    %c15 = arith.constant 15 : index
    %c0_159 = arith.constant 0 : index
    %c0_160 = arith.constant 0 : index
    %207 = vector.load %arg8[%c15, %c0_159, %c0_160] : memref<16x25x120xf32, #tpu.memory_space<vmem>>, vector<1x25x120xf32>
    %208 = vector.shape_cast %207 : vector<1x25x120xf32> to vector<25x120xf32>
    %cst_161 = arith.constant dense<0.000000e+00> : vector<1x120xf32>
    %209 = tpu.matmul %206, %208, %cst_161 {dimension_numbers = #tpu.dot_dimension_numbers<[1], [0], [0], [1], [0, 0, 1, 1], [], []>} : vector<1x25xf32>, vector<25x120xf32>, vector<1x120xf32> -> vector<1x120xf32>
    %210 = arith.addf %205, %209 : vector<1x120xf32>
    %cst_162 = arith.constant 0.000000e+00 : f32
    %211 = vector.broadcast %cst_162 : f32 to vector<1x120xf32>
    %212 = arith.maximumf %210, %211 : vector<1x120xf32>
    %c0_163 = arith.constant 0 : index
    %c0_164 = arith.constant 0 : index
    %213 = vector.load %arg10[%c0_163, %c0_164] : memref<120x84xf32, #tpu.memory_space<vmem>>, vector<120x84xf32>
    %cst_165 = arith.constant dense<0.000000e+00> : vector<1x84xf32>
    %214 = tpu.matmul %212, %213, %cst_165 {dimension_numbers = #tpu.dot_dimension_numbers<[1], [0], [0], [1], [0, 0, 1, 1], [], []>} : vector<1x120xf32>, vector<120x84xf32>, vector<1x84xf32> -> vector<1x84xf32>
    %c0_166 = arith.constant 0 : index
    %c0_167 = arith.constant 0 : index
    %215 = vector.load %arg11[%c0_166, %c0_167] : memref<1x84xf32, #tpu.memory_space<vmem>>, vector<1x84xf32>
    %216 = arith.addf %214, %215 : vector<1x84xf32>
    %cst_168 = arith.constant 0.000000e+00 : f32
    %217 = vector.broadcast %cst_168 : f32 to vector<1x84xf32>
    %218 = arith.maximumf %216, %217 : vector<1x84xf32>
    %c0_169 = arith.constant 0 : index
    %c0_170 = arith.constant 0 : index
    %219 = vector.load %arg12[%c0_169, %c0_170] : memref<84x10xf32, #tpu.memory_space<vmem>>, vector<84x10xf32>
    %cst_171 = arith.constant dense<0.000000e+00> : vector<1x10xf32>
    %220 = tpu.matmul %218, %219, %cst_171 {dimension_numbers = #tpu.dot_dimension_numbers<[1], [0], [0], [1], [0, 0, 1, 1], [], []>} : vector<1x84xf32>, vector<84x10xf32>, vector<1x10xf32> -> vector<1x10xf32>
    %c0_172 = arith.constant 0 : index
    %c0_173 = arith.constant 0 : index
    %221 = vector.load %arg13[%c0_172, %c0_173] : memref<1x10xf32, #tpu.memory_space<vmem>>, vector<1x10xf32>
    %222 = arith.addf %220, %221 : vector<1x10xf32>
    %c0_174 = arith.constant 0 : index
    %c0_175 = arith.constant 0 : index
    %c0_176 = arith.constant 0 : index
    %223 = vector.load %arg14[%c0_174, %c0_175, %c0_176] : memref<1x1x10xf32, #tpu.memory_space<vmem>>, vector<1x1x10xf32>
    %224 = vector.shape_cast %223 : vector<1x1x10xf32> to vector<1x10xf32>
    %225 = vector.shape_cast %222 : vector<1x10xf32> to vector<1x1x10xf32>
    tpu.vector_store %arg14[%c0_174, %c0_175, %c0_176], %225 {strides = array<i32>} : memref<1x1x10xf32, #tpu.memory_space<vmem>>, vector<1x1x10xf32>,
    return
  }
  func.func @transform_0(%arg0: i32) -> (i32, i32, i32) {
    %c0_i32 = arith.constant 0 : i32
    %c0_i32_0 = arith.constant 0 : i32
    %c0_i32_1 = arith.constant 0 : i32
    return %arg0, %c0_i32, %c0_i32_0 : i32, i32, i32
  }
  func.func @transform_1(%arg0: i32) -> (i32, i32, i32) {
    %c0_i32 = arith.constant 0 : i32
    %c0_i32_0 = arith.constant 0 : i32
    %c0_i32_1 = arith.constant 0 : i32
    %c0_i32_2 = arith.constant 0 : i32
    return %c0_i32, %c0_i32_0, %c0_i32_1 : i32, i32, i32
  }
  func.func @transform_2(%arg0: i32) -> (i32, i32) {
    %c0_i32 = arith.constant 0 : i32
    %c0_i32_0 = arith.constant 0 : i32
    %c0_i32_1 = arith.constant 0 : i32
    return %c0_i32, %c0_i32_0 : i32, i32
  }
  func.func @transform_3(%arg0: i32) -> (i32, i32, i32) {
    %c0_i32 = arith.constant 0 : i32
    %c0_i32_0 = arith.constant 0 : i32
    %c0_i32_1 = arith.constant 0 : i32
    %c0_i32_2 = arith.constant 0 : i32
    return %c0_i32, %c0_i32_0, %c0_i32_1 : i32, i32, i32
  }
  func.func @transform_4(%arg0: i32) -> (i32, i32, i32) {
    %c0_i32 = arith.constant 0 : i32
    %c0_i32_0 = arith.constant 0 : i32
    %c0_i32_1 = arith.constant 0 : i32
    %c0_i32_2 = arith.constant 0 : i32
    return %c0_i32, %c0_i32_0, %c0_i32_1 : i32, i32, i32
  }
  func.func @transform_5(%arg0: i32) -> (i32, i32) {
    %c0_i32 = arith.constant 0 : i32
    %c0_i32_0 = arith.constant 0 : i32
    %c0_i32_1 = arith.constant 0 : i32
    return %c0_i32, %c0_i32_0 : i32, i32
  }
  func.func @transform_6(%arg0: i32) -> (i32, i32, i32) {
    %c0_i32 = arith.constant 0 : i32
    %c0_i32_0 = arith.constant 0 : i32
    %c0_i32_1 = arith.constant 0 : i32
    %c0_i32_2 = arith.constant 0 : i32
    return %c0_i32, %c0_i32_0, %c0_i32_1 : i32, i32, i32
  }
  func.func @transform_7(%arg0: i32) -> (i32, i32, i32) {
    %c0_i32 = arith.constant 0 : i32
    %c0_i32_0 = arith.constant 0 : i32
    %c0_i32_1 = arith.constant 0 : i32
    %c0_i32_2 = arith.constant 0 : i32
    return %c0_i32, %c0_i32_0, %c0_i32_1 : i32, i32, i32
  }
  func.func @transform_8(%arg0: i32) -> (i32, i32) {
    %c0_i32 = arith.constant 0 : i32
    %c0_i32_0 = arith.constant 0 : i32
    %c0_i32_1 = arith.constant 0 : i32
    return %c0_i32, %c0_i32_0 : i32, i32
  }
  func.func @transform_9(%arg0: i32) -> (i32, i32) {
    %c0_i32 = arith.constant 0 : i32
    %c0_i32_0 = arith.constant 0 : i32
    %c0_i32_1 = arith.constant 0 : i32
    return %c0_i32, %c0_i32_0 : i32, i32
  }
  func.func @transform_10(%arg0: i32) -> (i32, i32) {
    %c0_i32 = arith.constant 0 : i32
    %c0_i32_0 = arith.constant 0 : i32
    %c0_i32_1 = arith.constant 0 : i32
    return %c0_i32, %c0_i32_0 : i32, i32
  }
  func.func @transform_11(%arg0: i32) -> (i32, i32) {
    %c0_i32 = arith.constant 0 : i32
    %c0_i32_0 = arith.constant 0 : i32
    %c0_i32_1 = arith.constant 0 : i32
    return %c0_i32, %c0_i32_0 : i32, i32
  }
  func.func @transform_12(%arg0: i32) -> (i32, i32) {
    %c0_i32 = arith.constant 0 : i32
    %c0_i32_0 = arith.constant 0 : i32
    %c0_i32_1 = arith.constant 0 : i32
    return %c0_i32, %c0_i32_0 : i32, i32
  }
  func.func @transform_13(%arg0: i32) -> (i32, i32, i32) {
    %c0_i32 = arith.constant 0 : i32
    %c0_i32_0 = arith.constant 0 : i32
    %c0_i32_1 = arith.constant 0 : i32
    return %arg0, %c0_i32, %c0_i32_0 : i32, i32, i32
  }
}

</mosaic_0001>

<bundles_post_ra>
// kernel: cnn_forward.1
= control target key start
LH: loop header
LB: loop body
LE: loop exit
PB: predicated region body
PF: predicated region fallthrough
CT: control target
= control target key end

     0   :  { %s14921_s0 = inlined_call_operand.vmem [shape: f32[2,1,842], index: 0, kind: input, shape index: {}]   ;;  %s14922_s1 = inlined_call_operand.vmem [shape: f32[9,6,1], index: 1, kind: input, shape index: {}]   ;;  %s14923_s2 = inlined_call_operand.vmem [shape: f32[6,1], index: 2, kind: input, shape index: {}]   ;;  %s14924_s3 = inlined_call_operand.vmem [shape: f32[4,784,197], index: 3, kind: input, shape index: {}]   ;;  %s14925_s4 = inlined_call_operand.vmem [shape: f32[9,16,6], index: 4, kind: input, shape index: {}]   ;;  %s14926_s5 = inlined_call_operand.vmem [shape: f32[16,1], index: 5, kind: input, shape index: {}]   ;;  %s14927_s6 = inlined_call_operand.vmem [shape: f32[4,169,25], index: 6, kind: input, shape index: {}]   ;;  %s14928_s7 = inlined_call_operand.vmem [shape: f32[16,25,120], index: 7, kind: input, shape index: {}]   ;;  %s14929_s8 = inlined_call_operand.vmem [shape: f32[1,120], index: 8, kind: input, shape index: {}]   ;;  %s14930_s9 = inlined_call_operand.vmem [shape: f32[120,84], index: 9, kind: input, shape index: {}]   ;;  %s14931_s10 = inlined_call_operand.vmem [shape: f32[1,84], index: 10, kind: input, shape index: {}]   ;;  %s14932_s11 = inlined_call_operand.vmem [shape: f32[84,10], index: 11, kind: input, shape index: {}]   ;;  %s14933_s12 = inlined_call_operand.vmem [shape: f32[1,10], index: 12, kind: input, shape index: {}]   ;;  %s14934_s13 = inlined_call_operand.hbm [shape: f32[2,1,10], index: 13, kind: output, shape index: {}]  }
   0x1   :  { %14942 = sst [smem:[#allocation7_spill]] %s14921_s0 }
   0x2   :  { %14943 = sst [smem:[#allocation8_spill]] %s14922_s1 }
   0x3   :  { %18 = vsyncpa [#allocation3], 0 }
   0x4   :  { %20 = vsyncpa [#allocation3 + $0x1], 0  ;;  %s10995_s25 = smov 0   ;;  %s10997_s26 = smov 0  }
   0x5   :  { %s10999_s27 = smov 0   ;;  %s11001_s28 = smov 0  }
   0x6 LB: > { %14944 = sst [smem:[#allocation5_spill]] %s10900_s27  ;;  %s11016_s29 = sadd.s32 4294967295, %s10904_s28   ;;  %s10904_s28 = sphi %s11001_s28, %s14959_s28   ;;  %s10900_s27 = sphi %s10999_s27, %s14956_s27   ;;  %s10896_s26 = sphi %s10997_s26, %s14958_s26   ;;  %s10892_s25 = sphi %s10995_s25, %s14957_s25  }
   0x7   : > { %s8227_s30 = sadd.s32 4294967294, %s10904_s28   ;;  %s11020_s14 = sadd.s32 1, %s10904_s28  }
   0x8   : > { %s311_s15 = sadd.s32 1, %s10900_s27  ;;  %s308_s16 = ssub.s32 %s10904_s28, %s11020_s14 }
   0x9   : > { %p321_p0 = scmp.ne.s32.totalorder %s10900_s27, %s10896_s26  ;;  %p309_p1 = scmp.eq.s32.totalorder %s308_s16, 0 }
   0xa   : > { %p322_p2 = scmp.eq.s32.totalorder %s11016_s29, 1  ;;  %p327_p3 = scmp.ne.s32.totalorder %s10896_s26, %s10892_s25 }
   0xb   : > { %p328_p4 = scmp.eq.s32.totalorder %s8227_s30, 1  ;;  %p8230_p7 = scmp.ge.s32.totalorder %s10904_s28, 1 }
   0xc   : > { %s11031_s17 = scalar_select %p309_p1, %s10900_s27, %s311_s15  }
   0xd   : > { %p11033_p5 = por %p322_p2, %p321_p0  ;;  %p11037_p6 = por %p328_p4, %p327_p3 }
   0xe   : > { %14945 = sst [smem:[#allocation6_spill]] %s11031_s17  ;;  %p389_p8 = scmp.lt.s32.totalorder %s10904_s28, 3 }
  0x10   : > { %p390_p9 = pnand %p8230_p7, %p389_p8 }
  0x11   : > { %p431_p10 = scmp.lt.s32.totalorder (!%p390_p9), %s11016_s29, 1  ;;  %v440_v0 = vlaneseq (!%p390_p9)  ;;  %v10906_v2 = vmov (!%p390_p9), 0.0   ;;  %s14948_s0 = sld [smem:[#allocation7_spill]] (!%p390_p9)  ;;  %vm482_vm0 = vcmask (!%p390_p9), 1039360   ;;  %vm493_vm1 = vcmask (!%p390_p9), 1040384  }
  0x12   : > { %393 = sbr.rel (%p390_p9) target bundleno = 2524 (0x9dc), region = 72  ;;  %572 = vmatprep.mubr.f32.mxu0 (!%p390_p9), %v10906_v2  ;;  %643 = vmatprep.mubr.f32.mxu1 (!%p390_p9), %v10906_v2  ;;  %s14937_s30 = smov (!%p390_p9), 127   ;;  %vm489_vm2 = vcmask (!%p390_p9), 7168   ;;  %vm1107_vm3 = vcmask (!%p390_p9), 1031168   ;;  %vm1437_vm4 = vcmask (!%p390_p9), 818176   ;;  %vm1767_vm5 = vcmask (!%p390_p9), 809984  }
  0x13   : > { %v441_v1 = vshrl.u32 (!%p390_p9), %v440_v0, 7  ;;  %s14939_s15 = smov (!%p390_p9), 126   ;;  %s14935_s16 = smov (!%p390_p9), 100   ;;  %vm2097_vm6 = vcmask (!%p390_p9), 801792   ;;  %vm2427_vm7 = vcmask (!%p390_p9), 588800   ;;  %vm2757_vm8 = vcmask (!%p390_p9), 580608  }
  0x14   : > { %s10912_s22 = smov (!%p390_p9), 72   ;;  %s10913_s23 = smov (!%p390_p9), 71   ;;  %vm3087_vm9 = vcmask (!%p390_p9), 572416   ;;  %vm10915_vm10 = vmmov (!%p390_p9), 0   ;;  %vm3597_vm11 = vcmask (!%p390_p9), 130048   ;;  %vm5363_vm12 = vcmask (!%p390_p9), 1045504  }
  0x15   : > { %v446_v3 = vsub.s32 (!%p390_p9), 1, %v441_v1  ;;  %v442_v4 = vsub.s32 (!%p390_p9), 0, %v441_v1  ;;  %v454_v5 = vsub.s32 (!%p390_p9), 3, %v441_v1  ;;  %v450_v6 = vsub.s32 (!%p390_p9), 2, %v441_v1  ;;  %s14949_s1 = sld [smem:[#allocation8_spill]] (!%p390_p9)  ;;  %s14951_s27 = smov (!%p390_p9), 127  }
  0x16   : > { %v462_v7 = vsub.s32 (!%p390_p9), 5, %v441_v1  ;;  %v466_v14 = vsub.s32 (!%p390_p9), 6, %v441_v1  ;;  %v458_v15 = vsub.s32 (!%p390_p9), 4, %v441_v1  ;;  %vm5356_vm13 = vcmask (!%p390_p9), 48128  }
  0x17   : > { %vm5638_vm14 = vcmask (!%p390_p9), 941056   ;;  %vm5738_vm15 = vcmask (!%p390_p9), 932864  }
  0x19   : > { %s432_s20 = scalar_select %p431_p10, %s11016_s29, 1 }
  0x1b   : > { %s10782_s21 = smul.u32 7, %s432_s20  ;;  %s10910_s20 = smov 99   ;;  %v11155_v23 = vld [vmem:[%s14949_s1 + $0x8] sm:$0x3f]  ;;  %v11185_v31 = vld [vmem:[%s14949_s1] sm:$0x3f] }
  0x1c   : > { %v11211_v39 = vld [vmem:[%s14949_s1 + $0x10] sm:$0x3f]  ;;  %v11232_v47 = vld [vmem:[%s14949_s1 + $0x18] sm:$0x3f]  ;;  %v11259_v57 = vld [vmem:[%s14949_s1 + $0x20] sm:$0x3f] }
  0x1d   : > { %s434_s24 = scalar_lea.vmem %s14948_s0, %s10782_s21  ;;  %s10911_s21 = smov 98  }
  0x1e   : > { %v435_v8 = vld [vmem:[%s434_s24] sm:$0x7f]  ;;  %s10914_s24 = smov 70   ;;  %s10918_s0 = smov 114  }
  0x1f   : > { %v11050_v9 = vrot.slane %v435_v8, %v446_v3  ;;  %v11052_v10 = vrot.slane %v435_v8, %v442_v4  ;;  %v11054_v11 = vrot.slane %v435_v8, %v454_v5  ;;  %v11060_v12 = vrot.slane %v435_v8, %v450_v6  ;;  %v11287_v5 = vld [vmem:[%s14949_s1 + $0x28] sm:$0x3f] }
  0x20   : > { %v11062_v13 = vrot.slane %v435_v8, %v462_v7  ;;  %v11068_v16 = vrot.slane %v435_v8, %v466_v14  ;;  %v11070_v17 = vrot.slane %v435_v8, %v458_v15 }
  0x21   : > { %470 = vrot.lane.b32.xlu0 %v11050_v9, %s14937_s30  ;;  %468 = vrot.lane.b32.xlu1 %v11052_v10, %s14937_s30 }
  0x25   : > { %472 = vrot.lane.b32.xlu0 %v11060_v12, %s14937_s30  ;;  %478 = vrot.lane.b32.xlu1 %v11062_v13, %s14937_s30 }
  0x29   : > { %480 = vrot.lane.b32.xlu0 %v11068_v16, %s14937_s30  ;;  %476 = vrot.lane.b32.xlu1 %v11070_v17, %s14937_s30 }
  0x2d   : > { %1095 = vrot.lane.b32.xlu0 %v11050_v9, %s14939_s15  ;;  %1097 = vrot.lane.b32.xlu1 %v11060_v12, %s14939_s15 }
  0x31   : > { %1093 = vrot.lane.b32.xlu0 %v11052_v10, %s14939_s15  ;;  %1103 = vrot.lane.b32.xlu1 %v11062_v13, %s14939_s15 }
  0x35   : > { %1105 = vrot.lane.b32.xlu0 %v11068_v16, %s14939_s15  ;;  %1101 = vrot.lane.b32.xlu1 %v11070_v17, %s14939_s15 }
  0x39   : > { %1425 = vrot.lane.b32.xlu0 %v11050_v9, %s14935_s16  ;;  %1427 = vrot.lane.b32.xlu1 %v11060_v12, %s14935_s16 }
  0x3d   : > { %1423 = vrot.lane.b32.xlu0 %v11052_v10, %s14935_s16  ;;  %1433 = vrot.lane.b32.xlu1 %v11062_v13, %s14935_s16 }
  0x41   : > { %1435 = vrot.lane.b32.xlu0 %v11068_v16, %s14935_s16  ;;  %1431 = vrot.lane.b32.xlu1 %v11070_v17, %s14935_s16 }
  0x45   : > { %1755 = vrot.lane.b32.xlu0 %v11050_v9, %s10910_s20  ;;  %1757 = vrot.lane.b32.xlu1 %v11060_v12, %s10910_s20 }
  0x49   : > { %1753 = vrot.lane.b32.xlu0 %v11052_v10, %s10910_s20  ;;  %1763 = vrot.lane.b32.xlu1 %v11062_v13, %s10910_s20 }
  0x4d   : > { %1765 = vrot.lane.b32.xlu0 %v11068_v16, %s10910_s20  ;;  %1761 = vrot.lane.b32.xlu1 %v11070_v17, %s10910_s20 }
  0x51   : > { %2085 = vrot.lane.b32.xlu0 %v11050_v9, %s10911_s21  ;;  %2087 = vrot.lane.b32.xlu1 %v11060_v12, %s10911_s21 }
  0x55   : > { %2083 = vrot.lane.b32.xlu0 %v11052_v10, %s10911_s21  ;;  %2093 = vrot.lane.b32.xlu1 %v11062_v13, %s10911_s21 }
  0x59   : > { %2095 = vrot.lane.b32.xlu0 %v11068_v16, %s10911_s21  ;;  %2091 = vrot.lane.b32.xlu1 %v11070_v17, %s10911_s21 }
  0x5d   : > { %2415 = vrot.lane.b32.xlu0 %v11050_v9, %s10912_s22  ;;  %2417 = vrot.lane.b32.xlu1 %v11060_v12, %s10912_s22 }
  0x61   : > { %2413 = vrot.lane.b32.xlu0 %v11052_v10, %s10912_s22  ;;  %2423 = vrot.lane.b32.xlu1 %v11062_v13, %s10912_s22 }
  0x65   : > { %2425 = vrot.lane.b32.xlu0 %v11068_v16, %s10912_s22  ;;  %2421 = vrot.lane.b32.xlu1 %v11070_v17, %s10912_s22 }
  0x69   : > { %2745 = vrot.lane.b32.xlu0 %v11050_v9, %s10913_s23  ;;  %2747 = vrot.lane.b32.xlu1 %v11060_v12, %s10913_s23 }
  0x6d   : > { %2743 = vrot.lane.b32.xlu0 %v11052_v10, %s10913_s23  ;;  %2753 = vrot.lane.b32.xlu1 %v11062_v13, %s10913_s23 }
  0x71   : > { %2755 = vrot.lane.b32.xlu0 %v11068_v16, %s10913_s23  ;;  %2751 = vrot.lane.b32.xlu1 %v11070_v17, %s10913_s23 }
  0x75   : > { %474 = vrot.lane.b32.xlu0 %v11054_v11, %s14937_s30  ;;  %3075 = vrot.lane.b32.xlu1 %v11050_v9, %s10914_s24  ;;  %s10920_s30 = smov 102  }
  0x79   : > { %3077 = vrot.lane.b32.xlu0 %v11060_v12, %s10914_s24  ;;  %3073 = vrot.lane.b32.xlu1 %v11052_v10, %s10914_s24 }
  0x7d   : > { %1099 = vrot.lane.b32.xlu0 %v11054_v11, %s14939_s15  ;;  %1429 = vrot.lane.b32.xlu1 %v11054_v11, %s14935_s16  ;;  %s14950_s15 = smov 126  }
  0x81   : > { %1759 = vrot.lane.b32.xlu0 %v11054_v11, %s10910_s20  ;;  %2089 = vrot.lane.b32.xlu1 %v11054_v11, %s10911_s21  ;;  %s10919_s21 = smov 113   ;;  %s9155_s20 = sshll.u32 %s11016_s29, 4 }
  0x82   : > { %s10924_s29 = smov [#allocation2]  }
  0x85   : > { %2419 = vrot.lane.b32.xlu0 %v11054_v11, %s10912_s22  ;;  %2749 = vrot.lane.b32.xlu1 %v11054_v11, %s10913_s23  ;;  %s10921_s22 = smov 101   ;;  %s14952_s23 = smov 100  }
  0x89   : > { %3079 = vrot.lane.b32.xlu0 %v11054_v11, %s10914_s24  ;;  %3081 = vrot.lane.b32.xlu1 %v11070_v17, %s10914_s24 }
  0x8d   : > { %3083 = vrot.lane.b32.xlu0 %v11062_v13, %s10914_s24  ;;  %3085 = vrot.lane.b32.xlu1 %v11068_v16, %s10914_s24  ;;  %s10917_s24 = smov 115  }
  0x93   : > { %v471_v18 = vpop.permute.xlu0 %470  ;;  %v469_v19 = vpop.permute.xlu1 %468 }
  0x94   : > { %v483_v24 = vsel %vm482_vm0, %v469_v19, %v471_v18  ;;  %v11315_v19 = vld [vmem:[%s14949_s1 + $0x30] sm:$0x3f] }
  0x97   : > { %v11148_v20 = vpop.permute.xlu0 %472  ;;  %v479_v21 = vpop.permute.xlu1 %478 }
  0x98   : > { %v484_v22 = vsel %vm482_vm0, %v471_v18, %v11148_v20 }
  0x99   : > { %8232 = vmatprep.subr.msk.mxu0 %vm493_vm1, %v484_v22 }
  0x9a   : > { %8233 = vmatpush1.msk.msra.mxu0 %vm493_vm1, %v483_v24 }
  0x9b   : > { %v11160_v25 = vpop.permute.xlu0 %480  ;;  %8234 = vmatmul.mubr.msk.f32.vlgmr.msra.gmra.mrb[0].mxu0 %vm489_vm2, %v11155_v23  ;;  %v11164_v26 = vpop.permute.xlu1 %476 }
  0x9c   : > { %v488_v27 = vsel %vm482_vm0, %v479_v21, %v11160_v25  ;;  %v487_v28 = vsel %vm482_vm0, %v11164_v26, %v479_v21  ;;  %714 = vmatprep.mubr.f32.mxu0 %v10906_v2 }
  0x9d   : > { %8238 = vmatprep.subr.msk.mxu0 %vm493_vm1, %v488_v27 }
  0x9e   : > { %8239 = vmatpush1.msk.msra.mxu0 %vm493_vm1, %v487_v28 }
  0x9f   : > { %v1096_v29 = vpop.permute.xlu0 %1095  ;;  %8240 = vmatmul.mubr.msk.f32.vlgmr.msra.gmra.mrb[2].mxu0 %vm489_vm2, %v11155_v23  ;;  %v11175_v30 = vpop.permute.xlu1 %1097  ;;  %8243 = vmatprep.subr.msk.mxu0 %vm493_vm1, %v11050_v9 }
  0xa0   : > { %8244 = vmatpush1.msk.msra.mxu0 %vm493_vm1, %v11052_v10  ;;  %872 = vmatprep.mubr.f32.mxu0 %v10906_v2  ;;  %v1109_v34 = vsel %vm1107_vm3, %v1096_v29, %v11175_v30 }
  0xa1   : > { %8249 = vmatprep.subr.msk.mxu0 %vm493_vm1, %v11062_v13 }
  0xa3   : > { %v1094_v32 = vpop.permute.xlu0 %1093  ;;  %8245 = vmatmul.mubr.msk.f32.vlgmr.msra.gmra.mrb[0].mxu0 %vm489_vm2, %v11185_v31  ;;  %v1104_v33 = vpop.permute.xlu1 %1103 }
  0xa4   : > { %8250 = vmatpush1.msk.msra.mxu0 %vm493_vm1, %v11070_v17  ;;  %1014 = vmatprep.mubr.f32.mxu0 %v10906_v2  ;;  %v1108_v35 = vsel %vm1107_vm3, %v1094_v32, %v1096_v29 }
  0xa5   : > { %8255 = vmatprep.subr.msk.mxu0 %vm493_vm1, %v1109_v34 }
  0xa7   : > { %v11198_v36 = vpop.permute.xlu0 %1105  ;;  %8251 = vmatmul.mubr.msk.f32.vlgmr.msra.gmra.mrb[2].mxu0 %vm489_vm2, %v11185_v31  ;;  %v11202_v37 = vpop.permute.xlu1 %1101 }
  0xa8   : > { %v1113_v38 = vsel %vm1107_vm3, %v1104_v33, %v11198_v36  ;;  %8256 = vmatpush1.msk.msra.mxu0 %vm493_vm1, %v1108_v35  ;;  %1195 = vmatprep.mubr.f32.mxu0 %v10906_v2  ;;  %v1112_v40 = vsel %vm1107_vm3, %v11202_v37, %v1104_v33 }
  0xa9   : > { %8261 = vmatprep.subr.msk.mxu0 %vm493_vm1, %v1113_v38  ;;  %v11343_v38 = vld [vmem:[%s14949_s1 + $0x38] sm:$0x3f] }
  0xab   : > { %v1426_v41 = vpop.permute.xlu0 %1425  ;;  %8257 = vmatmul.mubr.msk.f32.vlgmr.msra.gmra.mrb[0].mxu0 %vm489_vm2, %v11211_v39  ;;  %v11218_v42 = vpop.permute.xlu1 %1427 }
  0xac   : > { %8262 = vmatpush1.msk.msra.mxu0 %vm493_vm1, %v1112_v40  ;;  %v1439_v43 = vsel %vm1437_vm4, %v1426_v41, %v11218_v42  ;;  %1337 = vmatprep.mubr.f32.mxu0 %v10906_v2 }
  0xad   : > { %8267 = vmatprep.subr.msk.mxu0 %vm493_vm1, %v1439_v43 }
  0xaf   : > { %v1424_v44 = vpop.permute.xlu0 %1423  ;;  %v1434_v45 = vpop.permute.xlu1 %1433  ;;  %8263 = vmatmul.mubr.msk.f32.vlgmr.msra.gmra.mrb[2].mxu0 %vm489_vm2, %v11211_v39 }
  0xb0   : > { %v1438_v46 = vsel %vm1437_vm4, %v1424_v44, %v1426_v41  ;;  %1525 = vmatprep.mubr.f32.mxu0 %v10906_v2 }
  0xb1   : > { %8268 = vmatpush1.msk.msra.mxu0 %vm493_vm1, %v1438_v46 }
  0xb3   : > { %v11235_v48 = vpop.permute.xlu0 %1435  ;;  %v11237_v49 = vpop.permute.xlu1 %1431  ;;  %8269 = vmatmul.mubr.msk.f32.vlgmr.msra.gmra.mrb[0].mxu0 %vm489_vm2, %v11232_v47 }
  0xb4   : > { %v1443_v50 = vsel %vm1437_vm4, %v1434_v45, %v11235_v48  ;;  %v1442_v51 = vsel %vm1437_vm4, %v11237_v49, %v1434_v45  ;;  %1667 = vmatprep.mubr.f32.mxu0 %v10906_v2 }
  0xb5   : > { %8273 = vmatprep.subr.msk.mxu0 %vm493_vm1, %v1443_v50 }
  0xb6   : > { %8274 = vmatpush1.msk.msra.mxu0 %vm493_vm1, %v1442_v51 }
  0xb7   : > { %v1756_v52 = vpop.permute.xlu0 %1755  ;;  %v11248_v53 = vpop.permute.xlu1 %1757  ;;  %8275 = vmatmul.mubr.msk.f32.vlgmr.msra.gmra.mrb[2].mxu0 %vm489_vm2, %v11232_v47 }
  0xb8   : > { %v1769_v54 = vsel %vm1767_vm5, %v1756_v52, %v11248_v53  ;;  %1855 = vmatprep.mubr.f32.mxu0 %v10906_v2 }
  0xb9   : > { %8279 = vmatprep.subr.msk.mxu0 %vm493_vm1, %v1769_v54 }
  0xbb   : > { %v1754_v55 = vpop.permute.xlu0 %1753  ;;  %v1764_v56 = vpop.permute.xlu1 %1763 }
  0xbc   : > { %v1768_v58 = vsel %vm1767_vm5, %v1754_v55, %v1756_v52 }
  0xbd   : > { %8280 = vmatpush1.msk.msra.mxu0 %vm493_vm1, %v1768_v58 }
  0xbe   : > { %8281 = vmatmul.mubr.msk.f32.vlgmr.msra.gmra.mrb[0].mxu0 %vm489_vm2, %v11259_v57 }
  0xbf   : > { %v11265_v59 = vpop.permute.xlu0 %1765  ;;  %v11267_v60 = vpop.permute.xlu1 %1761  ;;  %1997 = vmatprep.mubr.f32.mxu0 %v10906_v2 }
  0xc0   : > { %v1773_v61 = vsel %vm1767_vm5, %v1764_v56, %v11265_v59  ;;  %v1772_v62 = vsel %vm1767_vm5, %v11267_v60, %v1764_v56  ;;  %v11384_v56 = vld [vmem:[%s14949_s1 + $0x40] sm:$0x3f] }
  0xc1   : > { %8285 = vmatprep.subr.msk.mxu0 %vm493_vm1, %v1773_v61 }
  0xc2   : > { %8286 = vmatpush1.msk.msra.mxu0 %vm493_vm1, %v1772_v62 }
  0xc3   : > { %v2086_v63 = vpop.permute.xlu0 %2085  ;;  %v11276_v0 = vpop.permute.xlu1 %2087  ;;  %8287 = vmatmul.mubr.msk.f32.vlgmr.msra.gmra.mrb[2].mxu0 %vm489_vm2, %v11259_v57 }
  0xc4   : > { %v2099_v1 = vsel %vm2097_vm6, %v2086_v63, %v11276_v0  ;;  %2185 = vmatprep.mubr.f32.mxu0 %v10906_v2 }
  0xc5   : > { %8291 = vmatprep.subr.msk.mxu0 %vm493_vm1, %v2099_v1 }
  0xc7   : > { %v2084_v3 = vpop.permute.xlu0 %2083  ;;  %v2094_v4 = vpop.permute.xlu1 %2093 }
  0xc8   : > { %v2098_v6 = vsel %vm2097_vm6, %v2084_v3, %v2086_v63 }
  0xc9   : > { %8292 = vmatpush1.msk.msra.mxu0 %vm493_vm1, %v2098_v6  ;;  %v3404_v6 = vld [vmem:[%s14924_s3 + $0x18] sm:$0xff] }
  0xca   : > { %8293 = vmatmul.mubr.msk.f32.vlgmr.msra.gmra.mrb[0].mxu0 %vm489_vm2, %v11287_v5 }
  0xcb   : > { %v11293_v7 = vpop.permute.xlu0 %2095  ;;  %v11295_v8 = vpop.permute.xlu1 %2091  ;;  %2327 = vmatprep.mubr.f32.mxu0 %v10906_v2 }
  0xcc   : > { %v2103_v9 = vsel %vm2097_vm6, %v2094_v4, %v11293_v7  ;;  %v2102_v10 = vsel %vm2097_vm6, %v11295_v8, %v2094_v4  ;;  %v3402_v4 = vld [vmem:[%s14924_s3 + $0x8] sm:$0xff] }
  0xcd   : > { %8297 = vmatprep.subr.msk.mxu0 %vm493_vm1, %v2103_v9  ;;  %v3401_v9 = vld [vmem:[%s14924_s3] sm:$0xff] }
  0xce   : > { %8298 = vmatpush1.msk.msra.mxu0 %vm493_vm1, %v2102_v10  ;;  %v3403_v10 = vld [vmem:[%s14924_s3 + $0x10] sm:$0xff] }
  0xcf   : > { %v2416_v13 = vpop.permute.xlu0 %2415  ;;  %v11304_v14 = vpop.permute.xlu1 %2417  ;;  %8299 = vmatmul.mubr.msk.f32.vlgmr.msra.gmra.mrb[2].mxu0 %vm489_vm2, %v11287_v5 }
  0xd0   : > { %v2429_v15 = vsel %vm2427_vm7, %v2416_v13, %v11304_v14  ;;  %2515 = vmatprep.mubr.f32.mxu0 %v10906_v2 }
  0xd1   : > { %8303 = vmatprep.subr.msk.mxu0 %vm493_vm1, %v2429_v15  ;;  %v9563_v15 = vpack.c.bf16 %v3404_v6, %v3402_v4  ;;  %v3431_v4 = vld [vmem:[%s14924_s3 + $0xf0] sm:$0xff] }
  0xd3   : > { %v2414_v17 = vpop.permute.xlu0 %2413  ;;  %v2424_v18 = vpop.permute.xlu1 %2423 }
  0xd4   : > { %v2428_v21 = vsel %vm2427_vm7, %v2414_v17, %v2416_v13  ;;  %v9565_v17 = vpack.c.bf16 %v3403_v10, %v3401_v9  ;;  %v3438_v10 = vld [vmem:[%s14924_s3 + $0x128] sm:$0xff] }
  0xd5   : > { %8304 = vmatpush1.msk.msra.mxu0 %vm493_vm1, %v2428_v21  ;;  %v3405_v21 = vld [vmem:[%s14924_s3 + $0x20] sm:$0xff] }
  0xd6   : > { %8305 = vmatmul.mubr.msk.f32.vlgmr.msra.gmra.mrb[0].mxu0 %vm489_vm2, %v11315_v19 }
  0xd7   : > { %v11321_v22 = vpop.permute.xlu0 %2425  ;;  %v11323_v24 = vpop.permute.xlu1 %2421  ;;  %2657 = vmatprep.mubr.f32.mxu0 %v10906_v2 }
  0xd8   : > { %v2433_v27 = vsel %vm2427_vm7, %v2424_v18, %v11321_v22  ;;  %v2432_v28 = vsel %vm2427_vm7, %v11323_v24, %v2424_v18 }
  0xd9   : > { %8309 = vmatprep.subr.msk.mxu0 %vm493_vm1, %v2433_v27  ;;  %v3407_v27 = vld [vmem:[%s14924_s3 + $0x30] sm:$0xff] }
  0xda   : > { %8310 = vmatpush1.msk.msra.mxu0 %vm493_vm1, %v2432_v28  ;;  %v3410_v28 = vld [vmem:[%s14924_s3 + $0x48] sm:$0xff] }
  0xdb   : > { %v2746_v29 = vpop.permute.xlu0 %2745  ;;  %v11332_v32 = vpop.permute.xlu1 %2747  ;;  %8311 = vmatmul.mubr.msk.f32.vlgmr.msra.gmra.mrb[2].mxu0 %vm489_vm2, %v11315_v19 }
  0xdc   : > { %v2759_v33 = vsel %vm2757_vm8, %v2746_v29, %v11332_v32  ;;  %2845 = vmatprep.mubr.f32.mxu0 %v10906_v2 }
  0xdd   : > { %8315 = vmatprep.subr.msk.mxu0 %vm493_vm1, %v2759_v33  ;;  %v3409_v33 = vld [vmem:[%s14924_s3 + $0x40] sm:$0xff] }
  0xdf   : > { %v2744_v34 = vpop.permute.xlu0 %2743  ;;  %v2754_v35 = vpop.permute.xlu1 %2753 }
  0xe0   : > { %v2758_v40 = vsel %vm2757_vm8, %v2744_v34, %v2746_v29  ;;  %v3412_v29 = vld [vmem:[%s14924_s3 + $0x58] sm:$0xff]  ;;  %v3411_v34 = vld [vmem:[%s14924_s3 + $0x50] sm:$0xff] }
  0xe1   : > { %8316 = vmatpush1.msk.msra.mxu0 %vm493_vm1, %v2758_v40  ;;  %v9573_v40 = vpack.c.bf16 %v3411_v34, %v3409_v33  ;;  %v8344_v33 = vld [vmem:[%s14924_s3 + $0x648] sm:$0xff]  ;;  %v8346_v34 = vld [vmem:[%s14924_s3 + $0x658] sm:$0xff] }
  0xe2   : > { %8317 = vmatmul.mubr.msk.f32.vlgmr.msra.gmra.mrb[0].mxu0 %vm489_vm2, %v11343_v38 }
  0xe3   : > { %v11349_v41 = vpop.permute.xlu0 %2755  ;;  %v11351_v43 = vpop.permute.xlu1 %2751  ;;  %2987 = vmatprep.mubr.f32.mxu0 %v10906_v2 }
  0xe4   : > { %v2763_v44 = vsel %vm2757_vm8, %v2754_v35, %v11349_v41  ;;  %v2762_v45 = vsel %vm2757_vm8, %v11351_v43, %v2754_v35  ;;  %v3414_v35 = vld [vmem:[%s14924_s3 + $0x68] sm:$0xff] }
  0xe5   : > { %8321 = vmatprep.subr.msk.mxu0 %vm493_vm1, %v2763_v44 }
  0xe6   : > { %8322 = vmatpush1.msk.msra.mxu0 %vm493_vm1, %v2762_v45  ;;  %v3413_v45 = vld [vmem:[%s14924_s3 + $0x60] sm:$0xff] }
  0xe7   : > { %v475_v46 = vpop.permute.xlu0 %474  ;;  %v3076_v50 = vpop.permute.xlu1 %3075  ;;  %8323 = vmatmul.mubr.msk.f32.vlgmr.msra.gmra.mrb[2].mxu0 %vm489_vm2, %v11343_v38 }
  0xe8   : > { %v486_v51 = vsel %vm482_vm0, %v475_v46, %v11164_v26  ;;  %v485_v52 = vsel %vm482_vm0, %v11148_v20, %v475_v46  ;;  %3175 = vmatprep.mubr.f32.mxu0 %v10906_v2  ;;  %v3415_v46 = vld [vmem:[%s14924_s3 + $0x70] sm:$0xff] }
  0xe9   : > { %8235 = vmatprep.subr.msk.mxu1 %vm493_vm1, %v486_v51  ;;  %v3420_v51 = vld [vmem:[%s14924_s3 + $0x98] sm:$0xff] }
  0xea   : > { %8236 = vmatpush1.msk.msra.mxu1 %vm493_vm1, %v485_v52  ;;  %v9577_v52 = vpack.c.bf16 %v3415_v46, %v3413_v45  ;;  %v3450_v46 = vld [vmem:[%s14924_s3 + $0x188] sm:$0xff] }
  0xeb   : > { %v11369_v54 = vpop.permute.xlu0 %3077  ;;  %8237 = vmatmul.mubr.msk.f32.vlgmr.msra.gmra.mrb[0].mxu1 %vm489_vm2, %v11155_v23  ;;  %9284 = vmatprep.subr.mxu1 %v10906_v2  ;;  %v3074_v55 = vpop.permute.xlu1 %3073 }
  0xec   : > { %v3089_v26 = vsel %vm3087_vm9, %v3076_v50, %v11369_v54  ;;  %v3088_v20 = vsel %vm3087_vm9, %v3074_v55, %v3076_v50  ;;  %9285 = vmatpush3.msk.msra.mxu1 %vm493_vm1, %v11160_v25  ;;  %9286 = vmatprep.mubr.msk.f32.mxu1 %vm10915_vm10, %v10906_v2  ;;  %v3418_v50 = vld [vmem:[%s14924_s3 + $0x88] sm:$0xff]  ;;  %v3417_v55 = vld [vmem:[%s14924_s3 + $0x80] sm:$0xff] }
  0xed   : > { %8327 = vmatprep.subr.msk.mxu0 %vm493_vm1, %v3089_v26  ;;  %8246 = vmatprep.subr.msk.mxu1 %vm493_vm1, %v11054_v11  ;;  %v3419_v26 = vld [vmem:[%s14924_s3 + $0x90] sm:$0xff] }
  0xee   : > { %8328 = vmatpush1.msk.msra.mxu0 %vm493_vm1, %v3088_v20  ;;  %v3422_v20 = vld [vmem:[%s14924_s3 + $0xa8] sm:$0xff] }
  0xef   : > { %v1100_v58 = vpop.permute.xlu0 %1099  ;;  %9287 = vmatmul.mubr.msk.f32.vlgmr.msra.gmra.mrb[2].mxu1 %vm489_vm2, %v11155_v23  ;;  %8329 = vmatmul.mubr.msk.f32.vlgmr.msra.gmra.mrb[0].mxu0 %vm489_vm2, %v11384_v56  ;;  %v1430_v25 = vpop.permute.xlu1 %1429 }
  0xf0   : > { %8247 = vmatpush1.msk.msra.mxu1 %vm493_vm1, %v11060_v12  ;;  %943 = vmatprep.mubr.f32.mxu1 %v10906_v2  ;;  %v1111_v11 = vsel %vm1107_vm3, %v1100_v58, %v11202_v37  ;;  %v1441_v3 = vsel %vm1437_vm4, %v1430_v25, %v11237_v49 }
  0xf1   : > { %9289 = vmatprep.subr.mxu1 %v10906_v2  ;;  %3317 = vmatprep.mubr.f32.mxu0 %v10906_v2 }
  0xf3   : > { %v1760_v61 = vpop.permute.xlu0 %1759  ;;  %8248 = vmatmul.mubr.msk.f32.vlgmr.msra.gmra.mrb[0].mxu1 %vm489_vm2, %v11185_v31  ;;  %v2090_v23 = vpop.permute.xlu1 %2089 }
  0xf4   : > { %v1770_v62 = vsel %vm1767_vm5, %v11248_v53, %v1760_v61  ;;  %v1771_v12 = vsel %vm1767_vm5, %v1760_v61, %v11267_v60  ;;  %9290 = vmatpush3.msk.msra.mxu1 %vm493_vm1, %v11068_v16  ;;  %v11411_v63 = vsel %vm2097_vm6, %v11276_v0, %v2090_v23  ;;  %v11415_v37 = vsel %vm2097_vm6, %v2090_v23, %v11295_v8  ;;  %v3423_v61 = vld [vmem:[%s14924_s3 + $0xb0] sm:$0xff] }
  0xf5   : > { %8258 = vmatprep.subr.msk.mxu1 %vm493_vm1, %v1111_v11  ;;  %9291 = vmatprep.mubr.msk.f32.mxu1 %vm10915_vm10, %v10906_v2  ;;  %v1110_v53 = vsel %vm1107_vm3, %v11175_v30, %v1100_v58  ;;  %v1440_v8 = vsel %vm1437_vm4, %v11218_v42, %v1430_v25  ;;  %v9581_v58 = vpack.c.bf16 %v3419_v26, %v3417_v55  ;;  %v3421_v11 = vld [vmem:[%s14924_s3 + $0xa0] sm:$0xff]  ;;  %v8350_v55 = vld [vmem:[%s14924_s3 + $0x678] sm:$0xff]  ;;  %vm6667_vm6 = vcmask 203776  }
  0xf7   : > { %v11422_v60 = vpop.permute.xlu0 %2419  ;;  %9292 = vmatmul.mubr.msk.f32.vlgmr.msra.gmra.mrb[2].mxu1 %vm489_vm2, %v11185_v31  ;;  %v11426_v16 = vpop.permute.xlu1 %2749 }
  0xf8   : > { %v11431_v0 = vsel %vm2427_vm7, %v11304_v14, %v11422_v60  ;;  %8259 = vmatpush1.msk.msra.mxu1 %vm493_vm1, %v1110_v53  ;;  %v11437_v1 = vsel %vm2757_vm8, %v11332_v32, %v11426_v16  ;;  %1266 = vmatprep.mubr.f32.mxu1 %v10906_v2  ;;  %v3408_v14 = vld [vmem:[%s14924_s3 + $0x38] sm:$0xff]  ;;  %v9569_v32 = vpack.c.bf16 %v3407_v27, %v3405_v21  ;;  %v3430_v53 = vld [vmem:[%s14924_s3 + $0xe8] sm:$0xff] }
  0xf9   : > { %9294 = vmatprep.subr.mxu1 %v10906_v2  ;;  %v2431_v23 = vsel %vm2427_vm7, %v11422_v60, %v11323_v24  ;;  %v3425_v24 = vld [vmem:[%s14924_s3 + $0xc0] sm:$0xff]  ;;  %v2761_v6 = vsel %vm2757_vm8, %v11426_v16, %v11351_v43  ;;  %v3435_v16 = vld [vmem:[%s14924_s3 + $0x110] sm:$0xff]  ;;  %vm7992_vm7 = vcmask 982016   ;;  %vm8083_vm8 = vcmask 1043456  }
  0xfa   : > { %v3433_v43 = vld [vmem:[%s14924_s3 + $0x100] sm:$0xff] }
  0xfb   : > { %v11441_v30 = vpop.permute.xlu0 %3079  ;;  %8260 = vmatmul.mubr.msk.f32.vlgmr.msra.gmra.mrb[0].mxu1 %vm489_vm2, %v11211_v39  ;;  %v11445_v31 = vpop.permute.xlu1 %3081 }
  0xfc   : > { %9295 = vmatpush3.msk.msra.mxu1 %vm493_vm1, %v11198_v36  ;;  %9296 = vmatprep.mubr.msk.f32.mxu1 %vm10915_vm10, %v10906_v2  ;;  %v3090_v21 = vsel %vm3087_vm9, %v11369_v54, %v11441_v30  ;;  %v3446_v54 = vld [vmem:[%s14924_s3 + $0x168] sm:$0xff] }
  0xfd   : > { %8270 = vmatprep.subr.msk.mxu1 %vm493_vm1, %v1441_v3 }
  0xff   : > { %v3084_v49 = vpop.permute.xlu0 %3083  ;;  %9297 = vmatmul.mubr.msk.f32.vlgmr.msra.gmra.mrb[2].mxu1 %vm489_vm2, %v11211_v39  ;;  %v11464_v36 = vpop.permute.xlu1 %3085  ;;  %v3406_v39 = vld [vmem:[%s14924_s3 + $0x28] sm:$0xff] }
 0x100   : > { %v3092_v13 = vsel %vm3087_vm9, %v11445_v31, %v3084_v49  ;;  %8271 = vmatpush1.msk.msra.mxu1 %vm493_vm1, %v1440_v8  ;;  %v3093_v42 = vsel %vm3087_vm9, %v3084_v49, %v11464_v36  ;;  %1596 = vmatprep.mubr.f32.mxu1 %v10906_v2  ;;  %v9567_v18 = vpack.c.bf16 %v3408_v14, %v3406_v39  ;;  %v3434_v8 = vld [vmem:[%s14924_s3 + $0x108] sm:$0xff]  ;;  %v3436_v49 = vld [vmem:[%s14924_s3 + $0x118] sm:$0xff]  ;;  %v3437_v39 = vld [vmem:[%s14924_s3 + $0x120] sm:$0xff] }
 0x101   : > { %8333 = vmatprep.subr.msk.mxu0 %vm493_vm1, %v3093_v42  ;;  %9299 = vmatprep.subr.mxu1 %v10906_v2  ;;  %v9597_v42 = vpack.c.bf16 %v3435_v16, %v3433_v43  ;;  %v3439_v14 = vld [vmem:[%s14924_s3 + $0x130] sm:$0xff]  ;;  %v3457_v43 = vld [vmem:[%s14924_s3 + $0x1c0] sm:$0xff] }
 0x102   : > { %8334 = vmatpush1.msk.msra.mxu0 %vm493_vm1, %v3092_v13  ;;  %v3091_v13 = vsel %vm3087_vm9, %v11441_v30, %v11445_v31  ;;  %v3442_v31 = vld [vmem:[%s14924_s3 + $0x148] sm:$0xff]  ;;  %v3459_v16 = vld [vmem:[%s14924_s3 + $0x1d0] sm:$0xff]  ;;  %vm8079_vm9 = vcmask 687104  }
 0x103   : > { %8272 = vmatmul.mubr.msk.f32.vlgmr.msra.gmra.mrb[0].mxu1 %vm489_vm2, %v11232_v47  ;;  %8335 = vmatmul.mubr.msk.f32.vlgmr.msra.gmra.mrb[2].mxu0 %vm489_vm2, %v11384_v56 }
 0x104   : > { %9300 = vmatpush3.msk.msra.mxu1 %vm493_vm1, %v11235_v48  ;;  %9301 = vmatprep.mubr.msk.f32.mxu1 %vm10915_vm10, %v10906_v2  ;;  %v9571_v48 = vpack.c.bf16 %v3412_v29, %v3410_v28  ;;  %v3441_v28 = vld [vmem:[%s14924_s3 + $0x140] sm:$0xff]  ;;  %v3443_v29 = vld [vmem:[%s14924_s3 + $0x150] sm:$0xff] }
 0x105   : > { %8282 = vmatprep.subr.msk.mxu1 %vm493_vm1, %v1771_v12  ;;  %9564 = vmatprep.subr.bf16.mxu0 %v9563_v15  ;;  %v3428_v12 = vld [vmem:[%s14924_s3 + $0xd8] sm:$0xff] }
 0x106   : > { %9566 = vmatpush1.bf16.msra.mxu0 %v9565_v17  ;;  %v3444_v15 = vld [vmem:[%s14924_s3 + $0x158] sm:$0xff]  ;;  %v8340_v17 = vld [vmem:[%s14924_s3 + $0x628] sm:$0xff] }
 0x107   : > { %9302 = vmatmul.mubr.msk.f32.vlgmr.msra.gmra.mrb[2].mxu1 %vm489_vm2, %v11232_v47  ;;  %9568 = vmatprep.subr.bf16.mxu0 %v9567_v18  ;;  %v3416_v47 = vld [vmem:[%s14924_s3 + $0x78] sm:$0xff]  ;;  %v9601_v18 = vpack.c.bf16 %v3439_v14, %v3437_v39  ;;  %v9603_v27 = vpack.c.bf16 %v3444_v15, %v3442_v31  ;;  %v8357_v39 = vld [vmem:[%s14924_s3 + $0x6b0] sm:$0xff]  ;;  %v8360_v14 = vld [vmem:[%s14924_s3 + $0x6c8] sm:$0xff]  ;;  %v9621_v15 = vpack.c.bf16 %v3459_v16, %v3457_v43 }
 0x108   : > { %8283 = vmatpush1.msk.msra.mxu1 %vm493_vm1, %v1770_v62  ;;  %1926 = vmatprep.mubr.f32.mxu1 %v10906_v2  ;;  %v9575_v44 = vpack.c.bf16 %v3416_v47, %v3414_v35  ;;  %v3426_v62 = vld [vmem:[%s14924_s3 + $0xc8] sm:$0xff]  ;;  %v9605_v35 = vpack.c.bf16 %v3443_v29, %v3441_v28  ;;  %v8362_v31 = vld [vmem:[%s14924_s3 + $0x6d8] sm:$0xff]  ;;  %v8359_v28 = vld [vmem:[%s14924_s3 + $0x6c0] sm:$0xff] }
 0x109   : > { %9304 = vmatprep.subr.mxu1 %v10906_v2  ;;  %v8361_v29 = vld [vmem:[%s14924_s3 + $0x6d0] sm:$0xff]  ;;  %v8392_v16 = vld [vmem:[%s14924_s3 + $0x7c8] sm:$0xff] }
 0x10a   : > { %9570 = vmatpush1.bf16.msra.mxu0 %v9569_v32  ;;  %v8339_v32 = vld [vmem:[%s14924_s3 + $0x620] sm:$0xff]  ;;  %v8389_v43 = vld [vmem:[%s14924_s3 + $0x7b0] sm:$0xff] }
 0x10b   : > { %8284 = vmatmul.mubr.msk.f32.vlgmr.msra.gmra.mrb[0].mxu1 %vm489_vm2, %v11259_v57  ;;  %9572 = vmatprep.subr.bf16.mxu0 %v9571_v48  ;;  %v8341_v48 = vld [vmem:[%s14924_s3 + $0x630] sm:$0xff] }
 0x10c   : > { %9305 = vmatpush3.msk.msra.mxu1 %vm493_vm1, %v11265_v59  ;;  %9306 = vmatprep.mubr.msk.f32.mxu1 %vm10915_vm10, %v10906_v2  ;;  %v9579_v59 = vpack.c.bf16 %v3420_v51, %v3418_v50  ;;  %v9761_v45 = vpack.c.bf16 %v8341_v48, %v8339_v32  ;;  %v3452_v50 = vld [vmem:[%s14924_s3 + $0x198] sm:$0xff]  ;;  %v9763_v51 = vpack.c.bf16 %v8346_v34, %v8344_v33  ;;  %v8363_v33 = vld [vmem:[%s14924_s3 + $0x6e0] sm:$0xff]  ;;  %v8365_v34 = vld [vmem:[%s14924_s3 + $0x6f0] sm:$0xff] }
 0x10d   : > { %8294 = vmatprep.subr.msk.mxu1 %vm493_vm1, %v11415_v37  ;;  %v3427_v37 = vld [vmem:[%s14924_s3 + $0xd0] sm:$0xff]  ;;  %v9781_v32 = vpack.c.bf16 %v8361_v29, %v8359_v28  ;;  %v8399_v29 = vld [vmem:[%s14924_s3 + $0x800] sm:$0xff] }
 0x10e   : > { %9574 = vmatpush1.bf16.msra.mxu0 %v9573_v40  ;;  %v9589_v60 = vpack.c.bf16 %v3427_v37, %v3425_v24  ;;  %v3445_v40 = vld [vmem:[%s14924_s3 + $0x160] sm:$0xff] }
 0x10f   : > { %9307 = vmatmul.mubr.msk.f32.vlgmr.msra.gmra.mrb[2].mxu1 %vm489_vm2, %v11259_v57  ;;  %9576 = vmatprep.subr.bf16.mxu0 %v9575_v44  ;;  %v3424_v57 = vld [vmem:[%s14924_s3 + $0xb8] sm:$0xff]  ;;  %v3447_v44 = vld [vmem:[%s14924_s3 + $0x170] sm:$0xff]  ;;  %v3453_v37 = vld [vmem:[%s14924_s3 + $0x1a0] sm:$0xff] }
 0x110   : > { %8295 = vmatpush1.msk.msra.mxu1 %vm493_vm1, %v11411_v63  ;;  %2256 = vmatprep.mubr.f32.mxu1 %v10906_v2  ;;  %v9583_v25 = vpack.c.bf16 %v3424_v57, %v3422_v20  ;;  %v9585_v63 = vpack.c.bf16 %v3423_v61, %v3421_v11  ;;  %v9609_v26 = vpack.c.bf16 %v3447_v44, %v3445_v40  ;;  %v3449_v57 = vld [vmem:[%s14924_s3 + $0x180] sm:$0xff]  ;;  %v3454_v11 = vld [vmem:[%s14924_s3 + $0x1a8] sm:$0xff]  ;;  %v3468_v44 = vld [vmem:[%s14924_s3 + $0x218] sm:$0xff] }
 0x111   : > { %9309 = vmatprep.subr.mxu1 %v10906_v2  ;;  %v9611_v20 = vpack.c.bf16 %v3452_v50, %v3450_v46  ;;  %v3466_v40 = vld [vmem:[%s14924_s3 + $0x208] sm:$0xff]  ;;  %v9785_v46 = vpack.c.bf16 %v8365_v34, %v8363_v33  ;;  %v3465_v33 = vld [vmem:[%s14924_s3 + $0x200] sm:$0xff]  ;;  %v3467_v34 = vld [vmem:[%s14924_s3 + $0x210] sm:$0xff] }
 0x112   : > { %9578 = vmatpush1.bf16.msra.mxu0 %v9577_v52  ;;  %v8343_v52 = vld [vmem:[%s14924_s3 + $0x640] sm:$0xff] }
 0x113   : > { %8296 = vmatmul.mubr.msk.f32.vlgmr.msra.gmra.mrb[0].mxu1 %vm489_vm2, %v11287_v5  ;;  %9580 = vmatprep.subr.bf16.mxu0 %v9579_v59  ;;  %v8348_v59 = vld [vmem:[%s14924_s3 + $0x668] sm:$0xff] }
 0x114   : > { %9310 = vmatpush3.msk.msra.mxu1 %vm493_vm1, %v11293_v7  ;;  %9311 = vmatprep.mubr.msk.f32.mxu1 %vm10915_vm10, %v10906_v2  ;;  %v9587_v7 = vpack.c.bf16 %v3428_v12, %v3426_v62  ;;  %v9767_v61 = vpack.c.bf16 %v8350_v55, %v8348_v59  ;;  %v8349_v62 = vld [vmem:[%s14924_s3 + $0x670] sm:$0xff]  ;;  %v8352_v12 = vld [vmem:[%s14924_s3 + $0x688] sm:$0xff]  ;;  %v8374_v59 = vld [vmem:[%s14924_s3 + $0x738] sm:$0xff] }
 0x115   : > { %8306 = vmatprep.subr.msk.mxu1 %vm493_vm1, %v2431_v23  ;;  %v8347_v23 = vld [vmem:[%s14924_s3 + $0x660] sm:$0xff] }
 0x116   : > { %9582 = vmatpush1.bf16.msra.mxu0 %v9581_v58  ;;  %v3451_v58 = vld [vmem:[%s14924_s3 + $0x190] sm:$0xff] }
 0x117   : > { %9312 = vmatmul.mubr.msk.f32.vlgmr.msra.gmra.mrb[2].mxu1 %vm489_vm2, %v11287_v5  ;;  %9584 = vmatprep.subr.bf16.mxu0 %v9583_v25  ;;  %v3432_v5 = vld [vmem:[%s14924_s3 + $0xf8] sm:$0xff] }
 0x118   : > { %8307 = vmatpush1.msk.msra.mxu1 %vm493_vm1, %v11431_v0  ;;  %2586 = vmatprep.mubr.f32.mxu1 %v10906_v2  ;;  %v9591_v3 = vpack.c.bf16 %v3432_v5, %v3430_v53  ;;  %v3429_v0 = vld [vmem:[%s14924_s3 + $0xe0] sm:$0xff]  ;;  %v3455_v53 = vld [vmem:[%s14924_s3 + $0x1b0] sm:$0xff]  ;;  %v9769_v5 = vpack.c.bf16 %v8349_v62, %v8347_v23  ;;  %v8380_v62 = vld [vmem:[%s14924_s3 + $0x768] sm:$0xff] }
 0x119   : > { %9314 = vmatprep.subr.mxu1 %v10906_v2  ;;  %v9593_v9 = vpack.c.bf16 %v3431_v4, %v3429_v0  ;;  %v8351_v4 = vld [vmem:[%s14924_s3 + $0x680] sm:$0xff]  ;;  %v8377_v23 = vld [vmem:[%s14924_s3 + $0x750] sm:$0xff] }
 0x11a   : > { %9586 = vmatpush1.bf16.msra.mxu0 %v9585_v63  ;;  %v8354_v63 = vld [vmem:[%s14924_s3 + $0x698] sm:$0xff] }
 0x11b   : > { %8308 = vmatmul.mubr.msk.f32.vlgmr.msra.gmra.mrb[0].mxu1 %vm489_vm2, %v11315_v19  ;;  %9588 = vmatprep.subr.bf16.mxu0 %v9587_v7  ;;  %v9613_v7 = vpack.c.bf16 %v3451_v58, %v3449_v57  ;;  %v9771_v0 = vpack.c.bf16 %v8354_v63, %v8352_v12  ;;  %v8373_v57 = vld [vmem:[%s14924_s3 + $0x730] sm:$0xff]  ;;  %v8376_v58 = vld [vmem:[%s14924_s3 + $0x748] sm:$0xff]  ;;  %v8382_v12 = vld [vmem:[%s14924_s3 + $0x778] sm:$0xff] }
 0x11c   : > { %9315 = vmatpush3.msk.msra.mxu1 %vm493_vm1, %v11321_v22  ;;  %9316 = vmatprep.mubr.msk.f32.mxu1 %vm10915_vm10, %v10906_v2  ;;  %v9595_v22 = vpack.c.bf16 %v3436_v49, %v3434_v8  ;;  %v8356_v8 = vld [vmem:[%s14924_s3 + $0x6a8] sm:$0xff]  ;;  %v8358_v49 = vld [vmem:[%s14924_s3 + $0x6b8] sm:$0xff] }
 0x11d   : > { %8318 = vmatprep.subr.msk.mxu1 %vm493_vm1, %v2761_v6  ;;  %v8353_v6 = vld [vmem:[%s14924_s3 + $0x690] sm:$0xff] }
 0x11e   : > { %9590 = vmatpush1.bf16.msra.mxu0 %v9589_v60  ;;  %v3458_v60 = vld [vmem:[%s14924_s3 + $0x1c8] sm:$0xff] }
 0x11f   : > { %9317 = vmatmul.mubr.msk.f32.vlgmr.msra.gmra.mrb[2].mxu1 %vm489_vm2, %v11315_v19  ;;  %9592 = vmatprep.subr.bf16.mxu0 %v9591_v3  ;;  %v3440_v19 = vld [vmem:[%s14924_s3 + $0x138] sm:$0xff] }
 0x120   : > { %8319 = vmatpush1.msk.msra.mxu1 %vm493_vm1, %v11437_v1  ;;  %2916 = vmatprep.mubr.f32.mxu1 %v10906_v2  ;;  %v9599_v1 = vpack.c.bf16 %v3440_v19, %v3438_v10  ;;  %v3460_v3 = vld [vmem:[%s14924_s3 + $0x1d8] sm:$0xff]  ;;  %v9773_v10 = vpack.c.bf16 %v8353_v6, %v8351_v4  ;;  %v3462_v19 = vld [vmem:[%s14924_s3 + $0x1e8] sm:$0xff]  ;;  %v8385_v4 = vld [vmem:[%s14924_s3 + $0x790] sm:$0xff] }
 0x121   : > { %9319 = vmatprep.subr.mxu1 %v10906_v2  ;;  %v8388_v6 = vld [vmem:[%s14924_s3 + $0x7a8] sm:$0xff] }
 0x122   : > { %9594 = vmatpush1.bf16.msra.mxu0 %v9593_v9  ;;  %v9617_v9 = vpack.c.bf16 %v3455_v53, %v3453_v37  ;;  %v8381_v37 = vld [vmem:[%s14924_s3 + $0x770] sm:$0xff]  ;;  %v8384_v53 = vld [vmem:[%s14924_s3 + $0x788] sm:$0xff] }
 0x123   : > { %8320 = vmatmul.mubr.msk.f32.vlgmr.msra.gmra.mrb[0].mxu1 %vm489_vm2, %v11343_v38  ;;  %9596 = vmatprep.subr.bf16.mxu0 %v9595_v22  ;;  %v9619_v22 = vpack.c.bf16 %v3460_v3, %v3458_v60 }
 0x124   : > { %9320 = vmatpush3.msk.msra.mxu1 %vm493_vm1, %v11349_v41  ;;  %9321 = vmatprep.mubr.msk.f32.mxu1 %vm10915_vm10, %v10906_v2  ;;  %v8342_v41 = vld [vmem:[%s14924_s3 + $0x638] sm:$0xff] }
 0x125   : > { %8330 = vmatprep.subr.msk.mxu1 %vm493_vm1, %v3091_v13  ;;  %v9759_v30 = vpack.c.bf16 %v8342_v41, %v8340_v17  ;;  %v3464_v13 = vld [vmem:[%s14924_s3 + $0x1f8] sm:$0xff]  ;;  %v3461_v41 = vld [vmem:[%s14924_s3 + $0x1e0] sm:$0xff] }
 0x126   : > { %9598 = vmatpush1.bf16.msra.mxu0 %v9597_v42  ;;  %v9775_v42 = vpack.c.bf16 %v8358_v49, %v8356_v8  ;;  %v9623_v17 = vpack.c.bf16 %v3464_v13, %v3462_v19  ;;  %v8390_v8 = vld [vmem:[%s14924_s3 + $0x7b8] sm:$0xff] }
 0x127   : > { %9322 = vmatmul.mubr.msk.f32.vlgmr.msra.gmra.mrb[2].mxu1 %vm489_vm2, %v11343_v38  ;;  %9600 = vmatprep.subr.bf16.mxu0 %v9599_v1  ;;  %v3448_v38 = vld [vmem:[%s14924_s3 + $0x178] sm:$0xff]  ;;  %v8355_v1 = vld [vmem:[%s14924_s3 + $0x6a0] sm:$0xff] }
 0x128   : > { %8331 = vmatpush1.msk.msra.mxu1 %vm493_vm1, %v3090_v21  ;;  %3246 = vmatprep.mubr.f32.mxu1 %v10906_v2  ;;  %v9607_v47 = vpack.c.bf16 %v3448_v38, %v3446_v54  ;;  %v9777_v21 = vpack.c.bf16 %v8357_v39, %v8355_v1  ;;  %v8364_v54 = vld [vmem:[%s14924_s3 + $0x6e8] sm:$0xff]  ;;  %v8366_v38 = vld [vmem:[%s14924_s3 + $0x6f8] sm:$0xff]  ;;  %v8393_v1 = vld [vmem:[%s14924_s3 + $0x7d0] sm:$0xff] }
 0x129   : > { %9324 = vmatprep.subr.mxu1 %v10906_v2  ;;  %v9783_v48 = vpack.c.bf16 %v8366_v38, %v8364_v54  ;;  %v8396_v39 = vld [vmem:[%s14924_s3 + $0x7e8] sm:$0xff]  ;;  %v8401_v54 = vld [vmem:[%s14924_s3 + $0x810] sm:$0xff] }
 0x12a   : > { %9602 = vmatpush1.bf16.msra.mxu0 %v9601_v18  ;;  %v3463_v18 = vld [vmem:[%s14924_s3 + $0x1f0] sm:$0xff]  ;;  %v8404_v38 = vld [vmem:[%s14924_s3 + $0x828] sm:$0xff] }
 0x12b   : > { %8332 = vmatmul.mubr.msk.f32.vlgmr.msra.gmra.mrb[0].mxu1 %vm489_vm2, %v11384_v56  ;;  %9604 = vmatprep.subr.bf16.mxu0 %v9603_v27  ;;  %v9779_v27 = vpack.c.bf16 %v8362_v31, %v8360_v14  ;;  %v8398_v14 = vld [vmem:[%s14924_s3 + $0x7f8] sm:$0xff] }
 0x12c   : > { %9325 = vmatpush3.msk.msra.mxu1 %vm493_vm1, %v11464_v36  ;;  %9326 = vmatprep.mubr.msk.f32.mxu1 %vm10915_vm10, %v10906_v2  ;;  %v8345_v36 = vld [vmem:[%s14924_s3 + $0x650] sm:$0xff] }
 0x12d   : > { %9760 = vmatprep.subr.bf16.mxu1 %v9759_v30  ;;  %v9765_v25 = vpack.c.bf16 %v8345_v36, %v8343_v52  ;;  %v9625_v30 = vpack.c.bf16 %v3463_v18, %v3461_v41  ;;  %v8369_v52 = vld [vmem:[%s14924_s3 + $0x710] sm:$0xff]  ;;  %v8372_v36 = vld [vmem:[%s14924_s3 + $0x728] sm:$0xff] }
 0x12e   : > { %9606 = vmatpush1.bf16.msra.mxu0 %v9605_v35  ;;  %v8368_v35 = vld [vmem:[%s14924_s3 + $0x708] sm:$0xff]  ;;  %v8397_v41 = vld [vmem:[%s14924_s3 + $0x7f0] sm:$0xff] }
 0x12f   : > { %9327 = vmatmul.mubr.msk.f32.vlgmr.msra.gmra.mrb[2].mxu1 %vm489_vm2, %v11384_v56  ;;  %9608 = vmatprep.subr.bf16.mxu0 %v9607_v47  ;;  %v3456_v56 = vld [vmem:[%s14924_s3 + $0x1b8] sm:$0xff]  ;;  %v8400_v18 = vld [vmem:[%s14924_s3 + $0x808] sm:$0xff]  ;;  %vm5838_vm2 = vcmask 924672  }
 0x130   : > { %9762 = vmatpush1.bf16.msra.mxu1 %v9761_v45  ;;  %v9615_v24 = vpack.c.bf16 %v3456_v56, %v3454_v11  ;;  %v8370_v47 = vld [vmem:[%s14924_s3 + $0x718] sm:$0xff]  ;;  %v9627_v45 = vpack.c.bf16 %v3468_v44, %v3466_v40  ;;  %v3470_v40 = vld [vmem:[%s14924_s3 + $0x228] sm:$0xff] }
 0x131   : > { %9764 = vmatprep.subr.bf16.mxu1 %v9763_v51  ;;  %v9787_v50 = vpack.c.bf16 %v8370_v47, %v8368_v35  ;;  %v8367_v51 = vld [vmem:[%s14924_s3 + $0x700] sm:$0xff]  ;;  %v8405_v47 = vld [vmem:[%s14924_s3 + $0x830] sm:$0xff]  ;;  %v3472_v44 = vld [vmem:[%s14924_s3 + $0x238] sm:$0xff] }
 0x132   : > { %9610 = vmatpush1.bf16.msra.mxu0 %v9609_v26  ;;  %v9789_v55 = vpack.c.bf16 %v8369_v52, %v8367_v51  ;;  %v9791_v26 = vpack.c.bf16 %v8374_v59, %v8372_v36  ;;  %v8403_v35 = vld [vmem:[%s14924_s3 + $0x820] sm:$0xff]  ;;  %v9629_v51 = vpack.c.bf16 %v3467_v34, %v3465_v33  ;;  %v3471_v59 = vld [vmem:[%s14924_s3 + $0x230] sm:$0xff] }
 0x133   : > { %9612 = vmatprep.subr.bf16.mxu0 %v9611_v20  ;;  %v8371_v20 = vld [vmem:[%s14924_s3 + $0x720] sm:$0xff]  ;;  %v9825_v52 = vpack.c.bf16 %v8405_v47, %v8403_v35  ;;  %v8425_v35 = vld [vmem:[%s14924_s3 + $0x8d0] sm:$0xff]  ;;  %v3490_v47 = vld [vmem:[%s14924_s3 + $0x2c8] sm:$0xff] }
 0x134   : > { %9766 = vmatpush1.bf16.msra.mxu1 %v9765_v25  ;;  %v8378_v25 = vld [vmem:[%s14924_s3 + $0x758] sm:$0xff]  ;;  %v9793_v11 = vpack.c.bf16 %v8373_v57, %v8371_v20  ;;  %v3469_v36 = vld [vmem:[%s14924_s3 + $0x220] sm:$0xff] }
 0x135   : > { %9768 = vmatprep.subr.bf16.mxu1 %v9767_v61  ;;  %v9795_v56 = vpack.c.bf16 %v8378_v25, %v8376_v58  ;;  %v8375_v61 = vld [vmem:[%s14924_s3 + $0x740] sm:$0xff]  ;;  %v8409_v58 = vld [vmem:[%s14924_s3 + $0x850] sm:$0xff]  ;;  %v3474_v25 = vld [vmem:[%s14924_s3 + $0x248] sm:$0xff] }
 0x136   : > { %9614 = vmatpush1.bf16.msra.mxu0 %v9613_v7  ;;  %v9797_v63 = vpack.c.bf16 %v8377_v23, %v8375_v61  ;;  %v9799_v7 = vpack.c.bf16 %v8382_v12, %v8380_v62  ;;  %v8407_v57 = vld [vmem:[%s14924_s3 + $0x840] sm:$0xff]  ;;  %v8414_v61 = vld [vmem:[%s14924_s3 + $0x878] sm:$0xff]  ;;  %v9633_v23 = vpack.c.bf16 %v3471_v59, %v3469_v36  ;;  %v3491_v59 = vld [vmem:[%s14924_s3 + $0x2d0] sm:$0xff] }
 0x137   : > { %9616 = vmatprep.subr.bf16.mxu0 %v9615_v24  ;;  %v8379_v24 = vld [vmem:[%s14924_s3 + $0x760] sm:$0xff]  ;;  %v9829_v62 = vpack.c.bf16 %v8409_v58, %v8407_v57 }
 0x138   : > { %9770 = vmatpush1.bf16.msra.mxu1 %v9769_v5  ;;  %v8386_v5 = vld [vmem:[%s14924_s3 + $0x798] sm:$0xff]  ;;  %v9801_v60 = vpack.c.bf16 %v8381_v37, %v8379_v24  ;;  %v3473_v12 = vld [vmem:[%s14924_s3 + $0x240] sm:$0xff] }
 0x139   : > { %9772 = vmatprep.subr.bf16.mxu1 %v9771_v0  ;;  %v9803_v3 = vpack.c.bf16 %v8386_v5, %v8384_v53  ;;  %v8383_v0 = vld [vmem:[%s14924_s3 + $0x780] sm:$0xff]  ;;  %v8413_v53 = vld [vmem:[%s14924_s3 + $0x870] sm:$0xff]  ;;  %v3478_v5 = vld [vmem:[%s14924_s3 + $0x268] sm:$0xff] }
 0x13a   : > { %9618 = vmatpush1.bf16.msra.mxu0 %v9617_v9  ;;  %v9805_v49 = vpack.c.bf16 %v8385_v4, %v8383_v0  ;;  %v9807_v9 = vpack.c.bf16 %v8390_v8, %v8388_v6  ;;  %v8411_v37 = vld [vmem:[%s14924_s3 + $0x860] sm:$0xff]  ;;  %v8418_v0 = vld [vmem:[%s14924_s3 + $0x898] sm:$0xff] }
 0x13b   : > { %9620 = vmatprep.subr.bf16.mxu0 %v9619_v22  ;;  %v8387_v22 = vld [vmem:[%s14924_s3 + $0x7a0] sm:$0xff]  ;;  %v9833_v6 = vpack.c.bf16 %v8413_v53, %v8411_v37 }
 0x13c   : > { %9774 = vmatpush1.bf16.msra.mxu1 %v9773_v10  ;;  %v8394_v10 = vld [vmem:[%s14924_s3 + $0x7d8] sm:$0xff]  ;;  %v9809_v19 = vpack.c.bf16 %v8389_v43, %v8387_v22  ;;  %v3477_v8 = vld [vmem:[%s14924_s3 + $0x260] sm:$0xff] }
 0x13d   : > { %9776 = vmatprep.subr.bf16.mxu1 %v9775_v42  ;;  %v9811_v13 = vpack.c.bf16 %v8394_v10, %v8392_v16  ;;  %v8391_v42 = vld [vmem:[%s14924_s3 + $0x7c0] sm:$0xff]  ;;  %v8417_v16 = vld [vmem:[%s14924_s3 + $0x890] sm:$0xff]  ;;  %v3482_v10 = vld [vmem:[%s14924_s3 + $0x288] sm:$0xff] }
 0x13e   : > { %9622 = vmatpush1.bf16.msra.mxu0 %v9621_v15  ;;  %v9813_v31 = vpack.c.bf16 %v8393_v1, %v8391_v42  ;;  %v9815_v15 = vpack.c.bf16 %v8398_v14, %v8396_v39  ;;  %v8415_v43 = vld [vmem:[%s14924_s3 + $0x880] sm:$0xff]  ;;  %v8422_v42 = vld [vmem:[%s14924_s3 + $0x8b8] sm:$0xff] }
 0x13f   : > { %9624 = vmatprep.subr.bf16.mxu0 %v9623_v17  ;;  %v8395_v17 = vld [vmem:[%s14924_s3 + $0x7e0] sm:$0xff]  ;;  %v9837_v39 = vpack.c.bf16 %v8417_v16, %v8415_v43 }
 0x140   : > { %9778 = vmatpush1.bf16.msra.mxu1 %v9777_v21  ;;  %v8402_v21 = vld [vmem:[%s14924_s3 + $0x818] sm:$0xff]  ;;  %v3481_v14 = vld [vmem:[%s14924_s3 + $0x280] sm:$0xff] }
 0x141   : > { %9780 = vmatprep.subr.bf16.mxu1 %v9779_v27  ;;  %v9817_v27 = vpack.c.bf16 %v8397_v41, %v8395_v17  ;;  %v9819_v28 = vpack.c.bf16 %v8402_v21, %v8400_v18  ;;  %v8419_v41 = vld [vmem:[%s14924_s3 + $0x8a0] sm:$0xff]  ;;  %v8421_v18 = vld [vmem:[%s14924_s3 + $0x8b0] sm:$0xff]  ;;  %v3486_v21 = vld [vmem:[%s14924_s3 + $0x2a8] sm:$0xff] }
 0x142   : > { %9626 = vmatpush1.bf16.msra.mxu0 %v9625_v30  ;;  %v8406_v30 = vld [vmem:[%s14924_s3 + $0x838] sm:$0xff]  ;;  %v8423_v34 = vld [vmem:[%s14924_s3 + $0x8c0] sm:$0xff] }
 0x143   : > { %9628 = vmatprep.subr.bf16.mxu0 %v9627_v45  ;;  %v8408_v45 = vld [vmem:[%s14924_s3 + $0x848] sm:$0xff]  ;;  %v3489_v36 = vld [vmem:[%s14924_s3 + $0x2c0] sm:$0xff] }
 0x144   : > { %9782 = vmatpush1.bf16.msra.mxu1 %v9781_v32  ;;  %v9821_v32 = vpack.c.bf16 %v8401_v54, %v8399_v29  ;;  %v8426_v29 = vld [vmem:[%s14924_s3 + $0x8d8] sm:$0xff]  ;;  %v8427_v58 = vld [vmem:[%s14924_s3 + $0x8e0] sm:$0xff] }
 0x145   : > { %9784 = vmatprep.subr.bf16.mxu1 %v9783_v48  ;;  %v9823_v48 = vpack.c.bf16 %v8406_v30, %v8404_v38  ;;  %v9841_v38 = vpack.c.bf16 %v8421_v18, %v8419_v41  ;;  %v3485_v30 = vld [vmem:[%s14924_s3 + $0x2a0] sm:$0xff] }
 0x146   : > { %v8431_v53 = vld [vmem:[%s14924_s3 + $0x900] sm:$0xff] }
 0x147   : > { %v8435_v16 = vld [vmem:[%s14924_s3 + $0x920] sm:$0xff] }
 0x148   : > { %9786 = vmatpush1.bf16.msra.mxu1 %v9785_v46  ;;  %v8410_v46 = vld [vmem:[%s14924_s3 + $0x858] sm:$0xff]  ;;  %v8439_v18 = vld [vmem:[%s14924_s3 + $0x940] sm:$0xff] }
 0x149   : > { %9788 = vmatprep.subr.bf16.mxu1 %v9787_v50  ;;  %v9827_v20 = vpack.c.bf16 %v8410_v46, %v8408_v45  ;;  %v8430_v45 = vld [vmem:[%s14924_s3 + $0x8f8] sm:$0xff] }
 0x14c   : > { %9790 = vmatpush1.bf16.msra.mxu1 %v9789_v55 }
 0x14d   : > { %9792 = vmatprep.subr.bf16.mxu1 %v9791_v26  ;;  %v9631_v26 = vpack.c.bf16 %v3472_v44, %v3470_v40  ;;  %v3492_v40 = vld [vmem:[%s14924_s3 + $0x2d8] sm:$0xff]  ;;  %v8428_v44 = vld [vmem:[%s14924_s3 + $0x8e8] sm:$0xff] }
 0x14e   : > { %v9847_v57 = vpack.c.bf16 %v8430_v45, %v8428_v44  ;;  %v3512_v44 = vld [vmem:[%s14924_s3 + $0x378] sm:$0xff]  ;;  %v8448_v45 = vld [vmem:[%s14924_s3 + $0x988] sm:$0xff] }
 0x150   : > { %9794 = vmatpush1.bf16.msra.mxu1 %v9793_v11  ;;  %v3476_v11 = vld [vmem:[%s14924_s3 + $0x258] sm:$0xff] }
 0x151   : > { %9796 = vmatprep.subr.bf16.mxu1 %v9795_v56  ;;  %v8412_v56 = vld [vmem:[%s14924_s3 + $0x868] sm:$0xff] }
 0x152   : > { %v9831_v24 = vpack.c.bf16 %v8414_v61, %v8412_v56  ;;  %v3496_v56 = vld [vmem:[%s14924_s3 + $0x2f8] sm:$0xff]  ;;  %v8432_v61 = vld [vmem:[%s14924_s3 + $0x908] sm:$0xff] }
 0x154   : > { %9798 = vmatpush1.bf16.msra.mxu1 %v9797_v63  ;;  %v3475_v63 = vld [vmem:[%s14924_s3 + $0x250] sm:$0xff] }
 0x155   : > { %9800 = vmatprep.subr.bf16.mxu1 %v9799_v7  ;;  %v9635_v7 = vpack.c.bf16 %v3476_v11, %v3474_v25  ;;  %v9637_v4 = vpack.c.bf16 %v3475_v63, %v3473_v12  ;;  %v8429_v25 = vld [vmem:[%s14924_s3 + $0x8f0] sm:$0xff]  ;;  %v3494_v11 = vld [vmem:[%s14924_s3 + $0x2e8] sm:$0xff]  ;;  %v3493_v63 = vld [vmem:[%s14924_s3 + $0x2e0] sm:$0xff] }
 0x156   : > { %v9849_v12 = vpack.c.bf16 %v8429_v25, %v8427_v58  ;;  %v8447_v25 = vld [vmem:[%s14924_s3 + $0x980] sm:$0xff] }
 0x158   : > { %9802 = vmatpush1.bf16.msra.mxu1 %v9801_v60  ;;  %v3480_v60 = vld [vmem:[%s14924_s3 + $0x278] sm:$0xff] }
 0x159   : > { %9804 = vmatprep.subr.bf16.mxu1 %v9803_v3  ;;  %v8416_v3 = vld [vmem:[%s14924_s3 + $0x888] sm:$0xff] }
 0x15a   : > { %v9835_v22 = vpack.c.bf16 %v8418_v0, %v8416_v3  ;;  %v3500_v3 = vld [vmem:[%s14924_s3 + $0x318] sm:$0xff]  ;;  %v8436_v0 = vld [vmem:[%s14924_s3 + $0x928] sm:$0xff] }
 0x15c   : > { %9806 = vmatpush1.bf16.msra.mxu1 %v9805_v49  ;;  %v3479_v49 = vld [vmem:[%s14924_s3 + $0x270] sm:$0xff] }
 0x15d   : > { %9808 = vmatprep.subr.bf16.mxu1 %v9807_v9  ;;  %v9639_v9 = vpack.c.bf16 %v3480_v60, %v3478_v5  ;;  %v9641_v1 = vpack.c.bf16 %v3479_v49, %v3477_v8  ;;  %v8433_v5 = vld [vmem:[%s14924_s3 + $0x910] sm:$0xff]  ;;  %v3498_v60 = vld [vmem:[%s14924_s3 + $0x308] sm:$0xff]  ;;  %v3497_v49 = vld [vmem:[%s14924_s3 + $0x300] sm:$0xff] }
 0x15e   : > { %v9853_v8 = vpack.c.bf16 %v8433_v5, %v8431_v53  ;;  %v8451_v5 = vld [vmem:[%s14924_s3 + $0x9a0] sm:$0xff] }
 0x160   : > { %9810 = vmatpush1.bf16.msra.mxu1 %v9809_v19  ;;  %v3484_v19 = vld [vmem:[%s14924_s3 + $0x298] sm:$0xff] }
 0x161   : > { %9812 = vmatprep.subr.bf16.mxu1 %v9811_v13  ;;  %v8420_v13 = vld [vmem:[%s14924_s3 + $0x8a8] sm:$0xff] }
 0x162   : > { %v9839_v17 = vpack.c.bf16 %v8422_v42, %v8420_v13  ;;  %v3504_v13 = vld [vmem:[%s14924_s3 + $0x338] sm:$0xff]  ;;  %v8440_v42 = vld [vmem:[%s14924_s3 + $0x948] sm:$0xff] }
 0x164   : > { %9814 = vmatpush1.bf16.msra.mxu1 %v9813_v31  ;;  %v3483_v31 = vld [vmem:[%s14924_s3 + $0x290] sm:$0xff] }
 0x165   : > { %9816 = vmatprep.subr.bf16.mxu1 %v9815_v15  ;;  %v9643_v15 = vpack.c.bf16 %v3484_v19, %v3482_v10  ;;  %v9645_v54 = vpack.c.bf16 %v3483_v31, %v3481_v14  ;;  %v8437_v10 = vld [vmem:[%s14924_s3 + $0x930] sm:$0xff]  ;;  %v3502_v19 = vld [vmem:[%s14924_s3 + $0x328] sm:$0xff]  ;;  %v3501_v31 = vld [vmem:[%s14924_s3 + $0x320] sm:$0xff] }
 0x166   : > { %v9857_v14 = vpack.c.bf16 %v8437_v10, %v8435_v16  ;;  %v8455_v10 = vld [vmem:[%s14924_s3 + $0x9c0] sm:$0xff] }
 0x168   : > { %9818 = vmatpush1.bf16.msra.mxu1 %v9817_v27  ;;  %v3488_v27 = vld [vmem:[%s14924_s3 + $0x2b8] sm:$0xff] }
 0x169   : > { %9820 = vmatprep.subr.bf16.mxu1 %v9819_v28  ;;  %v8424_v28 = vld [vmem:[%s14924_s3 + $0x8c8] sm:$0xff] }
 0x16a   : > { %v9843_v33 = vpack.c.bf16 %v8426_v29, %v8424_v28  ;;  %v3508_v28 = vld [vmem:[%s14924_s3 + $0x358] sm:$0xff]  ;;  %v8444_v29 = vld [vmem:[%s14924_s3 + $0x968] sm:$0xff] }
 0x16c   : > { %9822 = vmatpush1.bf16.msra.mxu1 %v9821_v32  ;;  %v3487_v32 = vld [vmem:[%s14924_s3 + $0x2b0] sm:$0xff] }
 0x16d   : > { %9824 = vmatprep.subr.bf16.mxu1 %v9823_v48  ;;  %v9647_v48 = vpack.c.bf16 %v3488_v27, %v3486_v21  ;;  %v8441_v21 = vld [vmem:[%s14924_s3 + $0x950] sm:$0xff]  ;;  %v3506_v27 = vld [vmem:[%s14924_s3 + $0x348] sm:$0xff] }
 0x1c2   : > { %v11975_v50 = vpop.f32.mrb[0].mxu0 }
 0x1c3   : > { %v11983_v55 = vpop.f32.mrb[1].mxu0 }
 0x1c4   : > { %3665 = vmatprep.mubr.f32.mxu0 %v11983_v55  ;;  %4146 = vmatprep.mubr.f32.mxu1 %v11983_v55 }
 0x1c5   : > { %3666 = vmatmul.mubr.f32.vlgmr.msra.gmra.mrb[4].mxu0 %v11975_v50  ;;  %4147 = vmatmul.mubr.f32.vlgmr.msra.gmra.mrb[4].mxu1 %v11975_v50 }
 0x1c6   : > { %9630 = vmatpush1.bf16.msra.mxu0 %v9629_v51  ;;  %9826 = vmatpush1.bf16.msra.mxu1 %v9825_v52  ;;  %v9649_v51 = vpack.c.bf16 %v3487_v32, %v3485_v30  ;;  %v9845_v52 = vpack.c.bf16 %v8425_v35, %v8423_v34  ;;  %v9861_v30 = vpack.c.bf16 %v8441_v21, %v8439_v18  ;;  %v3505_v32 = vld [vmem:[%s14924_s3 + $0x340] sm:$0xff] }
 0x1c7   : > { %9632 = vmatprep.subr.bf16.mxu0 %v9631_v26  ;;  %9828 = vmatprep.subr.bf16.mxu1 %v9827_v20  ;;  %v9651_v20 = vpack.c.bf16 %v3492_v40, %v3490_v47  ;;  %v8443_v35 = vld [vmem:[%s14924_s3 + $0x960] sm:$0xff]  ;;  %v8445_v47 = vld [vmem:[%s14924_s3 + $0x970] sm:$0xff]  ;;  %v3510_v40 = vld [vmem:[%s14924_s3 + $0x368] sm:$0xff] }
 0x1c8   : > { %v8459_v21 = vld [vmem:[%s14924_s3 + $0x9e0] sm:$0xff] }
 0x1ca   : > { %9634 = vmatpush1.bf16.msra.mxu0 %v9633_v23  ;;  %9830 = vmatpush1.bf16.msra.mxu1 %v9829_v62  ;;  %v8434_v23 = vld [vmem:[%s14924_s3 + $0x918] sm:$0xff]  ;;  %v9653_v62 = vpack.c.bf16 %v3491_v59, %v3489_v36  ;;  %v9865_v36 = vpack.c.bf16 %v8445_v47, %v8443_v35  ;;  %v3509_v59 = vld [vmem:[%s14924_s3 + $0x360] sm:$0xff] }
 0x1cb   : > { %9636 = vmatprep.subr.bf16.mxu0 %v9635_v7  ;;  %9832 = vmatprep.subr.bf16.mxu1 %v9831_v24  ;;  %v3495_v7 = vld [vmem:[%s14924_s3 + $0x2f0] sm:$0xff]  ;;  %v9655_v24 = vpack.c.bf16 %v3496_v56, %v3494_v11  ;;  %v9851_v37 = vpack.c.bf16 %v8434_v23, %v8432_v61  ;;  %v3514_v56 = vld [vmem:[%s14924_s3 + $0x388] sm:$0xff]  ;;  %v3516_v61 = vld [vmem:[%s14924_s3 + $0x398] sm:$0xff] }
 0x1cc   : > { %v8449_v11 = vld [vmem:[%s14924_s3 + $0x990] sm:$0xff]  ;;  %v8452_v23 = vld [vmem:[%s14924_s3 + $0x9a8] sm:$0xff]  ;;  %v8463_v47 = vld [vmem:[%s14924_s3 + $0xa00] sm:$0xff] }
 0x1ce   : > { %9638 = vmatpush1.bf16.msra.mxu0 %v9637_v4  ;;  %9834 = vmatpush1.bf16.msra.mxu1 %v9833_v6  ;;  %v8438_v4 = vld [vmem:[%s14924_s3 + $0x938] sm:$0xff]  ;;  %v9657_v6 = vpack.c.bf16 %v3495_v7, %v3493_v63  ;;  %v9869_v63 = vpack.c.bf16 %v8449_v11, %v8447_v25  ;;  %v3513_v7 = vld [vmem:[%s14924_s3 + $0x380] sm:$0xff] }
 0x1cf   : > { %9640 = vmatprep.subr.bf16.mxu0 %v9639_v9  ;;  %9836 = vmatprep.subr.bf16.mxu1 %v9835_v22  ;;  %v3499_v9 = vld [vmem:[%s14924_s3 + $0x310] sm:$0xff]  ;;  %v9659_v22 = vpack.c.bf16 %v3500_v3, %v3498_v60  ;;  %v9855_v43 = vpack.c.bf16 %v8438_v4, %v8436_v0  ;;  %v3518_v3 = vld [vmem:[%s14924_s3 + $0x3a8] sm:$0xff]  ;;  %v3520_v0 = vld [vmem:[%s14924_s3 + $0x3b8] sm:$0xff] }
 0x1d0   : > { %v8453_v60 = vld [vmem:[%s14924_s3 + $0x9b0] sm:$0xff]  ;;  %v8456_v4 = vld [vmem:[%s14924_s3 + $0x9c8] sm:$0xff]  ;;  %v3529_v11 = vld [vmem:[%s14924_s3 + $0x400] sm:$0xff] }
 0x1d2   : > { %9642 = vmatpush1.bf16.msra.mxu0 %v9641_v1  ;;  %9838 = vmatpush1.bf16.msra.mxu1 %v9837_v39  ;;  %v8442_v1 = vld [vmem:[%s14924_s3 + $0x958] sm:$0xff]  ;;  %v9661_v39 = vpack.c.bf16 %v3499_v9, %v3497_v49  ;;  %v9873_v49 = vpack.c.bf16 %v8453_v60, %v8451_v5  ;;  %v3517_v9 = vld [vmem:[%s14924_s3 + $0x3a0] sm:$0xff] }
 0x1d3   : > { %9644 = vmatprep.subr.bf16.mxu0 %v9643_v15  ;;  %9840 = vmatprep.subr.bf16.mxu1 %v9839_v17  ;;  %v3503_v15 = vld [vmem:[%s14924_s3 + $0x330] sm:$0xff]  ;;  %v9663_v17 = vpack.c.bf16 %v3504_v13, %v3502_v19  ;;  %v9859_v41 = vpack.c.bf16 %v8442_v1, %v8440_v42  ;;  %v3522_v13 = vld [vmem:[%s14924_s3 + $0x3c8] sm:$0xff]  ;;  %v3524_v42 = vld [vmem:[%s14924_s3 + $0x3d8] sm:$0xff] }
 0x1d4   : > { %v8457_v19 = vld [vmem:[%s14924_s3 + $0x9d0] sm:$0xff]  ;;  %v8460_v1 = vld [vmem:[%s14924_s3 + $0x9e8] sm:$0xff]  ;;  %v3533_v60 = vld [vmem:[%s14924_s3 + $0x420] sm:$0xff] }
 0x1d6   : > { %9646 = vmatpush1.bf16.msra.mxu0 %v9645_v54  ;;  %9842 = vmatpush1.bf16.msra.mxu1 %v9841_v38  ;;  %v12103_v46 = vpop.f32.mrb[2].mxu0  ;;  %v8446_v54 = vld [vmem:[%s14924_s3 + $0x978] sm:$0xff]  ;;  %v9665_v38 = vpack.c.bf16 %v3503_v15, %v3501_v31  ;;  %v9877_v31 = vpack.c.bf16 %v8457_v19, %v8455_v10  ;;  %v3521_v15 = vld [vmem:[%s14924_s3 + $0x3c0] sm:$0xff] }
 0x1d7   : > { %v12111_v26 = vpop.f32.mrb[3].mxu0  ;;  %9648 = vmatprep.subr.bf16.mxu0 %v9647_v48  ;;  %9844 = vmatprep.subr.bf16.mxu1 %v9843_v33  ;;  %v3507_v48 = vld [vmem:[%s14924_s3 + $0x350] sm:$0xff]  ;;  %v9667_v33 = vpack.c.bf16 %v3508_v28, %v3506_v27  ;;  %v9863_v34 = vpack.c.bf16 %v8446_v54, %v8444_v29  ;;  %v3526_v28 = vld [vmem:[%s14924_s3 + $0x3e8] sm:$0xff]  ;;  %v3528_v29 = vld [vmem:[%s14924_s3 + $0x3f8] sm:$0xff] }
 0x1d8   : > { %v8461_v27 = vld [vmem:[%s14924_s3 + $0x9f0] sm:$0xff]  ;;  %v8464_v54 = vld [vmem:[%s14924_s3 + $0xa08] sm:$0xff] }
 0x1da   : > { %9650 = vmatpush1.bf16.msra.mxu0 %v9649_v51  ;;  %9846 = vmatpush1.bf16.msra.mxu1 %v9845_v52  ;;  %v8450_v51 = vld [vmem:[%s14924_s3 + $0x998] sm:$0xff]  ;;  %v9669_v52 = vpack.c.bf16 %v3507_v48, %v3505_v32  ;;  %v9881_v32 = vpack.c.bf16 %v8461_v27, %v8459_v21  ;;  %v3525_v48 = vld [vmem:[%s14924_s3 + $0x3e0] sm:$0xff] }
 0x1db   : > { %9652 = vmatprep.subr.bf16.mxu0 %v9651_v20  ;;  %9848 = vmatprep.subr.bf16.mxu1 %v9847_v57  ;;  %v3511_v20 = vld [vmem:[%s14924_s3 + $0x370] sm:$0xff]  ;;  %v9671_v57 = vpack.c.bf16 %v3512_v44, %v3510_v40  ;;  %v9867_v58 = vpack.c.bf16 %v8450_v51, %v8448_v45  ;;  %v3530_v44 = vld [vmem:[%s14924_s3 + $0x408] sm:$0xff]  ;;  %v3532_v45 = vld [vmem:[%s14924_s3 + $0x418] sm:$0xff] }
 0x1dc   : > { %v8465_v40 = vld [vmem:[%s14924_s3 + $0xa10] sm:$0xff]  ;;  %v8468_v51 = vld [vmem:[%s14924_s3 + $0xa28] sm:$0xff] }
 0x1de   : > { %9654 = vmatpush1.bf16.msra.mxu0 %v9653_v62  ;;  %9850 = vmatpush1.bf16.msra.mxu1 %v9849_v12  ;;  %v8454_v62 = vld [vmem:[%s14924_s3 + $0x9b8] sm:$0xff]  ;;  %v9673_v12 = vpack.c.bf16 %v3511_v20, %v3509_v59  ;;  %v9885_v20 = vpack.c.bf16 %v8465_v40, %v8463_v47 }
 0x1df   : > { %9656 = vmatprep.subr.bf16.mxu0 %v9655_v24  ;;  %9852 = vmatprep.subr.bf16.mxu1 %v9851_v37  ;;  %v3515_v24 = vld [vmem:[%s14924_s3 + $0x390] sm:$0xff]  ;;  %v9675_v37 = vpack.c.bf16 %v3516_v61, %v3514_v56  ;;  %v9871_v53 = vpack.c.bf16 %v8454_v62, %v8452_v23  ;;  %v8467_v61 = vld [vmem:[%s14924_s3 + $0xa20] sm:$0xff]  ;;  %v3534_v62 = vld [vmem:[%s14924_s3 + $0x428] sm:$0xff] }
 0x1e0   : > { %v3531_v56 = vld [vmem:[%s14924_s3 + $0x410] sm:$0xff] }
 0x1e1   : > { %v8469_v23 = vld [vmem:[%s14924_s3 + $0xa30] sm:$0xff] }
 0x1e2   : > { %9658 = vmatpush1.bf16.msra.mxu0 %v9657_v6  ;;  %9854 = vmatpush1.bf16.msra.mxu1 %v9853_v8  ;;  %v8458_v6 = vld [vmem:[%s14924_s3 + $0x9d8] sm:$0xff]  ;;  %v9677_v8 = vpack.c.bf16 %v3515_v24, %v3513_v7  ;;  %v9889_v5 = vpack.c.bf16 %v8469_v23, %v8467_v61 }
 0x1e3   : > { %9660 = vmatprep.subr.bf16.mxu0 %v9659_v22  ;;  %9856 = vmatprep.subr.bf16.mxu1 %v9855_v43  ;;  %v3519_v22 = vld [vmem:[%s14924_s3 + $0x3b0] sm:$0xff]  ;;  %v9679_v43 = vpack.c.bf16 %v3520_v0, %v3518_v3  ;;  %v9875_v16 = vpack.c.bf16 %v8458_v6, %v8456_v4  ;;  %v8474_v7 = vld [vmem:[%s14924_s3 + $0xa58] sm:$0xff]  ;;  %v8471_v0 = vld [vmem:[%s14924_s3 + $0xa40] sm:$0xff] }
 0x1e4   : > { %v3535_v3 = vld [vmem:[%s14924_s3 + $0x430] sm:$0xff] }
 0x1e6   : > { %9662 = vmatpush1.bf16.msra.mxu0 %v9661_v39  ;;  %9858 = vmatpush1.bf16.msra.mxu1 %v9857_v14  ;;  %v8462_v39 = vld [vmem:[%s14924_s3 + $0x9f8] sm:$0xff]  ;;  %v9681_v14 = vpack.c.bf16 %v3519_v22, %v3517_v9  ;;  %v8476_v22 = vld [vmem:[%s14924_s3 + $0xa68] sm:$0xff] }
 0x1e7   : > { %9664 = vmatprep.subr.bf16.mxu0 %v9663_v17  ;;  %9860 = vmatprep.subr.bf16.mxu1 %v9859_v41  ;;  %v3523_v17 = vld [vmem:[%s14924_s3 + $0x3d0] sm:$0xff]  ;;  %v9683_v41 = vpack.c.bf16 %v3524_v42, %v3522_v13  ;;  %v9879_v18 = vpack.c.bf16 %v8462_v39, %v8460_v1  ;;  %v3540_v9 = vld [vmem:[%s14924_s3 + $0x458] sm:$0xff]  ;;  %v3537_v13 = vld [vmem:[%s14924_s3 + $0x440] sm:$0xff] }
 0x1e8   : > { %v3539_v42 = vld [vmem:[%s14924_s3 + $0x450] sm:$0xff]  ;;  %v8475_v1 = vld [vmem:[%s14924_s3 + $0xa60] sm:$0xff] }
 0x1ea   : > { %9666 = vmatpush1.bf16.msra.mxu0 %v9665_v38  ;;  %9862 = vmatpush1.bf16.msra.mxu1 %v9861_v30  ;;  %v8466_v38 = vld [vmem:[%s14924_s3 + $0xa18] sm:$0xff]  ;;  %v9685_v30 = vpack.c.bf16 %v3523_v17, %v3521_v15  ;;  %v8480_v17 = vld [vmem:[%s14924_s3 + $0xa88] sm:$0xff] }
 0x1eb   : > { %9668 = vmatprep.subr.bf16.mxu0 %v9667_v33  ;;  %9864 = vmatprep.subr.bf16.mxu1 %v9863_v34  ;;  %v3527_v33 = vld [vmem:[%s14924_s3 + $0x3f0] sm:$0xff]  ;;  %v9687_v34 = vpack.c.bf16 %v3528_v29, %v3526_v28  ;;  %v9883_v35 = vpack.c.bf16 %v8466_v38, %v8464_v54  ;;  %v3544_v15 = vld [vmem:[%s14924_s3 + $0x478] sm:$0xff]  ;;  %v3541_v28 = vld [vmem:[%s14924_s3 + $0x460] sm:$0xff] }
 0x1ec   : > { %v9689_v59 = vpack.c.bf16 %v3527_v33, %v3525_v48  ;;  %v3543_v29 = vld [vmem:[%s14924_s3 + $0x470] sm:$0xff]  ;;  %v8479_v54 = vld [vmem:[%s14924_s3 + $0xa80] sm:$0xff]  ;;  %v3548_v48 = vld [vmem:[%s14924_s3 + $0x498] sm:$0xff] }
 0x1ed   : > { %v8484_v33 = vld [vmem:[%s14924_s3 + $0xaa8] sm:$0xff] }
 0x1ee   : > { %9670 = vmatpush1.bf16.msra.mxu0 %v9669_v52  ;;  %9866 = vmatpush1.bf16.msra.mxu1 %v9865_v36  ;;  %v8470_v52 = vld [vmem:[%s14924_s3 + $0xa38] sm:$0xff] }
 0x1ef   : > { %9672 = vmatprep.subr.bf16.mxu0 %v9671_v57  ;;  %9868 = vmatprep.subr.bf16.mxu1 %v9867_v58  ;;  %v9691_v58 = vpack.c.bf16 %v3532_v45, %v3530_v44  ;;  %v9887_v25 = vpack.c.bf16 %v8470_v52, %v8468_v51  ;;  %v3545_v44 = vld [vmem:[%s14924_s3 + $0x480] sm:$0xff]  ;;  %v3547_v45 = vld [vmem:[%s14924_s3 + $0x490] sm:$0xff] }
 0x1f0   : > { %v8483_v51 = vld [vmem:[%s14924_s3 + $0xaa0] sm:$0xff] }
 0x1f2   : > { %9674 = vmatpush1.bf16.msra.mxu0 %v9673_v12  ;;  %9870 = vmatpush1.bf16.msra.mxu1 %v9869_v63  ;;  %v3536_v12 = vld [vmem:[%s14924_s3 + $0x438] sm:$0xff]  ;;  %v8472_v63 = vld [vmem:[%s14924_s3 + $0xa48] sm:$0xff] }
 0x1f3   : > { %9676 = vmatprep.subr.bf16.mxu0 %v9675_v37  ;;  %9872 = vmatprep.subr.bf16.mxu1 %v9871_v53  ;;  %v9693_v37 = vpack.c.bf16 %v3531_v56, %v3529_v11  ;;  %v9695_v4 = vpack.c.bf16 %v3536_v12, %v3534_v62  ;;  %v9891_v6 = vpack.c.bf16 %v8474_v7, %v8472_v63  ;;  %v8490_v11 = vld [vmem:[%s14924_s3 + $0xad8] sm:$0xff]  ;;  %v3549_v62 = vld [vmem:[%s14924_s3 + $0x4a0] sm:$0xff]  ;;  %v3551_v12 = vld [vmem:[%s14924_s3 + $0x4b0] sm:$0xff] }
 0x1f4   : > { %v9709_v56 = vpack.c.bf16 %v3547_v45, %v3545_v44  ;;  %v8487_v63 = vld [vmem:[%s14924_s3 + $0xac0] sm:$0xff]  ;;  %v8506_v44 = vld [vmem:[%s14924_s3 + $0xb58] sm:$0xff] }
 0x1f6   : > { %9678 = vmatpush1.bf16.msra.mxu0 %v9677_v8  ;;  %9874 = vmatpush1.bf16.msra.mxu1 %v9873_v49  ;;  %v8473_v8 = vld [vmem:[%s14924_s3 + $0xa50] sm:$0xff]  ;;  %v3538_v49 = vld [vmem:[%s14924_s3 + $0x448] sm:$0xff] }
 0x1f7   : > { %9680 = vmatprep.subr.bf16.mxu0 %v9679_v43  ;;  %9876 = vmatprep.subr.bf16.mxu1 %v9875_v16  ;;  %v8478_v43 = vld [vmem:[%s14924_s3 + $0xa78] sm:$0xff]  ;;  %v9697_v16 = vpack.c.bf16 %v3535_v3, %v3533_v60  ;;  %v9893_v10 = vpack.c.bf16 %v8473_v8, %v8471_v0  ;;  %v9699_v19 = vpack.c.bf16 %v3540_v9, %v3538_v49  ;;  %v8492_v60 = vld [vmem:[%s14924_s3 + $0xae8] sm:$0xff]  ;;  %v3553_v8 = vld [vmem:[%s14924_s3 + $0x4c0] sm:$0xff] }
 0x1f8   : > { %v9895_v39 = vpack.c.bf16 %v8478_v43, %v8476_v22  ;;  %v8494_v3 = vld [vmem:[%s14924_s3 + $0xaf8] sm:$0xff]  ;;  %v9713_v0 = vpack.c.bf16 %v3551_v12, %v3549_v62  ;;  %v3555_v49 = vld [vmem:[%s14924_s3 + $0x4d0] sm:$0xff]  ;;  %v8491_v9 = vld [vmem:[%s14924_s3 + $0xae0] sm:$0xff] }
 0x1f9   : > { %v9911_v22 = vpack.c.bf16 %v8494_v3, %v8492_v60  ;;  %v8493_v43 = vld [vmem:[%s14924_s3 + $0xaf0] sm:$0xff]  ;;  %v8510_v62 = vld [vmem:[%s14924_s3 + $0xb78] sm:$0xff] }
 0x1fa   : > { %9682 = vmatpush1.bf16.msra.mxu0 %v9681_v14  ;;  %9878 = vmatpush1.bf16.msra.mxu1 %v9877_v31  ;;  %v8477_v14 = vld [vmem:[%s14924_s3 + $0xa70] sm:$0xff]  ;;  %v3542_v31 = vld [vmem:[%s14924_s3 + $0x468] sm:$0xff] }
 0x1fb   : > { %9684 = vmatprep.subr.bf16.mxu0 %v9683_v41  ;;  %9880 = vmatprep.subr.bf16.mxu1 %v9879_v18  ;;  %v8482_v41 = vld [vmem:[%s14924_s3 + $0xa98] sm:$0xff]  ;;  %v9701_v18 = vpack.c.bf16 %v3539_v42, %v3537_v13  ;;  %v9897_v21 = vpack.c.bf16 %v8477_v14, %v8475_v1  ;;  %v9703_v27 = vpack.c.bf16 %v3544_v15, %v3542_v31  ;;  %v3557_v14 = vld [vmem:[%s14924_s3 + $0x4e0] sm:$0xff]  ;;  %v3559_v31 = vld [vmem:[%s14924_s3 + $0x4f0] sm:$0xff] }
 0x1fc   : > { %v9899_v38 = vpack.c.bf16 %v8482_v41, %v8480_v17  ;;  %v8498_v13 = vld [vmem:[%s14924_s3 + $0xb18] sm:$0xff]  ;;  %v9717_v42 = vpack.c.bf16 %v3555_v49, %v3553_v8  ;;  %v9913_v1 = vpack.c.bf16 %v8493_v43, %v8491_v9  ;;  %v8495_v15 = vld [vmem:[%s14924_s3 + $0xb00] sm:$0xff]  ;;  %v8497_v41 = vld [vmem:[%s14924_s3 + $0xb10] sm:$0xff] }
 0x1fd   : > { %v8509_v3 = vld [vmem:[%s14924_s3 + $0xb70] sm:$0xff]  ;;  %v8514_v8 = vld [vmem:[%s14924_s3 + $0xb98] sm:$0xff]  ;;  %v3573_v43 = vld [vmem:[%s14924_s3 + $0x560] sm:$0xff] }
 0x1fe   : > { %9686 = vmatpush1.bf16.msra.mxu0 %v9685_v30  ;;  %9882 = vmatpush1.bf16.msra.mxu1 %v9881_v32  ;;  %v12347_v36 = vpop.f32.mrb[0].mxu1  ;;  %v8481_v30 = vld [vmem:[%s14924_s3 + $0xa90] sm:$0xff]  ;;  %v3546_v32 = vld [vmem:[%s14924_s3 + $0x488] sm:$0xff] }
 0x1ff   : > { %v12349_v57 = vpop.f32.mrb[1].mxu1  ;;  %9688 = vmatprep.subr.bf16.mxu0 %v9687_v34  ;;  %9884 = vmatprep.subr.bf16.mxu1 %v9883_v35  ;;  %v8486_v34 = vld [vmem:[%s14924_s3 + $0xab8] sm:$0xff]  ;;  %v9705_v35 = vpack.c.bf16 %v3543_v29, %v3541_v28  ;;  %v9901_v47 = vpack.c.bf16 %v8481_v30, %v8479_v54  ;;  %v9707_v40 = vpack.c.bf16 %v3548_v48, %v3546_v32  ;;  %v3561_v30 = vld [vmem:[%s14924_s3 + $0x500] sm:$0xff]  ;;  %v3563_v32 = vld [vmem:[%s14924_s3 + $0x510] sm:$0xff] }
 0x200   : > { %3736 = vmatprep.mubr.f32.mxu0 %v12349_v57  ;;  %4217 = vmatprep.mubr.f32.mxu1 %v12349_v57  ;;  %v9903_v52 = vpack.c.bf16 %v8486_v34, %v8484_v33  ;;  %v8502_v28 = vld [vmem:[%s14924_s3 + $0xb38] sm:$0xff]  ;;  %v9721_v29 = vpack.c.bf16 %v3559_v31, %v3557_v14  ;;  %v9917_v54 = vpack.c.bf16 %v8497_v41, %v8495_v15  ;;  %v8499_v48 = vld [vmem:[%s14924_s3 + $0xb20] sm:$0xff]  ;;  %v8501_v34 = vld [vmem:[%s14924_s3 + $0xb30] sm:$0xff] }
 0x201   : > { %v9725_v45 = vpack.c.bf16 %v3563_v32, %v3561_v30  ;;  %v8518_v14 = vld [vmem:[%s14924_s3 + $0xbb8] sm:$0xff]  ;;  %v3577_v41 = vld [vmem:[%s14924_s3 + $0x580] sm:$0xff] }
 0x202   : > { %9690 = vmatpush1.bf16.msra.mxu0 %v9689_v59  ;;  %9886 = vmatpush1.bf16.msra.mxu1 %v9885_v20  ;;  %v12377_v24 = vpop.f32.mrb[2].mxu1  ;;  %v8485_v59 = vld [vmem:[%s14924_s3 + $0xab0] sm:$0xff]  ;;  %v3550_v20 = vld [vmem:[%s14924_s3 + $0x4a8] sm:$0xff]  ;;  %v8522_v30 = vld [vmem:[%s14924_s3 + $0xbd8] sm:$0xff] }
 0x203   : > { %v9328_v53 = vpop.f32.mrb[3].mxu1  ;;  %9692 = vmatprep.subr.bf16.mxu0 %v9691_v58  ;;  %9888 = vmatprep.subr.bf16.mxu1 %v9887_v25  ;;  %v3552_v58 = vld [vmem:[%s14924_s3 + $0x4b8] sm:$0xff]  ;;  %v8488_v25 = vld [vmem:[%s14924_s3 + $0xac8] sm:$0xff]  ;;  %v9905_v61 = vpack.c.bf16 %v8485_v59, %v8483_v51  ;;  %v9921_v51 = vpack.c.bf16 %v8501_v34, %v8499_v48  ;;  %v3565_v59 = vld [vmem:[%s14924_s3 + $0x520] sm:$0xff] }
 0x204   : > { %v9711_v23 = vpack.c.bf16 %v3552_v58, %v3550_v20  ;;  %v9907_v7 = vpack.c.bf16 %v8490_v11, %v8488_v25  ;;  %v3554_v53 = vld [vmem:[%s14924_s3 + $0x4c8] sm:$0xff]  ;;  %v3567_v20 = vld [vmem:[%s14924_s3 + $0x530] sm:$0xff]  ;;  %v8503_v58 = vld [vmem:[%s14924_s3 + $0xb40] sm:$0xff] }
 0x205   : > { %3737 = vmatmul.mubr.f32.vlgmr.msra.gmra.mrb[4].mxu0 %v12347_v36  ;;  %4218 = vmatmul.mubr.f32.vlgmr.msra.gmra.mrb[4].mxu1 %v12347_v36  ;;  %v8505_v11 = vld [vmem:[%s14924_s3 + $0xb50] sm:$0xff]  ;;  %v9729_v12 = vpack.c.bf16 %v3567_v20, %v3565_v59  ;;  %v3581_v34 = vld [vmem:[%s14924_s3 + $0x5a0] sm:$0xff]  ;;  %v8526_v59 = vld [vmem:[%s14924_s3 + $0xbf8] sm:$0xff] }
 0x206   : > { %9694 = vmatpush1.bf16.msra.mxu0 %v9693_v37  ;;  %3807 = vmatprep.mubr.f32.mxu0 %v12111_v26  ;;  %v8489_v37 = vld [vmem:[%s14924_s3 + $0xad0] sm:$0xff] }
 0x207   : > { %9890 = vmatpush1.bf16.msra.mxu1 %v9889_v5  ;;  %4288 = vmatprep.mubr.f32.mxu1 %v12111_v26  ;;  %v3556_v5 = vld [vmem:[%s14924_s3 + $0x4d8] sm:$0xff] }
 0x208   : > { %9696 = vmatprep.subr.bf16.mxu0 %v9695_v4  ;;  %9892 = vmatprep.subr.bf16.mxu1 %v9891_v6  ;;  %v9909_v4 = vpack.c.bf16 %v8489_v37, %v8487_v63  ;;  %v9715_v6 = vpack.c.bf16 %v3556_v5, %v3554_v53  ;;  %v9925_v63 = vpack.c.bf16 %v8505_v11, %v8503_v58  ;;  %v3569_v37 = vld [vmem:[%s14924_s3 + $0x540] sm:$0xff]  ;;  %v3571_v53 = vld [vmem:[%s14924_s3 + $0x550] sm:$0xff] }
 0x209   : > { %v8507_v5 = vld [vmem:[%s14924_s3 + $0xb60] sm:$0xff]  ;;  %v9733_v49 = vpack.c.bf16 %v3571_v53, %v3569_v37  ;;  %v8530_v37 = vld [vmem:[%s14924_s3 + $0xc18] sm:$0xff] }
 0x20a   : > { %9698 = vmatpush1.bf16.msra.mxu0 %v9697_v16  ;;  %v3558_v16 = vld [vmem:[%s14924_s3 + $0x4e8] sm:$0xff]  ;;  %v9929_v9 = vpack.c.bf16 %v8509_v3, %v8507_v5  ;;  %v3585_v11 = vld [vmem:[%s14924_s3 + $0x5c0] sm:$0xff] }
 0x20b   : > { %9894 = vmatpush1.bf16.msra.mxu1 %v9893_v10  ;;  %9700 = vmatprep.subr.bf16.mxu0 %v9699_v19  ;;  %v3560_v10 = vld [vmem:[%s14924_s3 + $0x4f8] sm:$0xff]  ;;  %v8496_v19 = vld [vmem:[%s14924_s3 + $0xb08] sm:$0xff]  ;;  %v3589_v3 = vld [vmem:[%s14924_s3 + $0x5e0] sm:$0xff] }
 0x20c   : > { %9896 = vmatprep.subr.bf16.mxu1 %v9895_v39  ;;  %v9719_v39 = vpack.c.bf16 %v3560_v10, %v3558_v16  ;;  %v9915_v17 = vpack.c.bf16 %v8498_v13, %v8496_v19  ;;  %v3575_v16 = vld [vmem:[%s14924_s3 + $0x570] sm:$0xff]  ;;  %v8511_v10 = vld [vmem:[%s14924_s3 + $0xb80] sm:$0xff] }
 0x20d   : > { %v8513_v13 = vld [vmem:[%s14924_s3 + $0xb90] sm:$0xff]  ;;  %v9737_v31 = vpack.c.bf16 %v3575_v16, %v3573_v43  ;;  %v8534_v43 = vld [vmem:[%s14924_s3 + $0xc38] sm:$0xff] }
 0x20e   : > { %9702 = vmatpush1.bf16.msra.mxu0 %v9701_v18  ;;  %v3562_v18 = vld [vmem:[%s14924_s3 + $0x508] sm:$0xff]  ;;  %v9933_v15 = vpack.c.bf16 %v8513_v13, %v8511_v10  ;;  %v3593_v13 = vld [vmem:[%s14924_s3 + $0x600] sm:$0xff] }
 0x20f   : > { %9898 = vmatpush1.bf16.msra.mxu1 %v9897_v21  ;;  %9704 = vmatprep.subr.bf16.mxu0 %v9703_v27  ;;  %v3564_v21 = vld [vmem:[%s14924_s3 + $0x518] sm:$0xff]  ;;  %v8500_v27 = vld [vmem:[%s14924_s3 + $0xb28] sm:$0xff] }
 0x210   : > { %9900 = vmatprep.subr.bf16.mxu1 %v9899_v38  ;;  %v9723_v38 = vpack.c.bf16 %v3564_v21, %v3562_v18  ;;  %v9919_v33 = vpack.c.bf16 %v8502_v28, %v8500_v27  ;;  %v3579_v18 = vld [vmem:[%s14924_s3 + $0x590] sm:$0xff]  ;;  %v8515_v21 = vld [vmem:[%s14924_s3 + $0xba0] sm:$0xff] }
 0x211   : > { %v8517_v28 = vld [vmem:[%s14924_s3 + $0xbb0] sm:$0xff]  ;;  %v9741_v32 = vpack.c.bf16 %v3579_v18, %v3577_v41  ;;  %v8734_v41 = vld [vmem:[%s14924_s3 + $0x1268] sm:$0xff]  ;;  %v8736_v18 = vld [vmem:[%s14924_s3 + $0x1278] sm:$0xff] }
 0x212   : > { %9706 = vmatpush1.bf16.msra.mxu0 %v9705_v35  ;;  %v3566_v35 = vld [vmem:[%s14924_s3 + $0x528] sm:$0xff]  ;;  %v9937_v48 = vpack.c.bf16 %v8517_v28, %v8515_v21  ;;  %v10151_v28 = vpack.c.bf16 %v8736_v18, %v8734_v41  ;;  %v8559_v18 = vld [vmem:[%s14924_s3 + $0xcf8] sm:$0xff] }
 0x213   : > { %9902 = vmatpush1.bf16.msra.mxu1 %v9901_v47  ;;  %9708 = vmatprep.subr.bf16.mxu0 %v9707_v40  ;;  %v3568_v47 = vld [vmem:[%s14924_s3 + $0x538] sm:$0xff]  ;;  %v8504_v40 = vld [vmem:[%s14924_s3 + $0xb48] sm:$0xff] }
 0x214   : > { %9904 = vmatprep.subr.bf16.mxu1 %v9903_v52  ;;  %v9727_v52 = vpack.c.bf16 %v3568_v47, %v3566_v35  ;;  %v9923_v25 = vpack.c.bf16 %v8506_v44, %v8504_v40  ;;  %v3583_v35 = vld [vmem:[%s14924_s3 + $0x5b0] sm:$0xff]  ;;  %v8519_v47 = vld [vmem:[%s14924_s3 + $0xbc0] sm:$0xff]  ;;  %v8557_v41 = vld [vmem:[%s14924_s3 + $0xce8] sm:$0xff] }
 0x215   : > { %v8521_v44 = vld [vmem:[%s14924_s3 + $0xbd0] sm:$0xff]  ;;  %v9745_v20 = vpack.c.bf16 %v3583_v35, %v3581_v34  ;;  %v8738_v34 = vld [vmem:[%s14924_s3 + $0x1288] sm:$0xff]  ;;  %v8740_v35 = vld [vmem:[%s14924_s3 + $0x1298] sm:$0xff] }
 0x216   : > { %9710 = vmatpush1.bf16.msra.mxu0 %v9709_v56  ;;  %v3570_v56 = vld [vmem:[%s14924_s3 + $0x548] sm:$0xff]  ;;  %v9941_v58 = vpack.c.bf16 %v8521_v44, %v8519_v47  ;;  %v8542_v44 = vld [vmem:[%s14924_s3 + $0xc70] sm:$0xff] }
 0x217   : > { %9906 = vmatpush1.bf16.msra.mxu1 %v9905_v61  ;;  %9712 = vmatprep.subr.bf16.mxu0 %v9711_v23  ;;  %v3572_v61 = vld [vmem:[%s14924_s3 + $0x558] sm:$0xff]  ;;  %v8508_v23 = vld [vmem:[%s14924_s3 + $0xb68] sm:$0xff] }
 0x218   : > { %9908 = vmatprep.subr.bf16.mxu1 %v9907_v7  ;;  %v9731_v7 = vpack.c.bf16 %v3572_v61, %v3570_v56  ;;  %v9927_v60 = vpack.c.bf16 %v8510_v62, %v8508_v23  ;;  %v3587_v56 = vld [vmem:[%s14924_s3 + $0x5d0] sm:$0xff]  ;;  %v8523_v61 = vld [vmem:[%s14924_s3 + $0xbe0] sm:$0xff] }
 0x219   : > { %v8525_v62 = vld [vmem:[%s14924_s3 + $0xbf0] sm:$0xff]  ;;  %v9749_v53 = vpack.c.bf16 %v3587_v56, %v3585_v11  ;;  %v8744_v11 = vld [vmem:[%s14924_s3 + $0x12b8] sm:$0xff] }
 0x21a   : > { %9714 = vmatpush1.bf16.msra.mxu0 %v9713_v0  ;;  %v3574_v0 = vld [vmem:[%s14924_s3 + $0x568] sm:$0xff]  ;;  %v9945_v5 = vpack.c.bf16 %v8525_v62, %v8523_v61  ;;  %v8544_v62 = vld [vmem:[%s14924_s3 + $0xc80] sm:$0xff] }
 0x21b   : > { %9910 = vmatpush1.bf16.msra.mxu1 %v9909_v4  ;;  %9716 = vmatprep.subr.bf16.mxu0 %v9715_v6  ;;  %v3576_v4 = vld [vmem:[%s14924_s3 + $0x578] sm:$0xff]  ;;  %v8512_v6 = vld [vmem:[%s14924_s3 + $0xb88] sm:$0xff] }
 0x21c   : > { %9912 = vmatprep.subr.bf16.mxu1 %v9911_v22  ;;  %v9735_v22 = vpack.c.bf16 %v3576_v4, %v3574_v0  ;;  %v9931_v19 = vpack.c.bf16 %v8514_v8, %v8512_v6  ;;  %v3591_v0 = vld [vmem:[%s14924_s3 + $0x5f0] sm:$0xff]  ;;  %v8527_v4 = vld [vmem:[%s14924_s3 + $0xc00] sm:$0xff] }
 0x21d   : > { %v8529_v8 = vld [vmem:[%s14924_s3 + $0xc10] sm:$0xff]  ;;  %v9753_v16 = vpack.c.bf16 %v3591_v0, %v3589_v3 }
 0x21e   : > { %9718 = vmatpush1.bf16.msra.mxu0 %v9717_v42  ;;  %v3578_v42 = vld [vmem:[%s14924_s3 + $0x588] sm:$0xff]  ;;  %v9949_v10 = vpack.c.bf16 %v8529_v8, %v8527_v4  ;;  %v8550_v8 = vld [vmem:[%s14924_s3 + $0xcb0] sm:$0xff] }
 0x21f   : > { %9914 = vmatpush1.bf16.msra.mxu1 %v9913_v1  ;;  %9720 = vmatprep.subr.bf16.mxu0 %v9719_v39  ;;  %v3580_v1 = vld [vmem:[%s14924_s3 + $0x598] sm:$0xff]  ;;  %v8516_v39 = vld [vmem:[%s14924_s3 + $0xba8] sm:$0xff] }
 0x220   : > { %9916 = vmatprep.subr.bf16.mxu1 %v9915_v17  ;;  %v9739_v17 = vpack.c.bf16 %v3580_v1, %v3578_v42  ;;  %v9935_v27 = vpack.c.bf16 %v8518_v14, %v8516_v39  ;;  %v3595_v42 = vld [vmem:[%s14924_s3 + $0x610] sm:$0xff]  ;;  %v8531_v39 = vld [vmem:[%s14924_s3 + $0xc20] sm:$0xff] }
 0x221   : > { %v8533_v14 = vld [vmem:[%s14924_s3 + $0xc30] sm:$0xff] }
 0x222   : > { %9722 = vmatpush1.bf16.msra.mxu0 %v9721_v29  ;;  %v3582_v29 = vld [vmem:[%s14924_s3 + $0x5a8] sm:$0xff]  ;;  %v9953_v21 = vpack.c.bf16 %v8533_v14, %v8531_v39  ;;  %v8552_v39 = vld [vmem:[%s14924_s3 + $0xcc0] sm:$0xff]  ;;  %v8554_v14 = vld [vmem:[%s14924_s3 + $0xcd0] sm:$0xff] }
 0x223   : > { %9918 = vmatpush1.bf16.msra.mxu1 %v9917_v54  ;;  %9724 = vmatprep.subr.bf16.mxu0 %v9723_v38  ;;  %v3584_v54 = vld [vmem:[%s14924_s3 + $0x5b8] sm:$0xff]  ;;  %v8520_v38 = vld [vmem:[%s14924_s3 + $0xbc8] sm:$0xff] }
 0x224   : > { %9920 = vmatprep.subr.bf16.mxu1 %v9919_v33  ;;  %v9743_v33 = vpack.c.bf16 %v3584_v54, %v3582_v29  ;;  %v9939_v40 = vpack.c.bf16 %v8522_v30, %v8520_v38  ;;  %v8536_v29 = vld [vmem:[%s14924_s3 + $0xc40] sm:$0xff]  ;;  %v8538_v54 = vld [vmem:[%s14924_s3 + $0xc50] sm:$0xff] }
 0x225   : > { %v8733_v38 = vld [vmem:[%s14924_s3 + $0x1260] sm:$0xff]  ;;  %v8735_v30 = vld [vmem:[%s14924_s3 + $0x1270] sm:$0xff] }
 0x226   : > { %9726 = vmatpush1.bf16.msra.mxu0 %v9725_v45  ;;  %v3586_v45 = vld [vmem:[%s14924_s3 + $0x5c8] sm:$0xff]  ;;  %v10153_v47 = vpack.c.bf16 %v8735_v30, %v8733_v38  ;;  %v8556_v38 = vld [vmem:[%s14924_s3 + $0xce0] sm:$0xff]  ;;  %v8558_v30 = vld [vmem:[%s14924_s3 + $0xcf0] sm:$0xff] }
 0x227   : > { %9922 = vmatpush1.bf16.msra.mxu1 %v9921_v51  ;;  %9728 = vmatprep.subr.bf16.mxu0 %v9727_v52  ;;  %v3588_v51 = vld [vmem:[%s14924_s3 + $0x5d8] sm:$0xff]  ;;  %v8524_v52 = vld [vmem:[%s14924_s3 + $0xbe8] sm:$0xff] }
 0x228   : > { %9924 = vmatprep.subr.bf16.mxu1 %v9923_v25  ;;  %v9747_v25 = vpack.c.bf16 %v3588_v51, %v3586_v45  ;;  %v9943_v23 = vpack.c.bf16 %v8526_v59, %v8524_v52  ;;  %v8737_v45 = vld [vmem:[%s14924_s3 + $0x1280] sm:$0xff]  ;;  %v8739_v52 = vld [vmem:[%s14924_s3 + $0x1290] sm:$0xff]  ;;  %v8545_v59 = vld [vmem:[%s14924_s3 + $0xc88] sm:$0xff] }
 0x229   : > { %v10157_v61 = vpack.c.bf16 %v8739_v52, %v8737_v45  ;;  %v8560_v52 = vld [vmem:[%s14924_s3 + $0xd00] sm:$0xff] }
 0x22a   : > { %9730 = vmatpush1.bf16.msra.mxu0 %v9729_v12  ;;  %v3590_v12 = vld [vmem:[%s14924_s3 + $0x5e8] sm:$0xff] }
 0x22b   : > { %9926 = vmatpush1.bf16.msra.mxu1 %v9925_v63  ;;  %9732 = vmatprep.subr.bf16.mxu0 %v9731_v7  ;;  %v3592_v63 = vld [vmem:[%s14924_s3 + $0x5f8] sm:$0xff]  ;;  %v8528_v7 = vld [vmem:[%s14924_s3 + $0xc08] sm:$0xff] }
 0x22c   : > { %9928 = vmatprep.subr.bf16.mxu1 %v9927_v60  ;;  %v9751_v60 = vpack.c.bf16 %v3592_v63, %v3590_v12  ;;  %v9947_v6 = vpack.c.bf16 %v8530_v37, %v8528_v7  ;;  %v8546_v12 = vld [vmem:[%s14924_s3 + $0xc90] sm:$0xff]  ;;  %v8741_v63 = vld [vmem:[%s14924_s3 + $0x12a0] sm:$0xff] }
 0x22d   : > { %v8743_v37 = vld [vmem:[%s14924_s3 + $0x12b0] sm:$0xff]  ;;  %v9965_v3 = vpack.c.bf16 %v8546_v12, %v8544_v62 }
 0x22e   : > { %9734 = vmatpush1.bf16.msra.mxu0 %v9733_v49  ;;  %v3594_v49 = vld [vmem:[%s14924_s3 + $0x608] sm:$0xff]  ;;  %v10161_v0 = vpack.c.bf16 %v8743_v37, %v8741_v63  ;;  %v8566_v37 = vld [vmem:[%s14924_s3 + $0xd30] sm:$0xff] }
 0x22f   : > { %9930 = vmatpush1.bf16.msra.mxu1 %v9929_v9  ;;  %9736 = vmatprep.subr.bf16.mxu0 %v9735_v22  ;;  %v3596_v9 = vld [vmem:[%s14924_s3 + $0x618] sm:$0xff]  ;;  %v8532_v22 = vld [vmem:[%s14924_s3 + $0xc28] sm:$0xff] }
 0x230   : > { %9932 = vmatprep.subr.bf16.mxu1 %v9931_v19  ;;  %v9755_v19 = vpack.c.bf16 %v3596_v9, %v3594_v49  ;;  %v9951_v1 = vpack.c.bf16 %v8534_v43, %v8532_v22  ;;  %v8745_v49 = vld [vmem:[%s14924_s3 + $0x12c0] sm:$0xff]  ;;  %v8747_v22 = vld [vmem:[%s14924_s3 + $0x12d0] sm:$0xff]  ;;  %v8553_v43 = vld [vmem:[%s14924_s3 + $0xcc8] sm:$0xff] }
 0x232   : > { %9738 = vmatpush1.bf16.msra.mxu0 %v9737_v31  ;;  %v8537_v31 = vld [vmem:[%s14924_s3 + $0xc48] sm:$0xff] }
 0x233   : > { %9934 = vmatpush1.bf16.msra.mxu1 %v9933_v15  ;;  %9740 = vmatprep.subr.bf16.mxu0 %v9739_v17  ;;  %v8539_v15 = vld [vmem:[%s14924_s3 + $0xc58] sm:$0xff]  ;;  %v9757_v17 = vpack.c.bf16 %v3595_v42, %v3593_v13  ;;  %v10165_v42 = vpack.c.bf16 %v8747_v22, %v8745_v49  ;;  %v8570_v22 = vld [vmem:[%s14924_s3 + $0xd50] sm:$0xff] }
 0x234   : > { %9936 = vmatprep.subr.bf16.mxu1 %v9935_v27  ;;  %v9955_v27 = vpack.c.bf16 %v8539_v15, %v8537_v31  ;;  %v8749_v31 = vld [vmem:[%s14924_s3 + $0x12e0] sm:$0xff] }
 0x236   : > { %9742 = vmatpush1.bf16.msra.mxu0 %v9741_v32  ;;  %v8541_v32 = vld [vmem:[%s14924_s3 + $0xc68] sm:$0xff] }
 0x237   : > { %9938 = vmatpush1.bf16.msra.mxu1 %v9937_v48  ;;  %9744 = vmatprep.subr.bf16.mxu0 %v9743_v33  ;;  %v8543_v48 = vld [vmem:[%s14924_s3 + $0xc78] sm:$0xff]  ;;  %v9957_v33 = vpack.c.bf16 %v8538_v54, %v8536_v29  ;;  %v9975_v54 = vpack.c.bf16 %v8559_v18, %v8557_v41  ;;  %v8769_v41 = vld [vmem:[%s14924_s3 + $0x1380] sm:$0xff] }
 0x238   : > { %9940 = vmatprep.subr.bf16.mxu1 %v9939_v40  ;;  %v8540_v40 = vld [vmem:[%s14924_s3 + $0xc60] sm:$0xff]  ;;  %v9959_v51 = vpack.c.bf16 %v8543_v48, %v8541_v32 }
 0x239   : > { %v9961_v56 = vpack.c.bf16 %v8542_v44, %v8540_v40  ;;  %v8753_v32 = vld [vmem:[%s14924_s3 + $0x1300] sm:$0xff]  ;;  %v8760_v40 = vld [vmem:[%s14924_s3 + $0x1338] sm:$0xff]  ;;  %v9977_v44 = vpack.c.bf16 %v8558_v30, %v8556_v38 }
 0x23a   : > { %9746 = vmatpush1.bf16.msra.mxu0 %v9745_v20  ;;  %v8547_v20 = vld [vmem:[%s14924_s3 + $0xc98] sm:$0xff] }
 0x23b   : > { %9942 = vmatpush1.bf16.msra.mxu1 %v9941_v58  ;;  %9748 = vmatprep.subr.bf16.mxu0 %v9747_v25  ;;  %v10155_v58 = vpack.c.bf16 %v8740_v35, %v8738_v34  ;;  %v8742_v25 = vld [vmem:[%s14924_s3 + $0x12a8] sm:$0xff]  ;;  %v8563_v35 = vld [vmem:[%s14924_s3 + $0xd18] sm:$0xff] }
 0x23c   : > { %9944 = vmatprep.subr.bf16.mxu1 %v9943_v23  ;;  %v9963_v23 = vpack.c.bf16 %v8547_v20, %v8545_v59  ;;  %v10159_v7 = vpack.c.bf16 %v8744_v11, %v8742_v25  ;;  %v8561_v34 = vld [vmem:[%s14924_s3 + $0xd08] sm:$0xff]  ;;  %v8562_v59 = vld [vmem:[%s14924_s3 + $0xd10] sm:$0xff]  ;;  %v8757_v20 = vld [vmem:[%s14924_s3 + $0x1320] sm:$0xff] }
 0x23d   : > { %v8759_v25 = vld [vmem:[%s14924_s3 + $0x1330] sm:$0xff]  ;;  %v8565_v11 = vld [vmem:[%s14924_s3 + $0xd28] sm:$0xff]  ;;  %v9981_v62 = vpack.c.bf16 %v8562_v59, %v8560_v52 }
 0x23e   : > { %9750 = vmatpush1.bf16.msra.mxu0 %v9749_v53  ;;  %v8549_v53 = vld [vmem:[%s14924_s3 + $0xca8] sm:$0xff]  ;;  %v10177_v12 = vpack.c.bf16 %v8759_v25, %v8757_v20  ;;  %v8582_v25 = vld [vmem:[%s14924_s3 + $0xdb0] sm:$0xff] }
 0x23f   : > { %9946 = vmatpush1.bf16.msra.mxu1 %v9945_v5  ;;  %9752 = vmatprep.subr.bf16.mxu0 %v9751_v60  ;;  %v8551_v5 = vld [vmem:[%s14924_s3 + $0xcb8] sm:$0xff]  ;;  %v8746_v60 = vld [vmem:[%s14924_s3 + $0x12c8] sm:$0xff] }
 0x240   : > { %9948 = vmatprep.subr.bf16.mxu1 %v9947_v6  ;;  %v9967_v4 = vpack.c.bf16 %v8551_v5, %v8549_v53  ;;  %v8548_v6 = vld [vmem:[%s14924_s3 + $0xca0] sm:$0xff] }
 0x241   : > { %v9969_v13 = vpack.c.bf16 %v8550_v8, %v8548_v6  ;;  %v8761_v53 = vld [vmem:[%s14924_s3 + $0x1340] sm:$0xff] }
 0x242   : > { %9754 = vmatpush1.bf16.msra.mxu0 %v9753_v16  ;;  %v8555_v16 = vld [vmem:[%s14924_s3 + $0xcd8] sm:$0xff] }
 0x243   : > { %9950 = vmatpush1.bf16.msra.mxu1 %v9949_v10  ;;  %9756 = vmatprep.subr.bf16.mxu0 %v9755_v19  ;;  %v8750_v10 = vld [vmem:[%s14924_s3 + $0x12e8] sm:$0xff]  ;;  %v8752_v19 = vld [vmem:[%s14924_s3 + $0x12f8] sm:$0xff] }
 0x244   : > { %9952 = vmatprep.subr.bf16.mxu1 %v9951_v1  ;;  %v9971_v1 = vpack.c.bf16 %v8555_v16, %v8553_v43  ;;  %v10167_v15 = vpack.c.bf16 %v8752_v19, %v8750_v10  ;;  %v8765_v43 = vld [vmem:[%s14924_s3 + $0x1360] sm:$0xff]  ;;  %v8767_v10 = vld [vmem:[%s14924_s3 + $0x1370] sm:$0xff]  ;;  %v8573_v19 = vld [vmem:[%s14924_s3 + $0xd68] sm:$0xff] }
 0x245   : > { %3808 = vmatmul.mubr.f32.vlgmr.msra.gmra.mrb[4].mxu0 %v12103_v46 }
 0x246   : > { %4289 = vmatmul.mubr.f32.vlgmr.msra.gmra.mrb[4].mxu1 %v12103_v46  ;;  %9758 = vmatpush1.bf16.msra.mxu0 %v9757_v17  ;;  %v8751_v17 = vld [vmem:[%s14924_s3 + $0x12f0] sm:$0xff] }
 0x247   : > { %9954 = vmatpush1.bf16.msra.mxu1 %v9953_v21  ;;  %3878 = vmatprep.mubr.f32.mxu0 %v10906_v2  ;;  %v8754_v21 = vld [vmem:[%s14924_s3 + $0x1308] sm:$0xff]  ;;  %v10169_v29 = vpack.c.bf16 %v8751_v17, %v8749_v31  ;;  %v8574_v17 = vld [vmem:[%s14924_s3 + $0xd70] sm:$0xff] }
 0x248   : > { %4359 = vmatprep.mubr.f32.mxu1 %v10906_v2  ;;  %9956 = vmatprep.subr.bf16.mxu0 %v9955_v27  ;;  %v8756_v27 = vld [vmem:[%s14924_s3 + $0x1318] sm:$0xff] }
 0x249   : > { %10152 = vmatprep.subr.bf16.mxu1 %v10151_v28  ;;  %v9973_v28 = vpack.c.bf16 %v8554_v14, %v8552_v39  ;;  %v10171_v48 = vpack.c.bf16 %v8756_v27, %v8754_v21  ;;  %v10185_v14 = vpack.c.bf16 %v8767_v10, %v8765_v43  ;;  %v8771_v21 = vld [vmem:[%s14924_s3 + $0x1390] sm:$0xff]  ;;  %v8577_v27 = vld [vmem:[%s14924_s3 + $0xd88] sm:$0xff] }
 0x24a   : > { %v10189_v30 = vpack.c.bf16 %v8771_v21, %v8769_v41  ;;  %v8590_v10 = vld [vmem:[%s14924_s3 + $0xdf0] sm:$0xff] }
 0x24b   : > { %v8594_v21 = vld [vmem:[%s14924_s3 + $0xe10] sm:$0xff] }
 0x24d   : > { %8338 = vmatmul.mubr.msk.f32.vlgmr.msra.gmra.mrb[4].mxu0 %vm3597_vm11, %v12377_v24 }
 0x24e   : > { %8535 = vmatmul.mubr.msk.f32.vlgmr.msra.gmra.mrb[4].mxu1 %vm3597_vm11, %v12377_v24  ;;  %9958 = vmatpush1.bf16.msra.mxu0 %v9957_v33  ;;  %v8755_v33 = vld [vmem:[%s14924_s3 + $0x1310] sm:$0xff] }
 0x24f   : > { %10154 = vmatpush1.bf16.msra.mxu1 %v10153_v47  ;;  %4629 = vmatprep.mubr.f32.mxu0 %v11983_v55  ;;  %v8758_v47 = vld [vmem:[%s14924_s3 + $0x1328] sm:$0xff]  ;;  %v10173_v45 = vpack.c.bf16 %v8755_v33, %v8753_v32  ;;  %v8578_v33 = vld [vmem:[%s14924_s3 + $0xd90] sm:$0xff] }
 0x250   : > { %5112 = vmatprep.mubr.f32.mxu1 %v11983_v55  ;;  %9960 = vmatprep.subr.bf16.mxu0 %v9959_v51  ;;  %v8748_v55 = vld [vmem:[%s14924_s3 + $0x12d8] sm:$0xff]  ;;  %v9979_v51 = vpack.c.bf16 %v8563_v35, %v8561_v34  ;;  %v8773_v34 = vld [vmem:[%s14924_s3 + $0x13a0] sm:$0xff] }
 0x251   : > { %10156 = vmatprep.subr.bf16.mxu1 %v10155_v58  ;;  %v10163_v9 = vpack.c.bf16 %v8748_v55, %v8746_v60  ;;  %v10175_v58 = vpack.c.bf16 %v8760_v40, %v8758_v47  ;;  %v8763_v60 = vld [vmem:[%s14924_s3 + $0x1350] sm:$0xff]  ;;  %v8569_v55 = vld [vmem:[%s14924_s3 + $0xd48] sm:$0xff] }
 0x252   : > { %9962 = vmatpush1.bf16.msra.mxu0 %v9961_v56  ;;  %v8567_v56 = vld [vmem:[%s14924_s3 + $0xd38] sm:$0xff]  ;;  %v10181_v8 = vpack.c.bf16 %v8763_v60, %v8761_v53  ;;  %v8775_v47 = vld [vmem:[%s14924_s3 + $0x13b0] sm:$0xff]  ;;  %v8581_v40 = vld [vmem:[%s14924_s3 + $0xda8] sm:$0xff] }
 0x253   : > { %10158 = vmatpush1.bf16.msra.mxu1 %v10157_v61  ;;  %9964 = vmatprep.subr.bf16.mxu0 %v9963_v23  ;;  %v8762_v61 = vld [vmem:[%s14924_s3 + $0x1348] sm:$0xff]  ;;  %v8764_v23 = vld [vmem:[%s14924_s3 + $0x1358] sm:$0xff]  ;;  %v9983_v63 = vpack.c.bf16 %v8567_v56, %v8565_v11  ;;  %v10193_v59 = vpack.c.bf16 %v8775_v47, %v8773_v34  ;;  %v8777_v11 = vld [vmem:[%s14924_s3 + $0x13c0] sm:$0xff] }
 0x254   : > { %10160 = vmatprep.subr.bf16.mxu1 %v10159_v7  ;;  %v8564_v7 = vld [vmem:[%s14924_s3 + $0xd20] sm:$0xff]  ;;  %v10179_v5 = vpack.c.bf16 %v8764_v23, %v8762_v61  ;;  %v8779_v61 = vld [vmem:[%s14924_s3 + $0x13d0] sm:$0xff]  ;;  %v8585_v23 = vld [vmem:[%s14924_s3 + $0xdc8] sm:$0xff] }
 0x255   : > { %v9985_v6 = vpack.c.bf16 %v8566_v37, %v8564_v7  ;;  %v10197_v37 = vpack.c.bf16 %v8779_v61, %v8777_v11  ;;  %v8586_v60 = vld [vmem:[%s14924_s3 + $0xdd0] sm:$0xff] }
 0x256   : > { %9966 = vmatpush1.bf16.msra.mxu0 %v9965_v3  ;;  %v8571_v3 = vld [vmem:[%s14924_s3 + $0xd58] sm:$0xff]  ;;  %v8598_v47 = vld [vmem:[%s14924_s3 + $0xe30] sm:$0xff] }
 0x257   : > { %10162 = vmatpush1.bf16.msra.mxu1 %v10161_v0  ;;  %9968 = vmatprep.subr.bf16.mxu0 %v9967_v4  ;;  %v8766_v0 = vld [vmem:[%s14924_s3 + $0x1368] sm:$0xff]  ;;  %v8768_v4 = vld [vmem:[%s14924_s3 + $0x1378] sm:$0xff]  ;;  %v9987_v49 = vpack.c.bf16 %v8571_v3, %v8569_v55  ;;  %v8781_v55 = vld [vmem:[%s14924_s3 + $0x13e0] sm:$0xff] }
 0x258   : > { %10164 = vmatprep.subr.bf16.mxu1 %v10163_v9  ;;  %v8568_v9 = vld [vmem:[%s14924_s3 + $0xd40] sm:$0xff]  ;;  %v10183_v16 = vpack.c.bf16 %v8768_v4, %v8766_v0  ;;  %v8783_v0 = vld [vmem:[%s14924_s3 + $0x13f0] sm:$0xff]  ;;  %v8589_v4 = vld [vmem:[%s14924_s3 + $0xde8] sm:$0xff] }
 0x259   : > { %v9989_v39 = vpack.c.bf16 %v8570_v22, %v8568_v9  ;;  %v10201_v22 = vpack.c.bf16 %v8783_v0, %v8781_v55  ;;  %v8602_v61 = vld [vmem:[%s14924_s3 + $0xe50] sm:$0xff]  ;;  %v8604_v55 = vld [vmem:[%s14924_s3 + $0xe60] sm:$0xff] }
 0x25a   : > { %9970 = vmatpush1.bf16.msra.mxu0 %v9969_v13  ;;  %v8575_v13 = vld [vmem:[%s14924_s3 + $0xd78] sm:$0xff]  ;;  %v8801_v0 = vld [vmem:[%s14924_s3 + $0x1480] sm:$0xff] }
 0x25b   : > { %10166 = vmatpush1.bf16.msra.mxu1 %v10165_v42  ;;  %9972 = vmatprep.subr.bf16.mxu0 %v9971_v1  ;;  %v8770_v42 = vld [vmem:[%s14924_s3 + $0x1388] sm:$0xff]  ;;  %v8772_v1 = vld [vmem:[%s14924_s3 + $0x1398] sm:$0xff]  ;;  %v9991_v31 = vpack.c.bf16 %v8575_v13, %v8573_v19  ;;  %v8785_v19 = vld [vmem:[%s14924_s3 + $0x1400] sm:$0xff] }
 0x25c   : > { %10168 = vmatprep.subr.bf16.mxu1 %v10167_v15  ;;  %v8572_v15 = vld [vmem:[%s14924_s3 + $0xd60] sm:$0xff]  ;;  %v10187_v18 = vpack.c.bf16 %v8772_v1, %v8770_v42  ;;  %v8787_v42 = vld [vmem:[%s14924_s3 + $0x1410] sm:$0xff]  ;;  %v8593_v1 = vld [vmem:[%s14924_s3 + $0xe08] sm:$0xff] }
 0x25d   : > { %v9993_v38 = vpack.c.bf16 %v8574_v17, %v8572_v15  ;;  %v10205_v17 = vpack.c.bf16 %v8787_v42, %v8785_v19  ;;  %v8610_v42 = vld [vmem:[%s14924_s3 + $0xe90] sm:$0xff] }
 0x25e   : > { %9974 = vmatpush1.bf16.msra.mxu0 %v9973_v28  ;;  %v8579_v28 = vld [vmem:[%s14924_s3 + $0xd98] sm:$0xff] }
 0x25f   : > { %10170 = vmatpush1.bf16.msra.mxu1 %v10169_v29  ;;  %9976 = vmatprep.subr.bf16.mxu0 %v9975_v54  ;;  %v8774_v29 = vld [vmem:[%s14924_s3 + $0x13a8] sm:$0xff]  ;;  %v8776_v54 = vld [vmem:[%s14924_s3 + $0x13b8] sm:$0xff]  ;;  %v9995_v32 = vpack.c.bf16 %v8579_v28, %v8577_v27  ;;  %v8789_v27 = vld [vmem:[%s14924_s3 + $0x1420] sm:$0xff] }
 0x260   : > { %10172 = vmatprep.subr.bf16.mxu1 %v10171_v48  ;;  %v8576_v48 = vld [vmem:[%s14924_s3 + $0xd80] sm:$0xff]  ;;  %v10191_v35 = vpack.c.bf16 %v8776_v54, %v8774_v29  ;;  %v8791_v29 = vld [vmem:[%s14924_s3 + $0x1430] sm:$0xff]  ;;  %v8597_v54 = vld [vmem:[%s14924_s3 + $0xe28] sm:$0xff] }
 0x261   : > { %v9997_v52 = vpack.c.bf16 %v8578_v33, %v8576_v48  ;;  %v10209_v33 = vpack.c.bf16 %v8791_v29, %v8789_v27  ;;  %v8614_v27 = vld [vmem:[%s14924_s3 + $0xeb0] sm:$0xff] }
 0x262   : > { %9978 = vmatpush1.bf16.msra.mxu0 %v9977_v44  ;;  %v8583_v44 = vld [vmem:[%s14924_s3 + $0xdb8] sm:$0xff] }
 0x263   : > { %10174 = vmatpush1.bf16.msra.mxu1 %v10173_v45  ;;  %9980 = vmatprep.subr.bf16.mxu0 %v9979_v51  ;;  %v8778_v45 = vld [vmem:[%s14924_s3 + $0x13c8] sm:$0xff]  ;;  %v8780_v51 = vld [vmem:[%s14924_s3 + $0x13d8] sm:$0xff]  ;;  %v9999_v20 = vpack.c.bf16 %v8583_v44, %v8581_v40  ;;  %v8793_v40 = vld [vmem:[%s14924_s3 + $0x1440] sm:$0xff] }
 0x264   : > { %10176 = vmatprep.subr.bf16.mxu1 %v10175_v58  ;;  %v8580_v58 = vld [vmem:[%s14924_s3 + $0xda0] sm:$0xff]  ;;  %v10195_v56 = vpack.c.bf16 %v8780_v51, %v8778_v45  ;;  %v8795_v45 = vld [vmem:[%s14924_s3 + $0x1450] sm:$0xff]  ;;  %v8601_v51 = vld [vmem:[%s14924_s3 + $0xe48] sm:$0xff] }
 0x265   : > { %v10001_v7 = vpack.c.bf16 %v8582_v25, %v8580_v58  ;;  %v10213_v25 = vpack.c.bf16 %v8795_v45, %v8793_v40  ;;  %v8618_v40 = vld [vmem:[%s14924_s3 + $0xed0] sm:$0xff] }
 0x266   : > { %9982 = vmatpush1.bf16.msra.mxu0 %v9981_v62  ;;  %v8587_v62 = vld [vmem:[%s14924_s3 + $0xdd8] sm:$0xff] }
 0x267   : > { %10178 = vmatpush1.bf16.msra.mxu1 %v10177_v12  ;;  %9984 = vmatprep.subr.bf16.mxu0 %v9983_v63  ;;  %v8782_v12 = vld [vmem:[%s14924_s3 + $0x13e8] sm:$0xff]  ;;  %v8784_v63 = vld [vmem:[%s14924_s3 + $0x13f8] sm:$0xff]  ;;  %v10003_v53 = vpack.c.bf16 %v8587_v62, %v8585_v23  ;;  %v8797_v62 = vld [vmem:[%s14924_s3 + $0x1460] sm:$0xff] }
 0x268   : > { %10180 = vmatprep.subr.bf16.mxu1 %v10179_v5  ;;  %v8584_v5 = vld [vmem:[%s14924_s3 + $0xdc0] sm:$0xff]  ;;  %v10199_v3 = vpack.c.bf16 %v8784_v63, %v8782_v12  ;;  %v8799_v12 = vld [vmem:[%s14924_s3 + $0x1470] sm:$0xff]  ;;  %v8605_v63 = vld [vmem:[%s14924_s3 + $0xe68] sm:$0xff] }
 0x269   : > { %v10005_v9 = vpack.c.bf16 %v8586_v60, %v8584_v5  ;;  %v8804_v5 = vld [vmem:[%s14924_s3 + $0x1498] sm:$0xff]  ;;  %v10217_v60 = vpack.c.bf16 %v8799_v12, %v8797_v62  ;;  %v8817_v62 = vld [vmem:[%s14924_s3 + $0x1500] sm:$0xff] }
 0x26a   : > { %9986 = vmatpush1.bf16.msra.mxu0 %v9985_v6  ;;  %v8591_v6 = vld [vmem:[%s14924_s3 + $0xdf8] sm:$0xff] }
 0x26b   : > { %10182 = vmatpush1.bf16.msra.mxu1 %v10181_v8  ;;  %9988 = vmatprep.subr.bf16.mxu0 %v9987_v49  ;;  %v8786_v8 = vld [vmem:[%s14924_s3 + $0x1408] sm:$0xff]  ;;  %v8788_v49 = vld [vmem:[%s14924_s3 + $0x1418] sm:$0xff]  ;;  %v10007_v43 = vpack.c.bf16 %v8591_v6, %v8589_v4  ;;  %v8803_v6 = vld [vmem:[%s14924_s3 + $0x1490] sm:$0xff] }
 0x26c   : > { %10184 = vmatprep.subr.bf16.mxu1 %v10183_v16  ;;  %v8588_v16 = vld [vmem:[%s14924_s3 + $0xde0] sm:$0xff]  ;;  %v10203_v13 = vpack.c.bf16 %v8788_v49, %v8786_v8  ;;  %v8609_v8 = vld [vmem:[%s14924_s3 + $0xe88] sm:$0xff]  ;;  %v8611_v49 = vld [vmem:[%s14924_s3 + $0xe98] sm:$0xff] }
 0x26d   : > { %v10009_v15 = vpack.c.bf16 %v8590_v10, %v8588_v16  ;;  %v10221_v10 = vpack.c.bf16 %v8803_v6, %v8801_v0  ;;  %v10027_v19 = vpack.c.bf16 %v8611_v49, %v8609_v8  ;;  %v8624_v0 = vld [vmem:[%s14924_s3 + $0xf00] sm:$0xff]  ;;  %v8823_v49 = vld [vmem:[%s14924_s3 + $0x1530] sm:$0xff] }
 0x26e   : > { %9990 = vmatpush1.bf16.msra.mxu0 %v9989_v39  ;;  %v8595_v39 = vld [vmem:[%s14924_s3 + $0xe18] sm:$0xff]  ;;  %v8821_v6 = vld [vmem:[%s14924_s3 + $0x1520] sm:$0xff] }
 0x26f   : > { %10186 = vmatpush1.bf16.msra.mxu1 %v10185_v14  ;;  %9992 = vmatprep.subr.bf16.mxu0 %v9991_v31  ;;  %v8790_v14 = vld [vmem:[%s14924_s3 + $0x1428] sm:$0xff]  ;;  %v8792_v31 = vld [vmem:[%s14924_s3 + $0x1438] sm:$0xff]  ;;  %v10011_v41 = vpack.c.bf16 %v8595_v39, %v8593_v1  ;;  %v8805_v1 = vld [vmem:[%s14924_s3 + $0x14a0] sm:$0xff] }
 0x270   : > { %10188 = vmatprep.subr.bf16.mxu1 %v10187_v18  ;;  %v8592_v18 = vld [vmem:[%s14924_s3 + $0xe00] sm:$0xff]  ;;  %v10207_v28 = vpack.c.bf16 %v8792_v31, %v8790_v14  ;;  %v8807_v39 = vld [vmem:[%s14924_s3 + $0x14b0] sm:$0xff]  ;;  %v8613_v14 = vld [vmem:[%s14924_s3 + $0xea8] sm:$0xff] }
 0x271   : > { %v10013_v48 = vpack.c.bf16 %v8594_v21, %v8592_v18  ;;  %v8615_v31 = vld [vmem:[%s14924_s3 + $0xeb8] sm:$0xff]  ;;  %v8612_v21 = vld [vmem:[%s14924_s3 + $0xea0] sm:$0xff] }
 0x272   : > { %9994 = vmatpush1.bf16.msra.mxu0 %v9993_v38  ;;  %v8599_v38 = vld [vmem:[%s14924_s3 + $0xe38] sm:$0xff]  ;;  %v10031_v18 = vpack.c.bf16 %v8615_v31, %v8613_v14  ;;  %v8827_v31 = vld [vmem:[%s14924_s3 + $0x1550] sm:$0xff] }
 0x273   : > { %10190 = vmatpush1.bf16.msra.mxu1 %v10189_v30  ;;  %9996 = vmatprep.subr.bf16.mxu0 %v9995_v32  ;;  %v8794_v30 = vld [vmem:[%s14924_s3 + $0x1448] sm:$0xff]  ;;  %v8796_v32 = vld [vmem:[%s14924_s3 + $0x1458] sm:$0xff]  ;;  %v10015_v34 = vpack.c.bf16 %v8599_v38, %v8597_v54  ;;  %v8811_v54 = vld [vmem:[%s14924_s3 + $0x14d0] sm:$0xff] }
 0x274   : > { %10192 = vmatprep.subr.bf16.mxu1 %v10191_v35  ;;  %v8596_v35 = vld [vmem:[%s14924_s3 + $0xe20] sm:$0xff]  ;;  %v10211_v44 = vpack.c.bf16 %v8796_v32, %v8794_v30  ;;  %v8617_v38 = vld [vmem:[%s14924_s3 + $0xec8] sm:$0xff]  ;;  %v8619_v30 = vld [vmem:[%s14924_s3 + $0xed8] sm:$0xff] }
 0x275   : > { %v10017_v58 = vpack.c.bf16 %v8598_v47, %v8596_v35  ;;  %v8814_v32 = vld [vmem:[%s14924_s3 + $0x14e8] sm:$0xff]  ;;  %v10035_v35 = vpack.c.bf16 %v8619_v30, %v8617_v38  ;;  %v8616_v47 = vld [vmem:[%s14924_s3 + $0xec0] sm:$0xff] }
 0x276   : > { %9998 = vmatpush1.bf16.msra.mxu0 %v9997_v52  ;;  %v8603_v52 = vld [vmem:[%s14924_s3 + $0xe58] sm:$0xff]  ;;  %v8829_v38 = vld [vmem:[%s14924_s3 + $0x1560] sm:$0xff] }
 0x277   : > { %10194 = vmatpush1.bf16.msra.mxu1 %v10193_v59  ;;  %10000 = vmatprep.subr.bf16.mxu0 %v9999_v20  ;;  %v8798_v59 = vld [vmem:[%s14924_s3 + $0x1468] sm:$0xff]  ;;  %v8800_v20 = vld [vmem:[%s14924_s3 + $0x1478] sm:$0xff]  ;;  %v10019_v11 = vpack.c.bf16 %v8603_v52, %v8601_v51  ;;  %v8815_v51 = vld [vmem:[%s14924_s3 + $0x14f0] sm:$0xff] }
 0x278   : > { %10196 = vmatprep.subr.bf16.mxu1 %v10195_v56  ;;  %v8600_v56 = vld [vmem:[%s14924_s3 + $0xe40] sm:$0xff]  ;;  %v10215_v23 = vpack.c.bf16 %v8800_v20, %v8798_v59  ;;  %v8621_v52 = vld [vmem:[%s14924_s3 + $0xee8] sm:$0xff]  ;;  %v8623_v59 = vld [vmem:[%s14924_s3 + $0xef8] sm:$0xff] }
 0x279   : > { %v8818_v20 = vld [vmem:[%s14924_s3 + $0x1508] sm:$0xff] }
 0x27a   : > { %10002 = vmatpush1.bf16.msra.mxu0 %v10001_v7  ;;  %v8607_v7 = vld [vmem:[%s14924_s3 + $0xe78] sm:$0xff] }
 0x27b   : > { %10198 = vmatpush1.bf16.msra.mxu1 %v10197_v37  ;;  %10004 = vmatprep.subr.bf16.mxu0 %v10003_v53  ;;  %v10021_v37 = vpack.c.bf16 %v8602_v61, %v8600_v56  ;;  %v8802_v53 = vld [vmem:[%s14924_s3 + $0x1488] sm:$0xff]  ;;  %v10023_v4 = vpack.c.bf16 %v8607_v7, %v8605_v63  ;;  %v10039_v56 = vpack.c.bf16 %v8623_v59, %v8621_v52  ;;  %v8620_v61 = vld [vmem:[%s14924_s3 + $0xee0] sm:$0xff]  ;;  %v8819_v63 = vld [vmem:[%s14924_s3 + $0x1510] sm:$0xff] }
 0x27c   : > { %10200 = vmatprep.subr.bf16.mxu1 %v10199_v3  ;;  %v8606_v3 = vld [vmem:[%s14924_s3 + $0xe70] sm:$0xff]  ;;  %v8625_v7 = vld [vmem:[%s14924_s3 + $0xf08] sm:$0xff]  ;;  %v8833_v52 = vld [vmem:[%s14924_s3 + $0x1580] sm:$0xff] }
 0x27d   : > { %v10025_v16 = vpack.c.bf16 %v8606_v3, %v8604_v55  ;;  %v10237_v55 = vpack.c.bf16 %v8819_v63, %v8817_v62  ;;  %v8642_v63 = vld [vmem:[%s14924_s3 + $0xf90] sm:$0xff] }
 0x27e   : > { %10006 = vmatpush1.bf16.msra.mxu0 %v10005_v9  ;;  %v10219_v9 = vpack.c.bf16 %v8804_v5, %v8802_v53  ;;  %v8822_v53 = vld [vmem:[%s14924_s3 + $0x1528] sm:$0xff]  ;;  %v8824_v5 = vld [vmem:[%s14924_s3 + $0x1538] sm:$0xff] }
 0x27f   : > { %10202 = vmatpush1.bf16.msra.mxu1 %v10201_v22  ;;  %10008 = vmatprep.subr.bf16.mxu0 %v10007_v43  ;;  %v8806_v22 = vld [vmem:[%s14924_s3 + $0x14a8] sm:$0xff]  ;;  %v8808_v43 = vld [vmem:[%s14924_s3 + $0x14b8] sm:$0xff]  ;;  %v10239_v8 = vpack.c.bf16 %v8824_v5, %v8822_v53  ;;  %v8839_v53 = vld [vmem:[%s14924_s3 + $0x15b0] sm:$0xff] }
 0x280   : > { %10204 = vmatprep.subr.bf16.mxu1 %v10203_v13  ;;  %v8608_v13 = vld [vmem:[%s14924_s3 + $0xe80] sm:$0xff]  ;;  %v8645_v5 = vld [vmem:[%s14924_s3 + $0xfa8] sm:$0xff] }
 0x282   : > { %10010 = vmatpush1.bf16.msra.mxu0 %v10009_v15  ;;  %v8810_v15 = vld [vmem:[%s14924_s3 + $0x14c8] sm:$0xff] }
 0x283   : > { %10206 = vmatpush1.bf16.msra.mxu1 %v10205_v17  ;;  %10012 = vmatprep.subr.bf16.mxu0 %v10011_v41  ;;  %v10029_v17 = vpack.c.bf16 %v8610_v42, %v8608_v13  ;;  %v10225_v41 = vpack.c.bf16 %v8807_v39, %v8805_v1  ;;  %v10241_v13 = vpack.c.bf16 %v8823_v49, %v8821_v6  ;;  %v8630_v1 = vld [vmem:[%s14924_s3 + $0xf30] sm:$0xff]  ;;  %v5334_v39 = vld [vmem:[%s14923_s2] sm:$0x3f] }
 0x284   : > { %10208 = vmatprep.subr.bf16.mxu1 %v10207_v28  ;;  %v8809_v28 = vld [vmem:[%s14924_s3 + $0x14c0] sm:$0xff]  ;;  %v8646_v49 = vld [vmem:[%s14924_s3 + $0xfb0] sm:$0xff] }
 0x286   : > { %10014 = vmatpush1.bf16.msra.mxu0 %v10013_v48  ;;  %v8816_v48 = vld [vmem:[%s14924_s3 + $0x14f8] sm:$0xff] }
 0x287   : > { %10210 = vmatpush1.bf16.msra.mxu1 %v10209_v33  ;;  %10016 = vmatprep.subr.bf16.mxu0 %v10015_v34  ;;  %v10033_v33 = vpack.c.bf16 %v8614_v27, %v8612_v21  ;;  %v10229_v34 = vpack.c.bf16 %v8811_v54, %v8809_v28  ;;  %v10231_v45 = vpack.c.bf16 %v8816_v48, %v8814_v32  ;;  %v8634_v54 = vld [vmem:[%s14924_s3 + $0xf50] sm:$0xff]  ;;  %v8637_v48 = vld [vmem:[%s14924_s3 + $0xf68] sm:$0xff] }
 0x288   : > { %10212 = vmatprep.subr.bf16.mxu1 %v10211_v44  ;;  %v8813_v44 = vld [vmem:[%s14924_s3 + $0x14e0] sm:$0xff]  ;;  %v8831_v32 = vld [vmem:[%s14924_s3 + $0x1570] sm:$0xff] }
 0x28a   : > { %10018 = vmatpush1.bf16.msra.mxu0 %v10017_v58  ;;  %v8820_v58 = vld [vmem:[%s14924_s3 + $0x1518] sm:$0xff] }
 0x28b   : > { %10214 = vmatpush1.bf16.msra.mxu1 %v10213_v25  ;;  %10020 = vmatprep.subr.bf16.mxu0 %v10019_v11  ;;  %v10037_v25 = vpack.c.bf16 %v8618_v40, %v8616_v47  ;;  %v10233_v11 = vpack.c.bf16 %v8815_v51, %v8813_v44  ;;  %v10235_v12 = vpack.c.bf16 %v8820_v58, %v8818_v20  ;;  %v8638_v51 = vld [vmem:[%s14924_s3 + $0xf70] sm:$0xff]  ;;  %v8641_v58 = vld [vmem:[%s14924_s3 + $0xf88] sm:$0xff] }
 0x28c   : > { %10216 = vmatprep.subr.bf16.mxu1 %v10215_v23  ;;  %v8622_v23 = vld [vmem:[%s14924_s3 + $0xef0] sm:$0xff]  ;;  %v10249_v40 = vpack.c.bf16 %v8831_v32, %v8829_v38 }
 0x28d   : > { %4630 = vmatmul.mubr.f32.vlgmr.msra.gmra.mrb[6].mxu0 %v11975_v50  ;;  %v8835_v20 = vld [vmem:[%s14924_s3 + $0x1590] sm:$0xff] }
 0x28e   : > { %5113 = vmatmul.mubr.f32.vlgmr.msra.gmra.mrb[6].mxu1 %v11975_v50  ;;  %10022 = vmatpush1.bf16.msra.mxu0 %v10021_v37  ;;  %v10223_v50 = vpack.c.bf16 %v8808_v43, %v8806_v22  ;;  %v8627_v37 = vld [vmem:[%s14924_s3 + $0xf18] sm:$0xff]  ;;  %v8826_v43 = vld [vmem:[%s14924_s3 + $0x1548] sm:$0xff]  ;;  %v8654_v38 = vld [vmem:[%s14924_s3 + $0xff0] sm:$0xff] }
 0x28f   : > { %4700 = vmatprep.mubr.f32.mxu0 %v12349_v57  ;;  %10218 = vmatpush1.bf16.msra.mxu1 %v10217_v60  ;;  %v10041_v60 = vpack.c.bf16 %v8622_v23, %v8620_v61  ;;  %v10043_v3 = vpack.c.bf16 %v8627_v37, %v8625_v7  ;;  %v8631_v22 = vld [vmem:[%s14924_s3 + $0xf38] sm:$0xff]  ;;  %v10253_v23 = vpack.c.bf16 %v8835_v20, %v8833_v52  ;;  %v8837_v7 = vld [vmem:[%s14924_s3 + $0x15a0] sm:$0xff]  ;;  %v8658_v52 = vld [vmem:[%s14924_s3 + $0x1010] sm:$0xff] }
 0x290   : > { %5183 = vmatprep.mubr.f32.mxu1 %v12349_v57  ;;  %10024 = vmatprep.subr.bf16.mxu0 %v10023_v4  ;;  %v8812_v57 = vld [vmem:[%s14924_s3 + $0x14d8] sm:$0xff]  ;;  %v8626_v4 = vld [vmem:[%s14924_s3 + $0xf10] sm:$0xff] }
 0x291   : > { %10220 = vmatprep.subr.bf16.mxu1 %v10219_v9  ;;  %v10227_v29 = vpack.c.bf16 %v8812_v57, %v8810_v15  ;;  %v8629_v9 = vld [vmem:[%s14924_s3 + $0xf28] sm:$0xff]  ;;  %v8635_v57 = vld [vmem:[%s14924_s3 + $0xf58] sm:$0xff] }
 0x292   : > { %10026 = vmatpush1.bf16.msra.mxu0 %v10025_v16  ;;  %v8828_v16 = vld [vmem:[%s14924_s3 + $0x1558] sm:$0xff]  ;;  %v10047_v42 = vpack.c.bf16 %v8631_v22, %v8629_v9  ;;  %v8633_v15 = vld [vmem:[%s14924_s3 + $0xf48] sm:$0xff]  ;;  %v8841_v9 = vld [vmem:[%s14924_s3 + $0x15c0] sm:$0xff] }
 0x293   : > { %10222 = vmatpush1.bf16.msra.mxu1 %v10221_v10  ;;  %10028 = vmatprep.subr.bf16.mxu0 %v10027_v19  ;;  %v10045_v10 = vpack.c.bf16 %v8626_v4, %v8624_v0  ;;  %v8628_v19 = vld [vmem:[%s14924_s3 + $0xf20] sm:$0xff]  ;;  %v10243_v14 = vpack.c.bf16 %v8828_v16, %v8826_v43  ;;  %v10051_v28 = vpack.c.bf16 %v8635_v57, %v8633_v15  ;;  %v8843_v43 = vld [vmem:[%s14924_s3 + $0x15d0] sm:$0xff]  ;;  %v8649_v16 = vld [vmem:[%s14924_s3 + $0xfc8] sm:$0xff] }
 0x294   : > { %10224 = vmatprep.subr.bf16.mxu1 %v10223_v50  ;;  %v8825_v50 = vld [vmem:[%s14924_s3 + $0x1540] sm:$0xff]  ;;  %v10049_v21 = vpack.c.bf16 %v8630_v1, %v8628_v19  ;;  %v10257_v4 = vpack.c.bf16 %v8839_v53, %v8837_v7  ;;  %v8846_v19 = vld [vmem:[%s14924_s3 + $0x15e8] sm:$0xff]  ;;  %v10261_v1 = vpack.c.bf16 %v8843_v43, %v8841_v9  ;;  %v8847_v57 = vld [vmem:[%s14924_s3 + $0x15f0] sm:$0xff] }
 0x295   : > { %v10245_v27 = vpack.c.bf16 %v8827_v31, %v8825_v50  ;;  %v8845_v31 = vld [vmem:[%s14924_s3 + $0x15e0] sm:$0xff]  ;;  %v8662_v7 = vld [vmem:[%s14924_s3 + $0x1030] sm:$0xff] }
 0x296   : > { %10030 = vmatpush1.bf16.msra.mxu0 %v10029_v17  ;;  %v10916_v17 = vmov 0   ;;  %v8666_v9 = vld [vmem:[%s14924_s3 + $0x1050] sm:$0xff]  ;;  %v8861_v43 = vld [vmem:[%s14924_s3 + $0x1660] sm:$0xff] }
 0x297   : > { %10226 = vmatpush1.bf16.msra.mxu1 %v10225_v41  ;;  %10032 = vmatprep.subr.bf16.mxu0 %v10031_v18  ;;  %v8830_v41 = vld [vmem:[%s14924_s3 + $0x1568] sm:$0xff]  ;;  %v8832_v18 = vld [vmem:[%s14924_s3 + $0x1578] sm:$0xff] }
 0x298   : > { %10228 = vmatprep.subr.bf16.mxu1 %v10227_v29  ;;  %10840 = vset.pattern.permute.xlu0 %v10916_v17  ;;  %v8632_v29 = vld [vmem:[%s14924_s3 + $0xf40] sm:$0xff]  ;;  %v10247_v30 = vpack.c.bf16 %v8832_v18, %v8830_v41  ;;  %v8655_v41 = vld [vmem:[%s14924_s3 + $0xff8] sm:$0xff]  ;;  %v8850_v18 = vld [vmem:[%s14924_s3 + $0x1608] sm:$0xff] }
 0x299   : > { %5337 = vperm.xlu0 %10840, %v5334_v39   ;;  %10841 = vset.pattern.permute.xlu1 %v10916_v17  ;;  %v10053_v47 = vpack.c.bf16 %v8634_v54, %v8632_v29  ;;  %v8648_v39 = vld [vmem:[%s14924_s3 + $0xfc0] sm:$0xff]  ;;  %v8653_v17 = vld [vmem:[%s14924_s3 + $0xfe8] sm:$0xff] }
 0x29a   : > { %10034 = vmatpush1.bf16.msra.mxu0 %v10033_v33  ;;  %v8639_v33 = vld [vmem:[%s14924_s3 + $0xf78] sm:$0xff]  ;;  %v10071_v29 = vpack.c.bf16 %v8655_v41, %v8653_v17  ;;  %v8652_v54 = vld [vmem:[%s14924_s3 + $0xfe0] sm:$0xff]  ;;  %v8673_v17 = vld [vmem:[%s14924_s3 + $0x1088] sm:$0xff] }
 0x29b   : > { %10230 = vmatpush1.bf16.msra.mxu1 %v10229_v34  ;;  %10036 = vmatprep.subr.bf16.mxu0 %v10035_v35  ;;  %v8834_v34 = vld [vmem:[%s14924_s3 + $0x1588] sm:$0xff]  ;;  %v8836_v35 = vld [vmem:[%s14924_s3 + $0x1598] sm:$0xff]  ;;  %v10055_v44 = vpack.c.bf16 %v8639_v33, %v8637_v48  ;;  %v8851_v48 = vld [vmem:[%s14924_s3 + $0x1610] sm:$0xff] }
 0x29c   : > { %10232 = vmatprep.subr.bf16.mxu1 %v10231_v45  ;;  %v8636_v45 = vld [vmem:[%s14924_s3 + $0xf60] sm:$0xff]  ;;  %v10251_v59 = vpack.c.bf16 %v8836_v35, %v8834_v34  ;;  %v8657_v33 = vld [vmem:[%s14924_s3 + $0x1008] sm:$0xff]  ;;  %v8659_v34 = vld [vmem:[%s14924_s3 + $0x1018] sm:$0xff] }
 0x29d   : > { %v10057_v61 = vpack.c.bf16 %v8638_v51, %v8636_v45  ;;  %v8854_v35 = vld [vmem:[%s14924_s3 + $0x1628] sm:$0xff]  ;;  %v10075_v45 = vpack.c.bf16 %v8659_v34, %v8657_v33  ;;  %v8656_v51 = vld [vmem:[%s14924_s3 + $0x1000] sm:$0xff]  ;;  %v8675_v41 = vld [vmem:[%s14924_s3 + $0x1098] sm:$0xff] }
 0x29e   : > { %10038 = vmatpush1.bf16.msra.mxu0 %v10037_v25  ;;  %v8643_v25 = vld [vmem:[%s14924_s3 + $0xf98] sm:$0xff]  ;;  %v8677_v33 = vld [vmem:[%s14924_s3 + $0x10a8] sm:$0xff] }
 0x29f   : > { %10234 = vmatpush1.bf16.msra.mxu1 %v10233_v11  ;;  %10040 = vmatprep.subr.bf16.mxu0 %v10039_v56  ;;  %v8838_v11 = vld [vmem:[%s14924_s3 + $0x15a8] sm:$0xff]  ;;  %v8840_v56 = vld [vmem:[%s14924_s3 + $0x15b8] sm:$0xff]  ;;  %v10059_v62 = vpack.c.bf16 %v8643_v25, %v8641_v58  ;;  %v8855_v58 = vld [vmem:[%s14924_s3 + $0x1630] sm:$0xff] }
 0x2a0   : > { %10236 = vmatprep.subr.bf16.mxu1 %v10235_v12  ;;  %v8640_v12 = vld [vmem:[%s14924_s3 + $0xf80] sm:$0xff]  ;;  %v10255_v37 = vpack.c.bf16 %v8840_v56, %v8838_v11  ;;  %v8661_v25 = vld [vmem:[%s14924_s3 + $0x1028] sm:$0xff]  ;;  %v8663_v11 = vld [vmem:[%s14924_s3 + $0x1038] sm:$0xff] }
 0x2a1   : > { %v10061_v0 = vpack.c.bf16 %v8642_v63, %v8640_v12  ;;  %v8858_v56 = vld [vmem:[%s14924_s3 + $0x1648] sm:$0xff]  ;;  %v10079_v12 = vpack.c.bf16 %v8663_v11, %v8661_v25  ;;  %v8660_v63 = vld [vmem:[%s14924_s3 + $0x1020] sm:$0xff]  ;;  %v8679_v34 = vld [vmem:[%s14924_s3 + $0x10b8] sm:$0xff] }
 0x2a2   : > { %10042 = vmatpush1.bf16.msra.mxu0 %v10041_v60  ;;  %v8647_v60 = vld [vmem:[%s14924_s3 + $0xfb8] sm:$0xff]  ;;  %v8878_v11 = vld [vmem:[%s14924_s3 + $0x16e8] sm:$0xff] }
 0x2a3   : > { %10238 = vmatpush1.bf16.msra.mxu1 %v10237_v55  ;;  %10044 = vmatprep.subr.bf16.mxu0 %v10043_v3  ;;  %v8842_v55 = vld [vmem:[%s14924_s3 + $0x15c8] sm:$0xff]  ;;  %v8844_v3 = vld [vmem:[%s14924_s3 + $0x15d8] sm:$0xff]  ;;  %v10063_v6 = vpack.c.bf16 %v8647_v60, %v8645_v5  ;;  %v8859_v5 = vld [vmem:[%s14924_s3 + $0x1650] sm:$0xff] }
 0x2a4   : > { %10240 = vmatprep.subr.bf16.mxu1 %v10239_v8  ;;  %v8644_v8 = vld [vmem:[%s14924_s3 + $0xfa0] sm:$0xff]  ;;  %v10259_v22 = vpack.c.bf16 %v8844_v3, %v8842_v55  ;;  %v8665_v60 = vld [vmem:[%s14924_s3 + $0x1048] sm:$0xff]  ;;  %v8667_v55 = vld [vmem:[%s14924_s3 + $0x1058] sm:$0xff] }
 0x2a5   : > { %v8862_v3 = vld [vmem:[%s14924_s3 + $0x1668] sm:$0xff]  ;;  %v8683_v25 = vld [vmem:[%s14924_s3 + $0x10d8] sm:$0xff] }
 0x2a6   : > { %10046 = vmatpush1.bf16.msra.mxu0 %v10045_v10  ;;  %v8651_v10 = vld [vmem:[%s14924_s3 + $0xfd8] sm:$0xff] }
 0x2a7   : > { %10242 = vmatpush1.bf16.msra.mxu1 %v10241_v13  ;;  %10048 = vmatprep.subr.bf16.mxu0 %v10047_v42  ;;  %v8848_v13 = vld [vmem:[%s14924_s3 + $0x15f8] sm:$0xff]  ;;  %v10065_v42 = vpack.c.bf16 %v8646_v49, %v8644_v8  ;;  %v10067_v50 = vpack.c.bf16 %v8651_v10, %v8649_v16  ;;  %v10083_v8 = vpack.c.bf16 %v8667_v55, %v8665_v60  ;;  %v8664_v49 = vld [vmem:[%s14924_s3 + $0x1040] sm:$0xff]  ;;  %v8863_v16 = vld [vmem:[%s14924_s3 + $0x1670] sm:$0xff] }
 0x2a8   : > { %10244 = vmatprep.subr.bf16.mxu1 %v10243_v14  ;;  %v8650_v14 = vld [vmem:[%s14924_s3 + $0xfd0] sm:$0xff]  ;;  %v10263_v15 = vpack.c.bf16 %v8848_v13, %v8846_v19  ;;  %v8669_v10 = vld [vmem:[%s14924_s3 + $0x1068] sm:$0xff]  ;;  %v8671_v19 = vld [vmem:[%s14924_s3 + $0x1078] sm:$0xff]  ;;  %v10085_v13 = vpack.c.bf16 %v8666_v9, %v8664_v49 }
 0x2a9   : > { %v8687_v60 = vld [vmem:[%s14924_s3 + $0x10f8] sm:$0xff]  ;;  %v8882_v55 = vld [vmem:[%s14924_s3 + $0x1708] sm:$0xff]  ;;  %v8686_v49 = vld [vmem:[%s14924_s3 + $0x10f0] sm:$0xff] }
 0x2aa   : > { %10050 = vmatpush1.bf16.msra.mxu0 %v10049_v21  ;;  %v8852_v21 = vld [vmem:[%s14924_s3 + $0x1618] sm:$0xff]  ;;  %v8881_v9 = vld [vmem:[%s14924_s3 + $0x1700] sm:$0xff] }
 0x2ab   : > { %10246 = vmatpush1.bf16.msra.mxu1 %v10245_v27  ;;  %10052 = vmatprep.subr.bf16.mxu0 %v10051_v28  ;;  %v10069_v27 = vpack.c.bf16 %v8650_v14, %v8648_v39  ;;  %v10265_v28 = vpack.c.bf16 %v8847_v57, %v8845_v31  ;;  %v10267_v32 = vpack.c.bf16 %v8852_v21, %v8850_v18  ;;  %v8668_v39 = vld [vmem:[%s14924_s3 + $0x1060] sm:$0xff]  ;;  %v8670_v14 = vld [vmem:[%s14924_s3 + $0x1070] sm:$0xff]  ;;  %v8870_v21 = vld [vmem:[%s14924_s3 + $0x16a8] sm:$0xff] }
 0x2ac   : > { %10248 = vmatprep.subr.bf16.mxu1 %v10247_v30  ;;  %v8849_v30 = vld [vmem:[%s14924_s3 + $0x1600] sm:$0xff]  ;;  %v8867_v57 = vld [vmem:[%s14924_s3 + $0x1690] sm:$0xff] }
 0x2ad   : > { %v8865_v31 = vld [vmem:[%s14924_s3 + $0x1680] sm:$0xff] }
 0x2ae   : > { %10054 = vmatpush1.bf16.msra.mxu0 %v10053_v47  ;;  %v8856_v47 = vld [vmem:[%s14924_s3 + $0x1638] sm:$0xff] }
 0x2af   : > { %10250 = vmatpush1.bf16.msra.mxu1 %v10249_v40  ;;  %10056 = vmatprep.subr.bf16.mxu0 %v10055_v44  ;;  %v10073_v40 = vpack.c.bf16 %v8654_v38, %v8652_v54  ;;  %v10269_v44 = vpack.c.bf16 %v8851_v48, %v8849_v30  ;;  %v10271_v20 = vpack.c.bf16 %v8856_v47, %v8854_v35  ;;  %v8672_v38 = vld [vmem:[%s14924_s3 + $0x1080] sm:$0xff]  ;;  %v8674_v30 = vld [vmem:[%s14924_s3 + $0x1090] sm:$0xff]  ;;  %v8874_v35 = vld [vmem:[%s14924_s3 + $0x16c8] sm:$0xff] }
 0x2b0   : > { %10252 = vmatprep.subr.bf16.mxu1 %v10251_v59  ;;  %v8853_v59 = vld [vmem:[%s14924_s3 + $0x1620] sm:$0xff]  ;;  %v10091_v54 = vpack.c.bf16 %v8675_v41, %v8673_v17  ;;  %v8871_v48 = vld [vmem:[%s14924_s3 + $0x16b0] sm:$0xff]  ;;  %v10093_v47 = vpack.c.bf16 %v8674_v30, %v8672_v38  ;;  %v8693_v17 = vld [vmem:[%s14924_s3 + $0x1128] sm:$0xff] }
 0x2b1   : > { %v8695_v41 = vld [vmem:[%s14924_s3 + $0x1138] sm:$0xff]  ;;  %v8694_v38 = vld [vmem:[%s14924_s3 + $0x1130] sm:$0xff]  ;;  %v8889_v30 = vld [vmem:[%s14924_s3 + $0x1740] sm:$0xff] }
 0x2b2   : > { %10058 = vmatpush1.bf16.msra.mxu0 %v10057_v61  ;;  %v8860_v61 = vld [vmem:[%s14924_s3 + $0x1658] sm:$0xff] }
 0x2b3   : > { %10254 = vmatpush1.bf16.msra.mxu1 %v10253_v23  ;;  %10060 = vmatprep.subr.bf16.mxu0 %v10059_v62  ;;  %v10077_v23 = vpack.c.bf16 %v8658_v52, %v8656_v51  ;;  %v10273_v62 = vpack.c.bf16 %v8855_v58, %v8853_v59  ;;  %v10275_v53 = vpack.c.bf16 %v8860_v61, %v8858_v56  ;;  %v8678_v51 = vld [vmem:[%s14924_s3 + $0x10b0] sm:$0xff]  ;;  %v8873_v52 = vld [vmem:[%s14924_s3 + $0x16c0] sm:$0xff]  ;;  %v8681_v58 = vld [vmem:[%s14924_s3 + $0x10c8] sm:$0xff] }
 0x2b4   : > { %10256 = vmatprep.subr.bf16.mxu1 %v10255_v37  ;;  %v8857_v37 = vld [vmem:[%s14924_s3 + $0x1640] sm:$0xff]  ;;  %v8880_v56 = vld [vmem:[%s14924_s3 + $0x16f8] sm:$0xff] }
 0x2b6   : > { %10062 = vmatpush1.bf16.msra.mxu0 %v10061_v0  ;;  %v8864_v0 = vld [vmem:[%s14924_s3 + $0x1678] sm:$0xff] }
 0x2b7   : > { %10258 = vmatpush1.bf16.msra.mxu1 %v10257_v4  ;;  %10064 = vmatprep.subr.bf16.mxu0 %v10063_v6  ;;  %v10081_v4 = vpack.c.bf16 %v8662_v7, %v8660_v63  ;;  %v10277_v6 = vpack.c.bf16 %v8859_v5, %v8857_v37  ;;  %v8682_v63 = vld [vmem:[%s14924_s3 + $0x10d0] sm:$0xff]  ;;  %v8877_v7 = vld [vmem:[%s14924_s3 + $0x16e0] sm:$0xff]  ;;  %v10295_v37 = vpack.c.bf16 %v8880_v56, %v8878_v11  ;;  %v8685_v5 = vld [vmem:[%s14924_s3 + $0x10e8] sm:$0xff] }
 0x2b8   : > { %10260 = vmatprep.subr.bf16.mxu1 %v10259_v22  ;;  %v10279_v22 = vpack.c.bf16 %v8864_v0, %v8862_v3  ;;  %v8884_v3 = vld [vmem:[%s14924_s3 + $0x1718] sm:$0xff] }
 0x2b9   : > { %v8900_v11 = vld [vmem:[%s14924_s3 + $0x1798] sm:$0xff] }
 0x2ba   : > { %10066 = vmatpush1.bf16.msra.mxu0 %v10065_v42  ;;  %v8866_v42 = vld [vmem:[%s14924_s3 + $0x1688] sm:$0xff] }
 0x2bb   : > { %10262 = vmatpush1.bf16.msra.mxu1 %v10261_v1  ;;  %10068 = vmatprep.subr.bf16.mxu0 %v10067_v50  ;;  %v8868_v1 = vld [vmem:[%s14924_s3 + $0x1698] sm:$0xff]  ;;  %v10281_v50 = vpack.c.bf16 %v8863_v16, %v8861_v43  ;;  %v8883_v43 = vld [vmem:[%s14924_s3 + $0x1710] sm:$0xff]  ;;  %v8689_v16 = vld [vmem:[%s14924_s3 + $0x1108] sm:$0xff] }
 0x2bc   : > { %10264 = vmatprep.subr.bf16.mxu1 %v10263_v15  ;;  %v10087_v15 = vpack.c.bf16 %v8671_v19, %v8669_v10  ;;  %v10283_v18 = vpack.c.bf16 %v8868_v1, %v8866_v42  ;;  %v8691_v10 = vld [vmem:[%s14924_s3 + $0x1118] sm:$0xff]  ;;  %v8886_v19 = vld [vmem:[%s14924_s3 + $0x1728] sm:$0xff]  ;;  %v10301_v1 = vpack.c.bf16 %v8883_v43, %v8881_v9 }
 0x2bd   : > { %v8709_v43 = vld [vmem:[%s14924_s3 + $0x11a8] sm:$0xff] }
 0x2be   : > { %10070 = vmatpush1.bf16.msra.mxu0 %v10069_v27  ;;  %v8872_v27 = vld [vmem:[%s14924_s3 + $0x16b8] sm:$0xff] }
 0x2bf   : > { %10266 = vmatpush1.bf16.msra.mxu1 %v10265_v28  ;;  %10072 = vmatprep.subr.bf16.mxu0 %v10071_v29  ;;  %v10089_v28 = vpack.c.bf16 %v8670_v14, %v8668_v39  ;;  %v10285_v29 = vpack.c.bf16 %v8867_v57, %v8865_v31  ;;  %v8688_v39 = vld [vmem:[%s14924_s3 + $0x1100] sm:$0xff]  ;;  %v8690_v14 = vld [vmem:[%s14924_s3 + $0x1110] sm:$0xff] }
 0x2c0   : > { %10268 = vmatprep.subr.bf16.mxu1 %v10267_v32  ;;  %v8869_v32 = vld [vmem:[%s14924_s3 + $0x16a0] sm:$0xff]  ;;  %v8887_v57 = vld [vmem:[%s14924_s3 + $0x1730] sm:$0xff] }
 0x2c1   : > { %v8885_v31 = vld [vmem:[%s14924_s3 + $0x1720] sm:$0xff] }
 0x2c2   : > { %10074 = vmatpush1.bf16.msra.mxu0 %v10073_v40  ;;  %v10289_v40 = vpack.c.bf16 %v8871_v48, %v8869_v32  ;;  %v8697_v48 = vld [vmem:[%s14924_s3 + $0x1148] sm:$0xff] }
 0x2c3   : > { %10270 = vmatpush1.bf16.msra.mxu1 %v10269_v44  ;;  %10076 = vmatprep.subr.bf16.mxu0 %v10075_v45  ;;  %v10095_v44 = vpack.c.bf16 %v8679_v34, %v8677_v33  ;;  %v8676_v45 = vld [vmem:[%s14924_s3 + $0x10a0] sm:$0xff]  ;;  %v8699_v33 = vld [vmem:[%s14924_s3 + $0x1158] sm:$0xff]  ;;  %v8894_v34 = vld [vmem:[%s14924_s3 + $0x1768] sm:$0xff] }
 0x2c4   : > { %10272 = vmatprep.subr.bf16.mxu1 %v10271_v20  ;;  %v8875_v20 = vld [vmem:[%s14924_s3 + $0x16d0] sm:$0xff]  ;;  %v10097_v61 = vpack.c.bf16 %v8678_v51, %v8676_v45  ;;  %v8893_v51 = vld [vmem:[%s14924_s3 + $0x1760] sm:$0xff] }
 0x2c5   : > { %v8698_v45 = vld [vmem:[%s14924_s3 + $0x1150] sm:$0xff] }
 0x2c6   : > { %10078 = vmatpush1.bf16.msra.mxu0 %v10077_v23  ;;  %v10293_v23 = vpack.c.bf16 %v8875_v20, %v8873_v52  ;;  %v8701_v20 = vld [vmem:[%s14924_s3 + $0x1168] sm:$0xff] }
 0x2c7   : > { %10274 = vmatpush1.bf16.msra.mxu1 %v10273_v62  ;;  %10080 = vmatprep.subr.bf16.mxu0 %v10079_v12  ;;  %v10099_v62 = vpack.c.bf16 %v8683_v25, %v8681_v58  ;;  %v8680_v12 = vld [vmem:[%s14924_s3 + $0x10c0] sm:$0xff]  ;;  %v8703_v58 = vld [vmem:[%s14924_s3 + $0x1178] sm:$0xff]  ;;  %v8898_v25 = vld [vmem:[%s14924_s3 + $0x1788] sm:$0xff] }
 0x2c8   : > { %10276 = vmatprep.subr.bf16.mxu1 %v10275_v53  ;;  %v8879_v53 = vld [vmem:[%s14924_s3 + $0x16f0] sm:$0xff]  ;;  %v10101_v0 = vpack.c.bf16 %v8682_v63, %v8680_v12  ;;  %v8897_v63 = vld [vmem:[%s14924_s3 + $0x1780] sm:$0xff] }
 0x2c9   : > { %v8702_v12 = vld [vmem:[%s14924_s3 + $0x1170] sm:$0xff] }
 0x2ca   : > { %10082 = vmatpush1.bf16.msra.mxu0 %v10081_v4  ;;  %v10297_v4 = vpack.c.bf16 %v8879_v53, %v8877_v7  ;;  %v10315_v7 = vpack.c.bf16 %v8900_v11, %v8898_v25  ;;  %v8705_v53 = vld [vmem:[%s14924_s3 + $0x1188] sm:$0xff]  ;;  %v8920_v25 = vld [vmem:[%s14924_s3 + $0x1838] sm:$0xff] }
 0x2cb   : > { %10278 = vmatpush1.bf16.msra.mxu1 %v10277_v6  ;;  %10084 = vmatprep.subr.bf16.mxu0 %v10083_v8  ;;  %v10103_v6 = vpack.c.bf16 %v8687_v60, %v8685_v5  ;;  %v8684_v8 = vld [vmem:[%s14924_s3 + $0x10e0] sm:$0xff]  ;;  %v8707_v5 = vld [vmem:[%s14924_s3 + $0x1198] sm:$0xff]  ;;  %v8902_v60 = vld [vmem:[%s14924_s3 + $0x17a8] sm:$0xff] }
 0x2cc   : > { %10280 = vmatprep.subr.bf16.mxu1 %v10279_v22  ;;  %v10299_v22 = vpack.c.bf16 %v8884_v3, %v8882_v55  ;;  %v10105_v42 = vpack.c.bf16 %v8686_v49, %v8684_v8  ;;  %v8904_v55 = vld [vmem:[%s14924_s3 + $0x17b8] sm:$0xff]  ;;  %v8706_v8 = vld [vmem:[%s14924_s3 + $0x1190] sm:$0xff]  ;;  %v8901_v49 = vld [vmem:[%s14924_s3 + $0x17a0] sm:$0xff] }
 0x2cd   : > { %4701 = vmatmul.mubr.f32.vlgmr.msra.gmra.mrb[6].mxu0 %v12347_v36  ;;  %v10319_v9 = vpack.c.bf16 %v8904_v55, %v8902_v60  ;;  %v8924_v60 = vld [vmem:[%s14924_s3 + $0x1858] sm:$0xff] }
 0x2ce   : > { %5184 = vmatmul.mubr.f32.vlgmr.msra.gmra.mrb[6].mxu1 %v12347_v36  ;;  %10086 = vmatpush1.bf16.msra.mxu0 %v10085_v13  ;;  %v10287_v36 = vpack.c.bf16 %v8872_v27, %v8870_v21  ;;  %v8888_v13 = vld [vmem:[%s14924_s3 + $0x1738] sm:$0xff]  ;;  %v10109_v27 = vpack.c.bf16 %v8690_v14, %v8688_v39  ;;  %v8710_v39 = vld [vmem:[%s14924_s3 + $0x11b0] sm:$0xff]  ;;  %v8905_v14 = vld [vmem:[%s14924_s3 + $0x17c0] sm:$0xff] }
 0x2cf   : > { %4771 = vmatprep.mubr.f32.mxu0 %v12111_v26  ;;  %10282 = vmatpush1.bf16.msra.mxu1 %v10281_v50  ;;  %v10107_v50 = vpack.c.bf16 %v8691_v10, %v8689_v16  ;;  %v8892_v21 = vld [vmem:[%s14924_s3 + $0x1758] sm:$0xff]  ;;  %v8906_v10 = vld [vmem:[%s14924_s3 + $0x17c8] sm:$0xff] }
 0x2d0   : > { %5254 = vmatprep.mubr.f32.mxu1 %v12111_v26  ;;  %10088 = vmatprep.subr.bf16.mxu0 %v10087_v15  ;;  %v8876_v26 = vld [vmem:[%s14924_s3 + $0x16d8] sm:$0xff]  ;;  %v10303_v15 = vpack.c.bf16 %v8888_v13, %v8886_v19 }
 0x2d1   : > { %10284 = vmatprep.subr.bf16.mxu1 %v10283_v18  ;;  %v10291_v59 = vpack.c.bf16 %v8876_v26, %v8874_v35  ;;  %v8890_v18 = vld [vmem:[%s14924_s3 + $0x1748] sm:$0xff]  ;;  %v8896_v35 = vld [vmem:[%s14924_s3 + $0x1778] sm:$0xff] }
 0x2d2   : > { %10090 = vmatpush1.bf16.msra.mxu0 %v10089_v28  ;;  %v10305_v28 = vpack.c.bf16 %v8887_v57, %v8885_v31  ;;  %v10307_v32 = vpack.c.bf16 %v8892_v21, %v8890_v18  ;;  %v10311_v52 = vpack.c.bf16 %v8896_v35, %v8894_v34  ;;  %v8711_v16 = vld [vmem:[%s14924_s3 + $0x11b8] sm:$0xff]  ;;  %v8713_v57 = vld [vmem:[%s14924_s3 + $0x11c8] sm:$0xff] }
 0x2d3   : > { %10286 = vmatpush1.bf16.msra.mxu1 %v10285_v29  ;;  %10092 = vmatprep.subr.bf16.mxu0 %v10091_v54  ;;  %v10111_v29 = vpack.c.bf16 %v8695_v41, %v8693_v17  ;;  %v8692_v54 = vld [vmem:[%s14924_s3 + $0x1120] sm:$0xff]  ;;  %v8908_v19 = vld [vmem:[%s14924_s3 + $0x17d8] sm:$0xff]  ;;  %v8910_v41 = vld [vmem:[%s14924_s3 + $0x17e8] sm:$0xff] }
 0x2d4   : > { %10288 = vmatprep.subr.bf16.mxu1 %v10287_v36  ;;  %v8891_v36 = vld [vmem:[%s14924_s3 + $0x1750] sm:$0xff]  ;;  %v10113_v26 = vpack.c.bf16 %v8694_v38, %v8692_v54  ;;  %v10323_v31 = vpack.c.bf16 %v8908_v19, %v8906_v10  ;;  %v8715_v17 = vld [vmem:[%s14924_s3 + $0x11d8] sm:$0xff]  ;;  %v8909_v38 = vld [vmem:[%s14924_s3 + $0x17e0] sm:$0xff] }
 0x2d5   : > { %v8912_v18 = vld [vmem:[%s14924_s3 + $0x17f8] sm:$0xff]  ;;  %v8714_v54 = vld [vmem:[%s14924_s3 + $0x11d0] sm:$0xff] }
 0x2d6   : > { %10094 = vmatpush1.bf16.msra.mxu0 %v10093_v47  ;;  %v10309_v47 = vpack.c.bf16 %v8891_v36, %v8889_v30  ;;  %v10327_v30 = vpack.c.bf16 %v8912_v18, %v8910_v41  ;;  %v8717_v36 = vld [vmem:[%s14924_s3 + $0x11e8] sm:$0xff]  ;;  %v8916_v34 = vld [vmem:[%s14924_s3 + $0x1818] sm:$0xff] }
 0x2d7   : > { %10290 = vmatpush1.bf16.msra.mxu1 %v10289_v40  ;;  %10096 = vmatprep.subr.bf16.mxu0 %v10095_v44  ;;  %v10115_v40 = vpack.c.bf16 %v8699_v33, %v8697_v48  ;;  %v8696_v44 = vld [vmem:[%s14924_s3 + $0x1140] sm:$0xff]  ;;  %v8719_v48 = vld [vmem:[%s14924_s3 + $0x11f8] sm:$0xff]  ;;  %v8914_v33 = vld [vmem:[%s14924_s3 + $0x1808] sm:$0xff] }
 0x2d8   : > { %10292 = vmatprep.subr.bf16.mxu1 %v10291_v59  ;;  %v8895_v59 = vld [vmem:[%s14924_s3 + $0x1770] sm:$0xff]  ;;  %v10117_v56 = vpack.c.bf16 %v8698_v45, %v8696_v44  ;;  %v8913_v45 = vld [vmem:[%s14924_s3 + $0x1800] sm:$0xff]  ;;  %v8928_v10 = vld [vmem:[%s14924_s3 + $0x1878] sm:$0xff] }
 0x2d9   : > { %v8718_v44 = vld [vmem:[%s14924_s3 + $0x11f0] sm:$0xff] }
 0x2da   : > { %10098 = vmatpush1.bf16.msra.mxu0 %v10097_v61  ;;  %v10313_v61 = vpack.c.bf16 %v8895_v59, %v8893_v51  ;;  %v10331_v51 = vpack.c.bf16 %v8916_v34, %v8914_v33  ;;  %v8721_v59 = vld [vmem:[%s14924_s3 + $0x1208] sm:$0xff] }
 0x2db   : > { %10294 = vmatpush1.bf16.msra.mxu1 %v10293_v23  ;;  %10100 = vmatprep.subr.bf16.mxu0 %v10099_v62  ;;  %v10119_v23 = vpack.c.bf16 %v8703_v58, %v8701_v20  ;;  %v8700_v62 = vld [vmem:[%s14924_s3 + $0x1160] sm:$0xff]  ;;  %v8723_v20 = vld [vmem:[%s14924_s3 + $0x1218] sm:$0xff]  ;;  %v8918_v58 = vld [vmem:[%s14924_s3 + $0x1828] sm:$0xff] }
 0x2dc   : > { %10296 = vmatprep.subr.bf16.mxu1 %v10295_v37  ;;  %v8899_v37 = vld [vmem:[%s14924_s3 + $0x1790] sm:$0xff]  ;;  %v10121_v3 = vpack.c.bf16 %v8702_v12, %v8700_v62  ;;  %v8917_v12 = vld [vmem:[%s14924_s3 + $0x1820] sm:$0xff] }
 0x2dd   : > { %v8722_v62 = vld [vmem:[%s14924_s3 + $0x1210] sm:$0xff] }
 0x2de   : > { %10102 = vmatpush1.bf16.msra.mxu0 %v10101_v0  ;;  %v10317_v0 = vpack.c.bf16 %v8899_v37, %v8897_v63  ;;  %v10335_v63 = vpack.c.bf16 %v8920_v25, %v8918_v58  ;;  %v8725_v37 = vld [vmem:[%s14924_s3 + $0x1228] sm:$0xff] }
 0x2df   : > { %10298 = vmatpush1.bf16.msra.mxu1 %v10297_v4  ;;  %10104 = vmatprep.subr.bf16.mxu0 %v10103_v6  ;;  %v10123_v4 = vpack.c.bf16 %v8707_v5, %v8705_v53  ;;  %v8704_v6 = vld [vmem:[%s14924_s3 + $0x1180] sm:$0xff]  ;;  %v8727_v53 = vld [vmem:[%s14924_s3 + $0x1238] sm:$0xff]  ;;  %v8922_v5 = vld [vmem:[%s14924_s3 + $0x1848] sm:$0xff] }
 0x2e0   : > { %10300 = vmatprep.subr.bf16.mxu1 %v10299_v22  ;;  %v8903_v22 = vld [vmem:[%s14924_s3 + $0x17b0] sm:$0xff]  ;;  %v10125_v13 = vpack.c.bf16 %v8706_v8, %v8704_v6  ;;  %v8921_v8 = vld [vmem:[%s14924_s3 + $0x1840] sm:$0xff] }
 0x2e1   : > { %v8726_v6 = vld [vmem:[%s14924_s3 + $0x1230] sm:$0xff] }
 0x2e2   : > { %10106 = vmatpush1.bf16.msra.mxu0 %v10105_v42  ;;  %v10321_v42 = vpack.c.bf16 %v8903_v22, %v8901_v49  ;;  %v10339_v49 = vpack.c.bf16 %v8924_v60, %v8922_v5  ;;  %v8729_v22 = vld [vmem:[%s14924_s3 + $0x1248] sm:$0xff]  ;;  %v8952_v5 = vld [vmem:[%s14925_s4 + $0x40] sm:$0xff] }
 0x2e3   : > { %10302 = vmatpush1.bf16.msra.mxu1 %v10301_v1  ;;  %10108 = vmatprep.subr.bf16.mxu0 %v10107_v50  ;;  %v10127_v1 = vpack.c.bf16 %v8711_v16, %v8709_v43  ;;  %v8708_v50 = vld [vmem:[%s14924_s3 + $0x11a0] sm:$0xff]  ;;  %v8731_v43 = vld [vmem:[%s14924_s3 + $0x1258] sm:$0xff]  ;;  %v8926_v16 = vld [vmem:[%s14924_s3 + $0x1868] sm:$0xff] }
 0x2e4   : > { %10304 = vmatprep.subr.bf16.mxu1 %v10303_v15  ;;  %v8907_v15 = vld [vmem:[%s14924_s3 + $0x17d0] sm:$0xff]  ;;  %v10129_v21 = vpack.c.bf16 %v8710_v39, %v8708_v50  ;;  %v10343_v39 = vpack.c.bf16 %v8928_v10, %v8926_v16  ;;  %v8959_v10 = vld [vmem:[%s14925_s4 + $0x58] sm:$0xff] }
 0x2e5   : > { %v8730_v50 = vld [vmem:[%s14924_s3 + $0x1250] sm:$0xff] }
 0x2e6   : > { %10110 = vmatpush1.bf16.msra.mxu0 %v10109_v27  ;;  %v10325_v27 = vpack.c.bf16 %v8907_v15, %v8905_v14  ;;  %v8925_v14 = vld [vmem:[%s14924_s3 + $0x1860] sm:$0xff] }
 0x2e7   : > { %10306 = vmatpush1.bf16.msra.mxu1 %v10305_v28  ;;  %10112 = vmatprep.subr.bf16.mxu0 %v10111_v29  ;;  %v10131_v28 = vpack.c.bf16 %v8715_v17, %v8713_v57  ;;  %v8712_v29 = vld [vmem:[%s14924_s3 + $0x11c0] sm:$0xff] }
 0x2e8   : > { %10308 = vmatprep.subr.bf16.mxu1 %v10307_v32  ;;  %v8911_v32 = vld [vmem:[%s14924_s3 + $0x17f0] sm:$0xff]  ;;  %v10133_v35 = vpack.c.bf16 %v8714_v54, %v8712_v29 }
 0x2ea   : > { %10114 = vmatpush1.bf16.msra.mxu0 %v10113_v26  ;;  %v10329_v26 = vpack.c.bf16 %v8911_v32, %v8909_v38 }
 0x2eb   : > { %10310 = vmatpush1.bf16.msra.mxu1 %v10309_v47  ;;  %10116 = vmatprep.subr.bf16.mxu0 %v10115_v40  ;;  %v10135_v47 = vpack.c.bf16 %v8719_v48, %v8717_v36  ;;  %v8716_v40 = vld [vmem:[%s14924_s3 + $0x11e0] sm:$0xff] }
 0x2ec   : > { %10312 = vmatprep.subr.bf16.mxu1 %v10311_v52  ;;  %v8915_v52 = vld [vmem:[%s14924_s3 + $0x1810] sm:$0xff]  ;;  %v10137_v11 = vpack.c.bf16 %v8718_v44, %v8716_v40  ;;  %v5345_v40 = vld [vmem:[%s14925_s4 + $0x8] sm:$0xff]  ;;  %v6646_v44 = vld [vmem:[%s14926_s5] sm:$0xff] }
 0x2ee   : > { %10118 = vmatpush1.bf16.msra.mxu0 %v10117_v56  ;;  %v10333_v56 = vpack.c.bf16 %v8915_v52, %v8913_v45 }
 0x2ef   : > { %10314 = vmatpush1.bf16.msra.mxu1 %v10313_v61  ;;  %10120 = vmatprep.subr.bf16.mxu0 %v10119_v23  ;;  %v10139_v61 = vpack.c.bf16 %v8723_v20, %v8721_v59  ;;  %v8720_v23 = vld [vmem:[%s14924_s3 + $0x1200] sm:$0xff] }
 0x2f0   : > { %10316 = vmatprep.subr.bf16.mxu1 %v10315_v7  ;;  %v8919_v7 = vld [vmem:[%s14924_s3 + $0x1830] sm:$0xff]  ;;  %v10141_v55 = vpack.c.bf16 %v8722_v62, %v8720_v23  ;;  %v8940_v20 = vld [vmem:[%s14925_s4 + $0x20] sm:$0xff] }
 0x2f1   : > { %v8946_v62 = vld [vmem:[%s14925_s4 + $0x30] sm:$0xff] }
 0x2f2   : > { %10122 = vmatpush1.bf16.msra.mxu0 %v10121_v3  ;;  %v10337_v3 = vpack.c.bf16 %v8919_v7, %v8917_v12 }
 0x2f3   : > { %10318 = vmatpush1.bf16.msra.mxu1 %v10317_v0  ;;  %10124 = vmatprep.subr.bf16.mxu0 %v10123_v4  ;;  %v10143_v0 = vpack.c.bf16 %v8727_v53, %v8725_v37  ;;  %v8724_v4 = vld [vmem:[%s14924_s3 + $0x1220] sm:$0xff]  ;;  %v8947_v37 = vld [vmem:[%s14925_s4 + $0x38] sm:$0xff] }
 0x2f4   : > { %10320 = vmatprep.subr.bf16.mxu1 %v10319_v9  ;;  %v8923_v9 = vld [vmem:[%s14924_s3 + $0x1850] sm:$0xff]  ;;  %v10145_v19 = vpack.c.bf16 %v8726_v6, %v8724_v4 }
 0x2f6   : > { %10126 = vmatpush1.bf16.msra.mxu0 %v10125_v13  ;;  %v10341_v13 = vpack.c.bf16 %v8923_v9, %v8921_v8  ;;  %v8958_v8 = vld [vmem:[%s14925_s4 + $0x50] sm:$0xff] }
 0x2f7   : > { %10322 = vmatpush1.bf16.msra.mxu1 %v10321_v42  ;;  %10128 = vmatprep.subr.bf16.mxu0 %v10127_v1  ;;  %v10147_v42 = vpack.c.bf16 %v8731_v43, %v8729_v22  ;;  %v8728_v1 = vld [vmem:[%s14924_s3 + $0x1240] sm:$0xff]  ;;  %v6231_v43 = vld [vmem:[%s14927_s6 + $0x8] sm:$0xff] }
 0x2f8   : > { %10324 = vmatprep.subr.bf16.mxu1 %v10323_v31  ;;  %v8927_v31 = vld [vmem:[%s14924_s3 + $0x1870] sm:$0xff]  ;;  %v10149_v15 = vpack.c.bf16 %v8730_v50, %v8728_v1  ;;  %v6230_v22 = vld [vmem:[%s14927_s6] sm:$0xff]  ;;  %v6233_v50 = vld [vmem:[%s14927_s6 + $0x18] sm:$0xff] }
 0x2f9   : > { %v10345_v57 = vpack.c.bf16 %v8927_v31, %v8925_v14  ;;  %v6232_v1 = vld [vmem:[%s14927_s6 + $0x10] sm:$0xff]  ;;  %v6234_v31 = vld [vmem:[%s14927_s6 + $0x20] sm:$0xff] }
 0x2fa   : > { %10130 = vmatpush1.bf16.msra.mxu0 %v10129_v21  ;;  %v10351_v14 = vpack.c.bf16 %v6233_v50, %v6232_v1  ;;  %v8991_v1 = vld [vmem:[%s14927_s6 + $0xe0] sm:$0xff]  ;;  %v8992_v50 = vld [vmem:[%s14927_s6 + $0xe8] sm:$0xff] }
 0x2fb   : > { %10326 = vmatpush1.bf16.msra.mxu1 %v10325_v27  ;;  %10132 = vmatprep.subr.bf16.mxu0 %v10131_v28 }
 0x2fc   : > { %10328 = vmatprep.subr.bf16.mxu1 %v10327_v30 }
 0x2fe   : > { %10134 = vmatpush1.bf16.msra.mxu0 %v10133_v35 }
 0x2ff   : > { %10330 = vmatpush1.bf16.msra.mxu1 %v10329_v26  ;;  %10136 = vmatprep.subr.bf16.mxu0 %v10135_v47  ;;  %v5344_v47 = vld [vmem:[%s14925_s4] sm:$0xff] }
 0x300   : > { %10332 = vmatprep.subr.bf16.mxu1 %v10331_v51 }
 0x302   : > { %10138 = vmatpush1.bf16.msra.mxu0 %v10137_v11  ;;  %v8941_v11 = vld [vmem:[%s14925_s4 + $0x28] sm:$0xff] }
 0x303   : > { %10334 = vmatpush1.bf16.msra.mxu1 %v10333_v56  ;;  %10140 = vmatprep.subr.bf16.mxu0 %v10139_v61 }
 0x304   : > { %10336 = vmatprep.subr.bf16.mxu1 %v10335_v63 }
 0x306   : > { %10142 = vmatpush1.bf16.msra.mxu0 %v10141_v55 }
 0x307   : > { %10338 = vmatpush1.bf16.msra.mxu1 %v10337_v3  ;;  %10144 = vmatprep.subr.bf16.mxu0 %v10143_v0  ;;  %v8953_v0 = vld [vmem:[%s14925_s4 + $0x48] sm:$0xff] }
 0x308   : > { %10340 = vmatprep.subr.bf16.mxu1 %v10339_v49  ;;  %v8930_v49 = vld [vmem:[%s14925_s4 + $0x10] sm:$0xff] }
 0x30a   : > { %10146 = vmatpush1.bf16.msra.mxu0 %v10145_v19  ;;  %v8931_v19 = vld [vmem:[%s14925_s4 + $0x18] sm:$0xff] }
 0x30b   : > { %10342 = vmatpush1.bf16.msra.mxu1 %v10341_v13  ;;  %10148 = vmatprep.subr.bf16.mxu0 %v10147_v42  ;;  %v10348_v13 = vpack.c.bf16 %v6231_v43, %v6230_v22  ;;  %v10922_v42 = vmov 0.0|0.0  }
 0x30c   : > { %10344 = vmatprep.subr.bf16.mxu1 %v10343_v39  ;;  %v8964_v39 = vld [vmem:[%s14925_s4 + $0x60] sm:$0xff] }
 0x30d   : > { %4772 = vmatmul.mubr.f32.vlgmr.msra.gmra.mrb[6].mxu0 %v12103_v46 }
 0x30e   : > { %5255 = vmatmul.mubr.f32.vlgmr.msra.gmra.mrb[6].mxu1 %v12103_v46  ;;  %10150 = vmatpush1.bf16.msra.mxu0 %v10149_v15  ;;  %v6235_v15 = vld [vmem:[%s14927_s6 + $0x28] sm:$0xff] }
 0x30f   : > { %10346 = vmatpush1.bf16.msra.mxu1 %v10345_v57  ;;  %4842 = vmatprep.mubr.f32.mxu0 %v10906_v2 }
 0x310   : > { %5325 = vmatprep.mubr.f32.mxu1 %v10906_v2 }
 0x315   : > { %8732 = vmatmul.mubr.msk.f32.vlgmr.msra.gmra.mrb[6].mxu0 %vm3597_vm11, %v12377_v24 }
 0x316   : > { %8929 = vmatmul.mubr.msk.f32.vlgmr.msra.gmra.mrb[6].mxu1 %vm3597_vm11, %v12377_v24  ;;  %5519 = vmatprep.mubr.f32.mxu0 %v10906_v2 }
 0x317   : > { %5432 = vmatprep.mubr.f32.mxu1 %v10906_v2 }
 0x318   : > { %v5338_v36 = vpop.permute.xlu0 %5337 }
 0x320   : > { %v3880_v17 = vpop.f32.mrb[4].mxu0 }
 0x321   : > { %v4361_v41 = vpop.f32.mrb[4].mxu1  ;;  %v3882_v18 = vpop.f32.mrb[5].mxu0 }
 0x322   : > { %v4366_v46 = vmax.f32 %v3880_v17, %v4361_v41  ;;  %v4363_v21 = vpop.f32.mrb[5].mxu1  ;;  %v8965_v41 = vld [vmem:[%s14925_s4 + $0x68] sm:$0xff] }
 0x323   : > { %v4367_v27 = vmax.f32 %v3882_v18, %v4363_v21  ;;  %v10354_v18 = vpack.c.bf16 %v6235_v15, %v6234_v31  ;;  %v6237_v21 = vld [vmem:[%s14927_s6 + $0x38] sm:$0xff] }
 0x324   : > { %v8994_v31 = vld [vmem:[%s14927_s6 + $0xf8] sm:$0xff] }
 0x3e8   : > { %v4844_v28 = vpop.f32.mrb[6].mxu0 }
 0x3e9   : > { %v4849_v29 = vmax.f32 %v4366_v46, %v4844_v28  ;;  %v5327_v54 = vpop.f32.mrb[6].mxu1  ;;  %v4846_v38 = vpop.f32.mrb[7].mxu0  ;;  %v6236_v46 = vld [vmem:[%s14927_s6 + $0x30] sm:$0xff] }
 0x3ea   : > { %v4850_v30 = vmax.f32 %v4367_v27, %v4846_v38  ;;  %v5329_v32 = vpop.f32.mrb[7].mxu1  ;;  %v8970_v27 = vld [vmem:[%s14925_s4 + $0x70] sm:$0xff]  ;;  %v10357_v28 = vpack.c.bf16 %v6237_v21, %v6236_v46  ;;  %v6239_v38 = vld [vmem:[%s14927_s6 + $0x48] sm:$0xff]  ;;  %v8998_v46 = vld [vmem:[%s14927_s6 + $0x118] sm:$0xff] }
 0x3eb   : > { %v5332_v48 = vmax.f32 %v4849_v29, %v5327_v54  ;;  %v6238_v54 = vld [vmem:[%s14927_s6 + $0x40] sm:$0xff] }
 0x3ec   : > { %v5333_v33 = vmax.f32 %v4850_v30, %v5329_v32  ;;  %v8971_v32 = vld [vmem:[%s14925_s4 + $0x78] sm:$0xff] }
 0x3ed   : > { %v5340_v24 = vadd.f32 %v5338_v36, %v5332_v48  ;;  %v6240_v48 = vld [vmem:[%s14927_s6 + $0x50] sm:$0xff] }
 0x3ee   : > { %v5341_v34 = vadd.f32 %v5338_v36, %v5333_v33  ;;  %v10360_v36 = vpack.c.bf16 %v6239_v38, %v6238_v54  ;;  %v6241_v33 = vld [vmem:[%s14927_s6 + $0x58] sm:$0xff]  ;;  %v9001_v54 = vld [vmem:[%s14927_s6 + $0x130] sm:$0xff] }
 0x3ef   : > { %v5342_v35 = vmax.f32 %v5340_v24, 0.0  ;;  %v8976_v24 = vld [vmem:[%s14925_s4 + $0x80] sm:$0xff]  ;;  %v9002_v38 = vld [vmem:[%s14927_s6 + $0x138] sm:$0xff] }
 0x3f0   : > { %v5343_v26 = vmax.f32 %v5341_v34, 0.0  ;;  %v10363_v34 = vpack.c.bf16 %v6241_v33, %v6240_v48  ;;  %v9005_v33 = vld [vmem:[%s14927_s6 + $0x150] sm:$0xff] }
 0x3f1   : > { %5634 = vrot.lane.b32.xlu0 %v5342_v35, %s10917_s24  ;;  %5535 = vrot.lane.b32.xlu1 %v5342_v35, %s14950_s15 }
 0x3f2   : > { %8936 = vmatprep.subr.msk.mxu0 %vm5363_vm12, %v5343_v26 }
 0x3f3   : > { %8937 = vmatpush1.msk.msra.mxu0 %vm5363_vm12, %v5342_v35 }
 0x3f4   : > { %8938 = vmatmul.mubr.msk.f32.vlgmr.msra.gmra.mrb[8].mxu0 %vm5356_vm13, %v5344_v47  ;;  %v8977_v47 = vld [vmem:[%s14925_s4 + $0x88] sm:$0xff] }
 0x3f5   : > { %5734 = vrot.lane.b32.xlu0 %v5342_v35, %s10918_s0  ;;  %5537 = vrot.lane.b32.xlu1 %v5343_v26, %s14950_s15  ;;  %s429_s15 = sand.u32 1, %s10896_s26  }
 0x3f6   : > { %5525 = vmatprep.mubr.f32.mxu0 %v10906_v2 }
 0x3f8   : > { %8939 = vmatmul.mubr.msk.f32.gmra.mrb[10].mxu0 %vm5356_vm13, %v5345_v40 }
 0x3f9   : > { %5834 = vrot.lane.b32.xlu0 %v5342_v35, %s10919_s21  ;;  %5636 = vrot.lane.b32.xlu1 %v5343_v26, %s10917_s24 }
 0x3fa   : > { %5614 = vmatprep.mubr.f32.mxu0 %v10906_v2 }
 0x3fd   : > { %5934 = vrot.lane.b32.xlu0 %v5342_v35, %s10920_s30  ;;  %5736 = vrot.lane.b32.xlu1 %v5343_v26, %s10918_s0  ;;  %s430_s0 = scalar_lea.vmem [#allocation2], %s429_s15 }
 0x3fe   : > { %s8172_s1 = sshll.u32 %s430_s0, 4  ;;  %s14881_s1 = int_to_ptr.vmem [resolvable:$true] %s8172_s1 }
 0x401   : > { %6034 = vrot.lane.b32.xlu0 %v5342_v35, %s10921_s22  ;;  %5836 = vrot.lane.b32.xlu1 %v5343_v26, %s10919_s21 }
 0x405   : > { %5351 = vrot.lane.b32.xlu0 %v5342_v35, %s14951_s27  ;;  %5936 = vrot.lane.b32.xlu1 %v5343_v26, %s10920_s30  ;;  %s14879_s30 = scalar_lea.hbm %s14934_s13, %s9155_s20 }
 0x409   : > { %6134 = vrot.lane.b32.xlu0 %v5342_v35, %s14952_s23  ;;  %6036 = vrot.lane.b32.xlu1 %v5343_v26, %s10921_s22  ;;  %v6242_v35 = vld [vmem:[%s14927_s6 + $0x60] sm:$0xff]  ;;  %s8160_s22 = scalar_lea.sflag [#allocation3], %s429_s15 }
 0x40d   : > { %6650 = vperm.xlu0 %10840, %v6646_v44   ;;  %5353 = vrot.lane.b32.xlu1 %v5343_v26, %s14951_s27  ;;  %v6244_v44 = vld [vmem:[%s14927_s6 + $0x70] sm:$0xff]  ;;  %s10842_s27 = scalar_lea.vmem %s14881_s1, 16 }
 0x40e   : > { %p10843_p11 = scmp.ne.s32.totalorder %s14881_s1, %s10842_s27 }
 0x410   : > { %p10844_p12 = pnand %p10843_p11, %p11033_p5 }
 0x411   : > { %6136 = vrot.lane.b32.xlu1 %v5343_v26, %s14952_s23  ;;  %v6243_v26 = vld [vmem:[%s14927_s6 + $0x68] sm:$0xff]  ;;  %s10846_s23 = sshll.u32 %s10924_s29, 4  ;;  %s10847_s23 = int_to_ptr.vmem [resolvable:$false] %s10846_s23 }
 0x412   : > { %v10366_v40 = vpack.c.bf16 %v6243_v26, %v6242_v35  ;;  %v9010_v35 = vld [vmem:[%s14927_s6 + $0x160] sm:$0xff]  ;;  %v9011_v26 = vld [vmem:[%s14927_s6 + $0x168] sm:$0xff]  ;;  %p10845_p13 = pneg %p10844_p12  ;;  %s10848_s17 = scalar_lea.vmem %s10847_s23, 32 }
 0x413   : > { %p10849_p0 = scmp.lt.s32.totalorder %s14881_s1, %s10847_s23  ;;  %p10850_p1 = scmp.lt.s32.totalorder %s10848_s17, %s10842_s27 }
 0x415   : > { %p10851_p2 = por %p10850_p1, %p10849_p0 }
 0x417   : > { %p10852_p3 = pnand %p10851_p2, %p10845_p13 }
 0x463   : > { %v5635_v45 = vpop.permute.xlu0 %5634  ;;  %v5536_v51 = vpop.permute.xlu1 %5535 }
 0x467   : > { %v5735_v52 = vpop.permute.xlu0 %5734  ;;  %v5538_v59 = vpop.permute.xlu1 %5537 }
 0x468   : > { %v5539_v58 = vsel %vm1107_vm3, %v5536_v51, %v5538_v59  ;;  %8942 = vmatprep.subr.msk.mxu0 %vm5363_vm12, %v5538_v59  ;;  %vm5938_vm3 = vcmask 834560   ;;  %v6247_v59 = vld [vmem:[%s14927_s6 + $0x88] sm:$0xff] }
 0x469   : > { %8943 = vmatpush1.msk.msra.mxu0 %vm5363_vm12, %v5539_v58  ;;  %v6248_v58 = vld [vmem:[%s14927_s6 + $0x90] sm:$0xff] }
 0x46a   : > { %8944 = vmatmul.mubr.msk.f32.vlgmr.msra.gmra.mrb[8].mxu0 %vm5356_vm13, %v8940_v20 }
 0x46b   : > { %v5637_v25 = vpop.permute.xlu1 %5636  ;;  %5620 = vmatprep.mubr.f32.mxu0 %v10906_v2  ;;  %v5835_v61 = vpop.permute.xlu0 %5834 }
 0x46c   : > { %v5639_v56 = vsel %vm5638_vm14, %v5635_v45, %v5637_v25  ;;  %8948 = vmatprep.subr.msk.mxu0 %vm5363_vm12, %v5637_v25  ;;  %v6245_v45 = vld [vmem:[%s14927_s6 + $0x78] sm:$0xff] }
 0x46d   : > { %8949 = vmatpush1.msk.msra.mxu0 %vm5363_vm12, %v5639_v56  ;;  %v10369_v51 = vpack.c.bf16 %v6245_v45, %v6244_v44  ;;  %v6249_v25 = vld [vmem:[%s14927_s6 + $0x98] sm:$0xff]  ;;  %v6250_v56 = vld [vmem:[%s14927_s6 + $0xa0] sm:$0xff] }
 0x46e   : > { %8945 = vmatmul.mubr.msk.f32.gmra.mrb[10].mxu0 %vm5356_vm13, %v8941_v11  ;;  %v10375_v11 = vpack.c.bf16 %v6249_v25, %v6248_v58  ;;  %v9013_v44 = vld [vmem:[%s14927_s6 + $0x178] sm:$0xff] }
 0x46f   : > { %v5737_v23 = vpop.permute.xlu1 %5736  ;;  %5714 = vmatprep.mubr.f32.mxu0 %v10906_v2  ;;  %v5935_v63 = vpop.permute.xlu0 %5934  ;;  %v9017_v58 = vld [vmem:[%s14927_s6 + $0x198] sm:$0xff] }
 0x470   : > { %v5739_v12 = vsel %vm5738_vm15, %v5735_v52, %v5737_v23  ;;  %8954 = vmatprep.subr.msk.mxu0 %vm5363_vm12, %v5737_v23  ;;  %v6246_v52 = vld [vmem:[%s14927_s6 + $0x80] sm:$0xff] }
 0x471   : > { %v10372_v20 = vpack.c.bf16 %v6247_v59, %v6246_v52  ;;  %v9015_v52 = vld [vmem:[%s14927_s6 + $0x188] sm:$0xff] }
 0x472   : > { %8950 = vmatmul.mubr.msk.f32.vlgmr.msra.gmra.mrb[8].mxu0 %vm5356_vm13, %v8946_v62  ;;  %v7990_v62 = vld [vmem:[%s14930_s9 + $0x70] sm:$0xff] }
 0x473   : > { %8955 = vmatpush1.msk.msra.mxu0 %vm5363_vm12, %v5739_v12  ;;  %v5837_v7 = vpop.permute.xlu1 %5836  ;;  %5720 = vmatprep.mubr.f32.mxu0 %v10906_v2  ;;  %v6035_v60 = vpop.permute.xlu0 %6034 }
 0x474   : > { %8960 = vmatprep.subr.msk.mxu0 %vm5363_vm12, %v5837_v7  ;;  %v5839_v55 = vsel %vm5838_vm2, %v5835_v61, %v5837_v7  ;;  %v6251_v61 = vld [vmem:[%s14927_s6 + $0xa8] sm:$0x1] }
 0x475   : > { %v10378_v23 = vpack.c.bf16 %v6251_v61, %v6250_v56  ;;  %v9019_v56 = vld [vmem:[%s14927_s6 + $0x1a8] sm:$0xff] }
 0x476   : > { %8951 = vmatmul.mubr.msk.f32.gmra.mrb[10].mxu0 %vm5356_vm13, %v8947_v37 }
 0x477   : > { %v5937_v53 = vpop.permute.xlu1 %5936  ;;  %5814 = vmatprep.mubr.f32.mxu0 %v10906_v2  ;;  %v5352_v4 = vpop.permute.xlu0 %5351 }
 0x478   : > { %v5939_v16 = vsel %vm5938_vm3, %v5935_v63, %v5937_v53 }
 0x47a   : > { %8956 = vmatmul.mubr.msk.f32.vlgmr.msra.gmra.mrb[8].mxu0 %vm5356_vm13, %v8952_v5  ;;  %v8986_v5 = vld [vmem:[%s14927_s6 + $0xb8] sm:$0xff] }
 0x47b   : > { %8961 = vmatpush1.msk.msra.mxu0 %vm5363_vm12, %v5839_v55  ;;  %v6037_v3 = vpop.permute.xlu1 %6036  ;;  %5820 = vmatprep.mubr.f32.mxu0 %v10906_v2  ;;  %v6135_v29 = vpop.permute.xlu0 %6134 }
 0x47c   : > { %8966 = vmatprep.subr.msk.mxu0 %vm5363_vm12, %v5937_v53  ;;  %v8985_v53 = vld [vmem:[%s14927_s6 + $0xb0] sm:$0xff] }
 0x47e   : > { %8957 = vmatmul.mubr.msk.f32.gmra.mrb[10].mxu0 %vm5356_vm13, %v8953_v0 }
 0x47f   : > { %v5354_v6 = vpop.permute.xlu1 %5353  ;;  %5914 = vmatprep.mubr.f32.mxu0 %v10906_v2 }
 0x480   : > { %v5355_v9 = vsel %vm482_vm0, %v5352_v4, %v5354_v6  ;;  %8932 = vmatprep.subr.msk.mxu1 %vm5363_vm12, %v5354_v6  ;;  %vm6038_vm0 = vcmask 826368   ;;  %v10382_v4 = vpack.c.bf16 %v8986_v5, %v8985_v53  ;;  %v8987_v6 = vld [vmem:[%s14927_s6 + $0xc0] sm:$0xff]  ;;  %v9024_v5 = vld [vmem:[%s14927_s6 + $0x1d0] sm:$0xff] }
 0x481   : > { %8933 = vmatpush1.msk.msra.mxu1 %vm5363_vm12, %v5355_v9  ;;  %v6039_v57 = vsel %vm6038_vm0, %v6035_v60, %v6037_v3 }
 0x482   : > { %8962 = vmatmul.mubr.msk.f32.vlgmr.msra.gmra.mrb[8].mxu0 %vm5356_vm13, %v8958_v8  ;;  %8934 = vmatmul.mubr.msk.f32.vlgmr.msra.gmra.mrb[8].mxu1 %vm5356_vm13, %v8930_v49  ;;  %v8988_v8 = vld [vmem:[%s14927_s6 + $0xc8] sm:$0xff] }
 0x483   : > { %8967 = vmatpush1.msk.msra.mxu0 %vm5363_vm12, %v5939_v16  ;;  %5920 = vmatprep.mubr.f32.mxu0 %v10906_v2  ;;  %v6137_v17 = vpop.permute.xlu1 %6136  ;;  %v10385_v16 = vpack.c.bf16 %v8988_v8, %v8987_v6  ;;  %v9027_v6 = vld [vmem:[%s14927_s6 + $0x1e8] sm:$0xff] }
 0x484   : > { %8972 = vmatprep.subr.msk.mxu0 %vm5363_vm12, %v6037_v3  ;;  %5438 = vmatprep.mubr.f32.mxu1 %v10906_v2  ;;  %v6138_v30 = vsel %vm1437_vm4, %v6135_v29, %v6137_v17  ;;  %vm10923_vm4 = vmmov 1  }
 0x485   : > { %10347 = vmatprep.subr.bf16.mxu1 %v10922_v42  ;;  %vm14161_vm5 = vmpackc.low %vm493_vm1, %vm10923_vm4  ;;  %vm6252_vm1 = vcmask 334848  }
 0x486   : > { %8963 = vmatmul.mubr.msk.f32.gmra.mrb[10].mxu0 %vm5356_vm13, %v8959_v10  ;;  %8935 = vmatmul.mubr.msk.f32.gmra.mrb[10].mxu1 %vm5356_vm13, %v8931_v19  ;;  %v8989_v10 = vld [vmem:[%s14927_s6 + $0xd0] sm:$0xff]  ;;  %v8990_v19 = vld [vmem:[%s14927_s6 + $0xd8] sm:$0xff] }
 0x487   : > { %6014 = vmatprep.mubr.f32.mxu0 %v10906_v2  ;;  %10349 = vmatpush1.bf16.msra.mxu1 %v10348_v13  ;;  %v10388_v13 = vpack.c.bf16 %v8990_v19, %v8989_v10  ;;  %v9030_v10 = vld [vmem:[%s14927_s6 + $0x200] sm:$0xff]  ;;  %v9031_v19 = vld [vmem:[%s14927_s6 + $0x208] sm:$0x1] }
 0x488   : > { %10350 = vmatprep.subr.bf16.mxu1 %v10922_v42 }
 0x48a   : > { %8968 = vmatmul.mubr.msk.f32.vlgmr.msra.gmra.mrb[8].mxu0 %vm5356_vm13, %v8964_v39  ;;  %v10391_v39 = vpack.c.bf16 %v8992_v50, %v8991_v1  ;;  %v9035_v1 = vld [vmem:[%s14927_s6 + $0x210] sm:$0xff]  ;;  %v9036_v50 = vld [vmem:[%s14927_s6 + $0x218] sm:$0xff] }
 0x48b   : > { %8973 = vmatpush1.msk.msra.mxu0 %vm5363_vm12, %v6039_v57  ;;  %6020 = vmatprep.mubr.f32.mxu0 %v10906_v2  ;;  %v8995_v57 = vld [vmem:[%s14927_s6 + $0x100] sm:$0xff] }
 0x48c   : > { %8978 = vmatprep.subr.msk.mxu0 %vm5363_vm12, %v6137_v17  ;;  %10352 = vmatpush1.bf16.msra.mxu1 %v10351_v14  ;;  %v8993_v14 = vld [vmem:[%s14927_s6 + $0xf0] sm:$0xff]  ;;  %v8996_v17 = vld [vmem:[%s14927_s6 + $0x108] sm:$0xff] }
 0x48d   : > { %10353 = vmatprep.subr.bf16.mxu1 %v10922_v42  ;;  %v10394_v15 = vpack.c.bf16 %v8994_v31, %v8993_v14  ;;  %v9037_v14 = vld [vmem:[%s14927_s6 + $0x220] sm:$0xff]  ;;  %v9038_v31 = vld [vmem:[%s14927_s6 + $0x228] sm:$0xff] }
 0x48e   : > { %8969 = vmatmul.mubr.msk.f32.gmra.mrb[10].mxu0 %vm5356_vm13, %v8965_v41  ;;  %v10397_v41 = vpack.c.bf16 %v8996_v17, %v8995_v57  ;;  %v10453_v57 = vpack.c.bf16 %v9038_v31, %v9037_v14  ;;  %v9039_v17 = vld [vmem:[%s14927_s6 + $0x230] sm:$0xff]  ;;  %v9062_v14 = vld [vmem:[%s14928_s7 + $0x20] sm:$0xff]  ;;  %v9063_v31 = vld [vmem:[%s14928_s7 + $0x28] sm:$0xff] }
 0x48f   : > { %6114 = vmatprep.mubr.f32.mxu0 %v10906_v2 }
 0x490   : > { %10355 = vmatpush1.bf16.msra.mxu1 %v10354_v18  ;;  %v8997_v18 = vld [vmem:[%s14927_s6 + $0x110] sm:$0xff] }
 0x491   : > { %10356 = vmatprep.subr.bf16.mxu1 %v10922_v42  ;;  %v10400_v21 = vpack.c.bf16 %v8998_v46, %v8997_v18  ;;  %v9041_v46 = vld [vmem:[%s14927_s6 + $0x240] sm:$0xff] }
 0x492   : > { %8974 = vmatmul.mubr.msk.f32.vlgmr.msra.gmra.mrb[8].mxu0 %vm5356_vm13, %v8970_v27  ;;  %v8999_v27 = vld [vmem:[%s14927_s6 + $0x120] sm:$0xff] }
 0x493   : > { %8979 = vmatpush1.msk.msra.mxu0 %vm5363_vm12, %v6138_v30  ;;  %6120 = vmatprep.mubr.f32.mxu0 %v10906_v2  ;;  %v10406_v30 = vpack.c.bf16 %v9002_v38, %v9001_v54  ;;  %v9045_v54 = vld [vmem:[%s14927_s6 + $0x260] sm:$0xff]  ;;  %v9046_v38 = vld [vmem:[%s14927_s6 + $0x268] sm:$0xff] }
 0x494   : > { %10358 = vmatpush1.bf16.msra.mxu1 %v10357_v28  ;;  %10483 = vmatprep.subr.bf16.mxu0 %v10922_v42  ;;  %v9000_v28 = vld [vmem:[%s14927_s6 + $0x128] sm:$0xff] }
 0x495   : > { %10359 = vmatprep.subr.bf16.mxu1 %v10922_v42  ;;  %v10403_v29 = vpack.c.bf16 %v9000_v28, %v8999_v27  ;;  %v9043_v28 = vld [vmem:[%s14927_s6 + $0x250] sm:$0xff] }
 0x496   : > { %8975 = vmatmul.mubr.msk.f32.gmra.mrb[10].mxu0 %vm5356_vm13, %v8971_v32  ;;  %v9003_v32 = vld [vmem:[%s14927_s6 + $0x140] sm:$0xff] }
 0x497   : > { %6213 = vmatprep.mubr.f32.mxu0 %v10906_v2 }
 0x498   : > { %10361 = vmatpush1.bf16.msra.mxu1 %v10360_v36  ;;  %v9004_v36 = vld [vmem:[%s14927_s6 + $0x148] sm:$0xff] }
 0x499   : > { %10362 = vmatprep.subr.bf16.mxu1 %v10922_v42  ;;  %v10409_v48 = vpack.c.bf16 %v9004_v36, %v9003_v32  ;;  %v9047_v32 = vld [vmem:[%s14927_s6 + $0x270] sm:$0xff]  ;;  %v9048_v36 = vld [vmem:[%s14927_s6 + $0x278] sm:$0xff] }
 0x49a   : > { %8980 = vmatmul.mubr.msk.f32.vlgmr.msra.gmra.mrb[8].mxu0 %vm5356_vm13, %v8976_v24  ;;  %v9006_v24 = vld [vmem:[%s14927_s6 + $0x158] sm:$0x1] }
 0x49b   : > { %6219 = vmatprep.mubr.f32.mxu0 %v10906_v2 }
 0x49c   : > { %10364 = vmatpush1.bf16.msra.mxu1 %v10363_v34  ;;  %v10412_v34 = vpack.c.bf16 %v9006_v24, %v9005_v33  ;;  %v9049_v33 = vld [vmem:[%s14927_s6 + $0x280] sm:$0xff]  ;;  %v9050_v24 = vld [vmem:[%s14927_s6 + $0x288] sm:$0xff] }
 0x49d   : > { %10365 = vmatprep.subr.bf16.mxu1 %v10922_v42 }
 0x49e   : > { %8981 = vmatmul.mubr.msk.f32.gmra.mrb[10].mxu0 %vm5356_vm13, %v8977_v47  ;;  %v10416_v47 = vpack.c.bf16 %v9011_v26, %v9010_v35  ;;  %v9051_v35 = vld [vmem:[%s14927_s6 + $0x290] sm:$0xff]  ;;  %v9052_v26 = vld [vmem:[%s14927_s6 + $0x298] sm:$0xff] }
 0x49f   : > { %9337 = vmatprep.mubr.msk.f32.mxu0 %vm10915_vm10, %v10906_v2 }
 0x4a0   : > { %10367 = vmatpush1.bf16.msra.mxu1 %v10366_v40  ;;  %v9012_v40 = vld [vmem:[%s14927_s6 + $0x170] sm:$0xff] }
 0x4a1   : > { %10368 = vmatprep.subr.bf16.mxu1 %v10922_v42  ;;  %v10419_v45 = vpack.c.bf16 %v9013_v44, %v9012_v40  ;;  %v9053_v40 = vld [vmem:[%s14927_s6 + $0x2a0] sm:$0xff]  ;;  %v9054_v44 = vld [vmem:[%s14927_s6 + $0x2a8] sm:$0xff] }
 0x4a4   : > { %10370 = vmatpush1.bf16.msra.mxu1 %v10369_v51  ;;  %v9014_v51 = vld [vmem:[%s14927_s6 + $0x180] sm:$0xff] }
 0x4a5   : > { %10371 = vmatprep.subr.bf16.mxu1 %v10922_v42  ;;  %v10422_v59 = vpack.c.bf16 %v9015_v52, %v9014_v51  ;;  %v9055_v51 = vld [vmem:[%s14927_s6 + $0x2b0] sm:$0xff]  ;;  %v9056_v52 = vld [vmem:[%s14927_s6 + $0x2b8] sm:$0x1] }
 0x4a8   : > { %10373 = vmatpush1.bf16.msra.mxu1 %v10372_v20  ;;  %v9016_v20 = vld [vmem:[%s14927_s6 + $0x190] sm:$0xff] }
 0x4a9   : > { %10374 = vmatprep.subr.bf16.mxu1 %v10922_v42  ;;  %v10425_v25 = vpack.c.bf16 %v9017_v58, %v9016_v20 }
 0x4ac   : > { %10376 = vmatpush1.bf16.msra.mxu1 %v10375_v11  ;;  %v9018_v11 = vld [vmem:[%s14927_s6 + $0x1a0] sm:$0xff] }
 0x4ad   : > { %10377 = vmatprep.subr.bf16.mxu1 %v10922_v42  ;;  %v10428_v61 = vpack.c.bf16 %v9019_v56, %v9018_v11  ;;  %v6664_v11 = vld [vmem:[%s14928_s7 + $0x8] sm:$0xff] }
 0x4b0   : > { %10380 = vmatpush1.bf16.msk.msra.mxu1 %vm14161_vm5, %v10378_v23  ;;  %v9020_v23 = vld [vmem:[%s14927_s6 + $0x1b0] sm:$0xff] }
 0x4b1   : > { %10381 = vmatprep.subr.bf16.mxu1 %v10922_v42 }
 0x555   : > { %v5434_v12 = vpop.f32.mrb[8].mxu1 }
 0x556   : > { %v5436_v63 = vpop.f32.mrb[9].mxu1 }
 0x559   : > { %v5440_v7 = vpop.f32.mrb[10].mxu1 }
 0x55a   : > { %v5442_v37 = vpop.f32.mrb[11].mxu1 }
 0x56d   : > { %v6215_v60 = vpop.f32.mrb[8].mxu0 }
 0x56e   : > { %v14174_v55 = vadd.f32 %v6215_v60, %v5434_v12  ;;  %v6217_v3 = vpop.f32.mrb[9].mxu0  ;;  %v9021_v12 = vld [vmem:[%s14927_s6 + $0x1b8] sm:$0xff] }
 0x56f   : > { %v14176_v0 = vadd.f32 %v6217_v3, %v5436_v63  ;;  %v10431_v63 = vpack.c.bf16 %v9021_v12, %v9020_v23  ;;  %v9025_v60 = vld [vmem:[%s14927_s6 + $0x1d8] sm:$0xff] }
 0x570   : > { %v10437_v3 = vpack.c.bf16 %v9025_v60, %v9024_v5 }
 0x571   : > { %v6221_v49 = vpop.f32.mrb[10].mxu0  ;;  %8983 = vmatprep.mubr.msk.f32.mxu1 %vm6252_vm1, %v14176_v0 }
 0x572   : > { %v14186_v9 = vadd.f32 %v6221_v49, %v5440_v7  ;;  %v6223_v22 = vpop.f32.mrb[11].mxu0  ;;  %6327 = vmatmul.mubr.f32.vlgmr.msra.gmra.mrb[12].mxu1 %v14174_v55  ;;  %v9022_v7 = vld [vmem:[%s14927_s6 + $0x1c0] sm:$0xff]  ;;  %v9028_v49 = vld [vmem:[%s14927_s6 + $0x1f0] sm:$0xff] }
 0x573   : > { %v14189_v43 = vadd.f32 %v6223_v22, %v5442_v37  ;;  %10383 = vmatpush1.bf16.msra.mxu1 %v10382_v4  ;;  %v9023_v37 = vld [vmem:[%s14927_s6 + $0x1c8] sm:$0xff]  ;;  %v9026_v4 = vld [vmem:[%s14927_s6 + $0x1e0] sm:$0xff]  ;;  %v9029_v22 = vld [vmem:[%s14927_s6 + $0x1f8] sm:$0xff] }
 0x574   : > { %10384 = vmatprep.subr.bf16.mxu1 %v10922_v42  ;;  %v10434_v53 = vpack.c.bf16 %v9023_v37, %v9022_v7  ;;  %v10440_v8 = vpack.c.bf16 %v9027_v6, %v9026_v4 }
 0x575   : > { %8984 = vmatprep.mubr.msk.f32.mxu1 %vm6252_vm1, %v14189_v43 }
 0x576   : > { %6332 = vmatmul.mubr.f32.gmra.mrb[14].mxu1 %v14186_v9 }
 0x577   : > { %10386 = vmatpush1.bf16.msra.mxu1 %v10385_v16  ;;  %9008 = vmatprep.mubr.msk.f32.mxu1 %vm6252_vm1, %v14176_v0  ;;  %v10443_v16 = vpack.c.bf16 %v9029_v22, %v9028_v49  ;;  %v7976_v22 = vld [vmem:[%s14930_s9] sm:$0xff] }
 0x578   : > { %10387 = vmatprep.subr.bf16.mxu1 %v10922_v42 }
 0x57b   : > { %10389 = vmatpush1.bf16.msra.mxu1 %v10388_v13  ;;  %v10446_v13 = vpack.c.bf16 %v9031_v19, %v9030_v10  ;;  %v7978_v10 = vld [vmem:[%s14930_s9 + $0x10] sm:$0xff] }
 0x57c   : > { %10390 = vmatprep.subr.bf16.mxu1 %v10922_v42 }
 0x57f   : > { %10392 = vmatpush1.bf16.msra.mxu1 %v10391_v39  ;;  %v10450_v39 = vpack.c.bf16 %v9036_v50, %v9035_v1  ;;  %v7979_v1 = vld [vmem:[%s14930_s9 + $0x18] sm:$0xff] }
 0x580   : > { %10393 = vmatprep.subr.bf16.mxu1 %v10922_v42 }
 0x583   : > { %10395 = vmatpush1.bf16.msra.mxu1 %v10394_v15  ;;  %v6647_v15 = vld [vmem:[%s14926_s5 + $0x8] sm:$0xff] }
 0x584   : > { %10396 = vmatprep.subr.bf16.mxu1 %v10922_v42  ;;  %6655 = vperm.xlu1 %10841, %v6647_v15   ;;  %v6651_v15 = vpop.permute.xlu0 %6650 }
 0x587   : > { %10398 = vmatpush1.bf16.msra.mxu1 %v10397_v41  ;;  %v9040_v41 = vld [vmem:[%s14927_s6 + $0x238] sm:$0xff] }
 0x588   : > { %10399 = vmatprep.subr.bf16.mxu1 %v10922_v42  ;;  %v10456_v18 = vpack.c.bf16 %v9040_v41, %v9039_v17  ;;  %v7980_v41 = vld [vmem:[%s14930_s9 + $0x20] sm:$0xff] }
 0x58b   : > { %10401 = vmatpush1.bf16.msra.mxu1 %v10400_v21  ;;  %v9042_v21 = vld [vmem:[%s14927_s6 + $0x248] sm:$0xff] }
 0x58c   : > { %10402 = vmatprep.subr.bf16.mxu1 %v10922_v42  ;;  %v10459_v27 = vpack.c.bf16 %v9042_v21, %v9041_v46  ;;  %v10491_v21 = vpack.c.bf16 %v9063_v31, %v9062_v14  ;;  %v9098_v14 = vld [vmem:[%s14928_s7 + $0xe0] sm:$0xff]  ;;  %v9099_v31 = vld [vmem:[%s14928_s7 + $0xe8] sm:$0xff] }
 0x58f   : > { %10404 = vmatpush1.bf16.msra.mxu1 %v10403_v29 }
 0x590   : > { %10405 = vmatprep.subr.bf16.mxu1 %v10922_v42 }
 0x593   : > { %10407 = vmatpush1.bf16.msra.mxu1 %v10406_v30  ;;  %v10465_v30 = vpack.c.bf16 %v9046_v38, %v9045_v54  ;;  %v9065_v54 = vld [vmem:[%s14928_s7 + $0x38] sm:$0x1] }
 0x594   : > { %10408 = vmatprep.subr.bf16.mxu1 %v10922_v42 }
 0x597   : > { %10410 = vmatpush1.bf16.msra.mxu1 %v10409_v48  ;;  %v10468_v48 = vpack.c.bf16 %v9048_v36, %v9047_v32  ;;  %v7983_v32 = vld [vmem:[%s14930_s9 + $0x38] sm:$0xff] }
 0x598   : > { %10411 = vmatprep.subr.bf16.mxu1 %v10922_v42 }
 0x59b   : > { %10414 = vmatpush1.bf16.msk.msra.mxu1 %vm14161_vm5, %v10412_v34  ;;  %v10471_v34 = vpack.c.bf16 %v9050_v24, %v9049_v33  ;;  %v9069_v33 = vld [vmem:[%s14928_s7 + $0x48] sm:$0xff] }
 0x59c   : > { %10415 = vmatprep.subr.bf16.mxu1 %v10922_v42 }
 0x59e   : > { %6428 = vmatmul.mubr.f32.vlgmr.msra.gmra.mrb[16].mxu1 %v14174_v55 }
 0x59f   : > { %9009 = vmatprep.mubr.msk.f32.mxu1 %vm6252_vm1, %v14189_v43  ;;  %10417 = vmatpush1.bf16.msra.mxu1 %v10416_v47  ;;  %v10474_v47 = vpack.c.bf16 %v9052_v26, %v9051_v35  ;;  %v7985_v35 = vld [vmem:[%s14930_s9 + $0x48] sm:$0xff] }
 0x5a0   : > { %10418 = vmatprep.subr.bf16.mxu1 %v10922_v42 }
 0x5a2   : > { %6433 = vmatmul.mubr.f32.gmra.mrb[18].mxu1 %v14186_v9 }
 0x5a3   : > { %10420 = vmatpush1.bf16.msra.mxu1 %v10419_v45  ;;  %9033 = vmatprep.mubr.msk.f32.mxu1 %vm6252_vm1, %v14176_v0  ;;  %v10477_v45 = vpack.c.bf16 %v9054_v44, %v9053_v40  ;;  %v9070_v40 = vld [vmem:[%s14928_s7 + $0x50] sm:$0xff]  ;;  %v9071_v44 = vld [vmem:[%s14928_s7 + $0x58] sm:$0x1] }
 0x5a4   : > { %10421 = vmatprep.subr.bf16.mxu1 %v10922_v42 }
 0x5a7   : > { %10423 = vmatpush1.bf16.msra.mxu1 %v10422_v59  ;;  %v10480_v59 = vpack.c.bf16 %v9056_v52, %v9055_v51  ;;  %v7986_v51 = vld [vmem:[%s14930_s9 + $0x50] sm:$0xff]  ;;  %v7987_v52 = vld [vmem:[%s14930_s9 + $0x58] sm:$0xff] }
 0x5a8   : > { %10424 = vmatprep.subr.bf16.mxu1 %v10922_v42 }
 0x5ab   : > { %10426 = vmatpush1.bf16.msra.mxu1 %v10425_v25  ;;  %v6663_v25 = vld [vmem:[%s14928_s7] sm:$0xff] }
 0x5ac   : > { %10427 = vmatprep.subr.bf16.mxu1 %v10922_v42  ;;  %v10484_v56 = vpack.c.bf16 %v6664_v11, %v6663_v25  ;;  %v10611_v25 = vpack.c.bf16 %v7987_v52, %v7986_v51  ;;  %v9122_v52 = vld [vmem:[%s14928_s7 + $0x160] sm:$0xff] }
 0x5ae   : > { %10485 = vmatpush3.bf16.msra.mxu0 %v10484_v56 }
 0x5af   : > { %10429 = vmatpush1.bf16.msra.mxu1 %v10428_v61  ;;  %10486 = vmatprep.subr.bf16.mxu0 %v10922_v42 }
 0x5b0   : > { %10430 = vmatprep.subr.bf16.mxu1 %v10922_v42 }
 0x5b3   : > { %10432 = vmatpush1.bf16.msra.mxu1 %v10431_v63 }
 0x5b4   : > { %10433 = vmatprep.subr.bf16.mxu1 %v10922_v42 }
 0x5b7   : > { %10435 = vmatpush1.bf16.msra.mxu1 %v10434_v53 }
 0x5b8   : > { %10436 = vmatprep.subr.bf16.mxu1 %v10922_v42 }
 0x5bb   : > { %10438 = vmatpush1.bf16.msra.mxu1 %v10437_v3 }
 0x5bc   : > { %10439 = vmatprep.subr.bf16.mxu1 %v10922_v42 }
 0x5bf   : > { %10441 = vmatpush1.bf16.msra.mxu1 %v10440_v8 }
 0x5c0   : > { %10442 = vmatprep.subr.bf16.mxu1 %v10922_v42 }
 0x5c3   : > { %10444 = vmatpush1.bf16.msra.mxu1 %v10443_v16  ;;  %v7977_v16 = vld [vmem:[%s14930_s9 + $0x8] sm:$0xff] }
 0x5c4   : > { %10445 = vmatprep.subr.bf16.mxu1 %v10922_v42 }
 0x5c7   : > { %10448 = vmatpush1.bf16.msk.msra.mxu1 %vm14161_vm5, %v10446_v13  ;;  %v10596_v13 = vpack.c.bf16 %v7977_v16, %v7976_v22  ;;  %v9092_v16 = vld [vmem:[%s14928_s7 + $0xc0] sm:$0xff] }
 0x5c8   : > { %10449 = vmatprep.subr.bf16.mxu1 %v10922_v42 }
 0x5ca   : > { %6531 = vmatmul.mubr.f32.vlgmr.msra.gmra.mrb[20].mxu1 %v14174_v55 }
 0x5cb   : > { %9034 = vmatprep.mubr.msk.f32.mxu1 %vm6252_vm1, %v14189_v43  ;;  %10451 = vmatpush1.bf16.msra.mxu1 %v10450_v39 }
 0x5cc   : > { %10452 = vmatprep.subr.bf16.mxu1 %v10922_v42 }
 0x5ce   : > { %6536 = vmatmul.mubr.f32.gmra.mrb[22].mxu1 %v14186_v9 }
 0x5cf   : > { %10454 = vmatpush1.bf16.msra.mxu1 %v10453_v57  ;;  %9058 = vmatprep.mubr.msk.f32.mxu1 %vm6252_vm1, %v14176_v0  ;;  %v9044_v0 = vld [vmem:[%s14927_s6 + $0x258] sm:$0xff]  ;;  %v10599_v57 = vpack.c.bf16 %v7979_v1, %v7978_v10  ;;  %v9093_v10 = vld [vmem:[%s14928_s7 + $0xc8] sm:$0xff]  ;;  %v9094_v1 = vld [vmem:[%s14928_s7 + $0xd0] sm:$0xff] }
 0x5d0   : > { %10455 = vmatprep.subr.bf16.mxu1 %v10922_v42  ;;  %v10462_v29 = vpack.c.bf16 %v9044_v0, %v9043_v28 }
 0x5d3   : > { %10457 = vmatpush1.bf16.msra.mxu1 %v10456_v18  ;;  %v7981_v18 = vld [vmem:[%s14930_s9 + $0x28] sm:$0xff] }
 0x5d4   : > { %10458 = vmatprep.subr.bf16.mxu1 %v10922_v42  ;;  %v10602_v38 = vpack.c.bf16 %v7981_v18, %v7980_v41  ;;  %v9101_v41 = vld [vmem:[%s14928_s7 + $0xf8] sm:$0x1] }
 0x5d7   : > { %10460 = vmatpush1.bf16.msra.mxu1 %v10459_v27 }
 0x5d8   : > { %10461 = vmatprep.subr.bf16.mxu1 %v10922_v42 }
 0x5db   : > { %10463 = vmatpush1.bf16.msra.mxu1 %v10462_v29  ;;  %v9064_v29 = vld [vmem:[%s14928_s7 + $0x30] sm:$0xff] }
 0x5dc   : > { %10464 = vmatprep.subr.bf16.mxu1 %v10922_v42  ;;  %v10494_v36 = vpack.c.bf16 %v9065_v54, %v9064_v29 }
 0x5df   : > { %10466 = vmatpush1.bf16.msra.mxu1 %v10465_v30  ;;  %v7982_v30 = vld [vmem:[%s14930_s9 + $0x30] sm:$0xff] }
 0x5e0   : > { %10467 = vmatprep.subr.bf16.mxu1 %v10922_v42  ;;  %v10605_v24 = vpack.c.bf16 %v7983_v32, %v7982_v30  ;;  %v9107_v30 = vld [vmem:[%s14928_s7 + $0x118] sm:$0x1] }
 0x5e3   : > { %10469 = vmatpush1.bf16.msra.mxu1 %v10468_v48  ;;  %v9068_v48 = vld [vmem:[%s14928_s7 + $0x40] sm:$0xff] }
 0x5e4   : > { %10470 = vmatprep.subr.bf16.mxu1 %v10922_v42  ;;  %v10498_v26 = vpack.c.bf16 %v9069_v33, %v9068_v48  ;;  %v9110_v48 = vld [vmem:[%s14928_s7 + $0x120] sm:$0xff]  ;;  %v9111_v33 = vld [vmem:[%s14928_s7 + $0x128] sm:$0xff] }
 0x5e7   : > { %10472 = vmatpush1.bf16.msra.mxu1 %v10471_v34  ;;  %v7984_v34 = vld [vmem:[%s14930_s9 + $0x40] sm:$0xff] }
 0x5e8   : > { %10473 = vmatprep.subr.bf16.mxu1 %v10922_v42 }
 0x5eb   : > { %10475 = vmatpush1.bf16.msra.mxu1 %v10474_v47 }
 0x5ec   : > { %10476 = vmatprep.subr.bf16.mxu1 %v10922_v42 }
 0x5ef   : > { %10478 = vmatpush1.bf16.msra.mxu1 %v10477_v45  ;;  %v10608_v45 = vpack.c.bf16 %v7985_v35, %v7984_v34  ;;  %v9116_v35 = vld [vmem:[%s14928_s7 + $0x140] sm:$0xff] }
 0x5f0   : > { %10479 = vmatprep.subr.bf16.mxu1 %v10922_v42 }
 0x5f3   : > { %10482 = vmatpush1.bf16.msk.msra.mxu1 %vm14161_vm5, %v10480_v59  ;;  %v10501_v59 = vpack.c.bf16 %v9071_v44, %v9070_v40  ;;  %v9118_v44 = vld [vmem:[%s14928_s7 + $0x150] sm:$0xff] }
 0x5f4   : > { %10595 = vmatprep.subr.bf16.mxu1 %v10922_v42 }
 0x5f6   : > { %6634 = vmatmul.mubr.f32.vlgmr.msra.gmra.mrb[24].mxu1 %v14174_v55 }
 0x5f7   : > { %9059 = vmatprep.mubr.msk.f32.mxu1 %vm6252_vm1, %v14189_v43  ;;  %v6666_v43 = vld [vmem:[%s14928_s7 + $0x18] sm:$0x1]  ;;  %10597 = vmatpush3.bf16.msra.mxu1 %v10596_v13 }
 0x5f8   : > { %10598 = vmatprep.subr.bf16.mxu1 %v10922_v42 }
 0x5fa   : > { %6639 = vmatmul.mubr.f32.gmra.mrb[26].mxu1 %v14186_v9  ;;  %v6665_v9 = vld [vmem:[%s14928_s7 + $0x10] sm:$0xff] }
 0x5fb   : > { %9535 = vmatprep.mubr.msk.f32.mxu1 %vm10915_vm10, %v10906_v2  ;;  %v10487_v23 = vpack.c.bf16 %v6666_v43, %v6665_v9  ;;  %10600 = vmatpush3.bf16.msra.mxu1 %v10599_v57  ;;  %v9080_v43 = vld [vmem:[%s14928_s7 + $0x80] sm:$0xff] }
 0x5fc   : > { %10601 = vmatprep.subr.bf16.mxu1 %v10922_v42 }
 0x5fd   : > { %10489 = vmatpush3.bf16.msk.msra.mxu0 %vm14161_vm5, %v10487_v23  ;;  %v9081_v23 = vld [vmem:[%s14928_s7 + $0x88] sm:$0xff] }
 0x5fe   : > { %10490 = vmatprep.subr.bf16.mxu0 %v10922_v42 }
 0x5ff   : > { %10603 = vmatpush3.bf16.msra.mxu1 %v10602_v38  ;;  %v9106_v38 = vld [vmem:[%s14928_s7 + $0x110] sm:$0xff] }
 0x600   : > { %10604 = vmatprep.subr.bf16.mxu1 %v10922_v42 }
 0x603   : > { %10606 = vmatpush3.bf16.msra.mxu1 %v10605_v24  ;;  %v6656_v32 = vpop.permute.xlu1 %6655  ;;  %v10547_v24 = vpack.c.bf16 %v9111_v33, %v9110_v48  ;;  %v8073_v33 = vld [vmem:[%s14932_s11 + $0x30] sm:$0xff] }
 0x604   : > { %10607 = vmatprep.subr.bf16.mxu1 %v10922_v42 }
 0x607   : > { %10609 = vmatpush3.bf16.msra.mxu1 %v10608_v45  ;;  %v9119_v45 = vld [vmem:[%s14928_s7 + $0x158] sm:$0x1] }
 0x608   : > { %10610 = vmatprep.subr.bf16.mxu1 %v10922_v42  ;;  %v10557_v51 = vpack.c.bf16 %v9119_v45, %v9118_v44  ;;  %v8077_v44 = vld [vmem:[%s14932_s11 + $0x50] sm:$0xf]  ;;  %v7991_v45 = vld [vmem:[%s14931_s10] sm:$0x1] }
 0x60b   : > { %10612 = vmatpush3.bf16.msra.mxu1 %v10611_v25  ;;  %v9124_v25 = vld [vmem:[%s14928_s7 + $0x170] sm:$0xff] }
 0x60c   : > { %10613 = vmatprep.subr.bf16.mxu1 %v10922_v42 }
 0x645   : > { %v6328_v20 = vpop.f32.mrb[12].mxu1 }
 0x646   : > { %v6330_v58 = vpop.f32.mrb[13].mxu1 }
 0x647   : > { %v9075_v58 = vld [vmem:[%s14928_s7 + $0x68] sm:$0xff] }
 0x649   : > { %v6333_v55 = vpop.f32.mrb[14].mxu1 }
 0x64a   : > { %v6335_v61 = vpop.f32.mrb[15].mxu1 }
 0x64b   : > { %v9077_v61 = vld [vmem:[%s14928_s7 + $0x78] sm:$0x1] }
 0x671   : > { %v6429_v12 = vpop.f32.mrb[16].mxu1 }
 0x672   : > { %v6438_v63 = vmax.f32 %v6328_v20, %v6429_v12  ;;  %v6431_v7 = vpop.f32.mrb[17].mxu1  ;;  %v9074_v20 = vld [vmem:[%s14928_s7 + $0x60] sm:$0xff]  ;;  %v10512_v12 = vpack.c.bf16 %v9081_v23, %v9080_v43  ;;  %v9130_v23 = vld [vmem:[%s14928_s7 + $0x190] sm:$0xff] }
 0x673   : > { %v10505_v11 = vpack.c.bf16 %v9075_v58, %v9074_v20  ;;  %v9082_v7 = vld [vmem:[%s14928_s7 + $0x90] sm:$0xff] }
 0x675   : > { %v6434_v37 = vpop.f32.mrb[18].mxu1 }
 0x676   : > { %v6439_v53 = vmax.f32 %v6333_v55, %v6434_v37  ;;  %v6436_v5 = vpop.f32.mrb[19].mxu1  ;;  %v9076_v55 = vld [vmem:[%s14928_s7 + $0x70] sm:$0xff]  ;;  %v9083_v37 = vld [vmem:[%s14928_s7 + $0x98] sm:$0x1] }
 0x677   : > { %v10508_v9 = vpack.c.bf16 %v9077_v61, %v9076_v55  ;;  %v9086_v5 = vld [vmem:[%s14928_s7 + $0xa0] sm:$0xff]  ;;  %v9129_v61 = vld [vmem:[%s14928_s7 + $0x188] sm:$0xff] }
 0x678   : > { %v9128_v55 = vld [vmem:[%s14928_s7 + $0x180] sm:$0xff] }
 0x69d   : > { %v6532_v60 = vpop.f32.mrb[20].mxu1 }
 0x69e   : > { %v6541_v3 = vmax.f32 %v6438_v63, %v6532_v60  ;;  %v6534_v4 = vpop.f32.mrb[21].mxu1  ;;  %v9087_v60 = vld [vmem:[%s14928_s7 + $0xa8] sm:$0xff] }
 0x6a1   : > { %v6537_v6 = vpop.f32.mrb[22].mxu1 }
 0x6a2   : > { %v14458_v8 = vmax.f32 %v6439_v53, %v6537_v6  ;;  %v6539_v49 = vpop.f32.mrb[23].mxu1  ;;  %v10515_v53 = vpack.c.bf16 %v9083_v37, %v9082_v7  ;;  %v9088_v6 = vld [vmem:[%s14928_s7 + $0xb0] sm:$0xff]  ;;  %v9134_v7 = vld [vmem:[%s14928_s7 + $0x1a0] sm:$0xff]  ;;  %v9135_v37 = vld [vmem:[%s14928_s7 + $0x1a8] sm:$0xff] }
 0x6a3   : > { %v9089_v49 = vld [vmem:[%s14928_s7 + $0xb8] sm:$0x1] }
 0x6a4   : > { %v10522_v22 = vpack.c.bf16 %v9089_v49, %v9088_v6  ;;  %v9140_v6 = vld [vmem:[%s14928_s7 + $0x1c0] sm:$0xff]  ;;  %v9141_v49 = vld [vmem:[%s14928_s7 + $0x1c8] sm:$0xff] }
 0x6c9   : > { %v6635_v19 = vpop.f32.mrb[24].mxu1 }
 0x6ca   : > { %v6644_v50 = vmax.f32 %v6541_v3, %v6635_v19  ;;  %v6637_v39 = vpop.f32.mrb[25].mxu1  ;;  %v10519_v3 = vpack.c.bf16 %v9087_v60, %v9086_v5  ;;  %v10526_v19 = vpack.c.bf16 %v9093_v10, %v9092_v16  ;;  %v9136_v60 = vld [vmem:[%s14928_s7 + $0x1b0] sm:$0xff] }
 0x6cb   : > { %v9142_v10 = vld [vmem:[%s14928_s7 + $0x1d0] sm:$0xff] }
 0x6cc   : > { %v6658_v17 = vadd.f32 %v6651_v15, %v6644_v50  ;;  %v9095_v50 = vld [vmem:[%s14928_s7 + $0xd8] sm:$0x1]  ;;  %v10533_v15 = vpack.c.bf16 %v9099_v31, %v9098_v14  ;;  %v9148_v31 = vld [vmem:[%s14928_s7 + $0x1f0] sm:$0xff] }
 0x6cd   : > { %v14485_v46 = vpop.f32.mrb[26].mxu1  ;;  %v10529_v39 = vpack.c.bf16 %v9095_v50, %v9094_v1  ;;  %v9146_v1 = vld [vmem:[%s14928_s7 + $0x1e0] sm:$0xff]  ;;  %v9147_v50 = vld [vmem:[%s14928_s7 + $0x1e8] sm:$0xff] }
 0x6ce   : > { %v14487_v27 = vmax.f32 %v6658_v17, 0.0  ;;  %v6645_v28 = vmax.f32 %v14458_v8, %v14485_v46  ;;  %v6642_v0 = vpop.f32.mrb[27].mxu1  ;;  %v9100_v17 = vld [vmem:[%s14928_s7 + $0xf0] sm:$0xff]  ;;  %v9113_v46 = vld [vmem:[%s14928_s7 + $0x138] sm:$0x1] }
 0x6cf   : > { %v10536_v18 = vpack.c.bf16 %v9101_v41, %v9100_v17  ;;  %v9105_v0 = vld [vmem:[%s14928_s7 + $0x108] sm:$0xff]  ;;  %v9112_v8 = vld [vmem:[%s14928_s7 + $0x130] sm:$0xff]  ;;  %v7988_v41 = vld [vmem:[%s14930_s9 + $0x60] sm:$0xff] }
 0x6d0   : > { %9338 = vmatmul.mubr.msk.f32.vlgmr.msra.gmra.mrb[12].mxu0 %vm6667_vm6, %v14487_v27  ;;  %v6750_v47 = vrot.slane %v14487_v27, 1  ;;  %v6832_v56 = vrot.slane %v14487_v27, 2  ;;  %v6914_v63 = vrot.slane %v14487_v27, 3  ;;  %v6996_v4 = vrot.slane %v14487_v27, 4 }
 0x6d1   : > { %10492 = vmatpush3.bf16.msra.mxu0 %v10491_v21  ;;  %9348 = vmatprep.mubr.msk.f32.mxu0 %vm10915_vm10, %v10906_v2  ;;  %v7078_v13 = vrot.slane %v14487_v27, 5  ;;  %v7160_v57 = vrot.slane %v14487_v27, 6  ;;  %v9104_v21 = vld [vmem:[%s14928_s7 + $0x100] sm:$0xff]  ;;  %v7242_v54 = vrot.slane %v14487_v27, 7  ;;  %v6659_v27 = vadd.f32 %v6656_v32, %v6645_v28 }
 0x6d2   : > { %10493 = vmatprep.subr.bf16.mxu0 %v10922_v42  ;;  %v10540_v29 = vpack.c.bf16 %v9105_v0, %v9104_v21  ;;  %v10550_v28 = vpack.c.bf16 %v9113_v46, %v9112_v8  ;;  %v8067_v0 = vld [vmem:[%s14932_s11] sm:$0xff] }
 0x6d3   : > { %v14676_v34 = vmax.f32 %v6659_v27, 0.0  ;;  %v8072_v27 = vld [vmem:[%s14932_s11 + $0x28] sm:$0xff]  ;;  %v6662_v8 = vld [vmem:[%s14929_s8] sm:$0x1] }
 0x6d5   : > { %10496 = vmatpush3.bf16.msk.msra.mxu0 %vm14161_vm5, %v10494_v36  ;;  %v10543_v36 = vpack.c.bf16 %v9107_v30, %v9106_v38  ;;  %v7406_v40 = vrot.slane %v14676_v34, 1  ;;  %v7488_v58 = vrot.slane %v14676_v34, 2  ;;  %v7570_v43 = vrot.slane %v14676_v34, 3  ;;  %v8070_v30 = vld [vmem:[%s14932_s11 + $0x18] sm:$0xff] }
 0x6d6   : > { %10497 = vmatprep.subr.bf16.mxu0 %v10922_v42  ;;  %v7652_v5 = vrot.slane %v14676_v34, 4  ;;  %v7734_v16 = vrot.slane %v14676_v34, 5  ;;  %v7816_v14 = vrot.slane %v14676_v34, 6  ;;  %v7898_v17 = vrot.slane %v14676_v34, 7 }
 0x6d8   : > { %9349 = vmatmul.mubr.msk.f32.vlgmr.msra.gmra.mrb[12].mxu0 %vm6667_vm6, %v6750_v47 }
 0x6d9   : > { %10499 = vmatpush3.bf16.msra.mxu0 %v10498_v26  ;;  %9359 = vmatprep.mubr.msk.f32.mxu0 %vm10915_vm10, %v10906_v2  ;;  %v9117_v26 = vld [vmem:[%s14928_s7 + $0x148] sm:$0xff] }
 0x6da   : > { %10500 = vmatprep.subr.bf16.mxu0 %v10922_v42  ;;  %v10554_v47 = vpack.c.bf16 %v9117_v26, %v9116_v35 }
 0x6dd   : > { %10503 = vmatpush3.bf16.msk.msra.mxu0 %vm14161_vm5, %v10501_v59  ;;  %v9123_v59 = vld [vmem:[%s14928_s7 + $0x168] sm:$0xff] }
 0x6de   : > { %10504 = vmatprep.subr.bf16.mxu0 %v10922_v42  ;;  %v10561_v20 = vpack.c.bf16 %v9123_v59, %v9122_v52 }
 0x6e0   : > { %9360 = vmatmul.mubr.msk.f32.vlgmr.msra.gmra.mrb[12].mxu0 %vm6667_vm6, %v6832_v56 }
 0x6e1   : > { %10506 = vmatpush3.bf16.msra.mxu0 %v10505_v11  ;;  %9370 = vmatprep.mubr.msk.f32.mxu0 %vm10915_vm10, %v10906_v2  ;;  %v9125_v11 = vld [vmem:[%s14928_s7 + $0x178] sm:$0x1] }
 0x6e2   : > { %10507 = vmatprep.subr.bf16.mxu0 %v10922_v42  ;;  %v10564_v56 = vpack.c.bf16 %v9125_v11, %v9124_v25 }
 0x6e5   : > { %10510 = vmatpush3.bf16.msk.msra.mxu0 %vm14161_vm5, %v10508_v9  ;;  %v10568_v9 = vpack.c.bf16 %v9129_v61, %v9128_v55 }
 0x6e6   : > { %10511 = vmatprep.subr.bf16.mxu0 %v10922_v42 }
 0x6e8   : > { %9371 = vmatmul.mubr.msk.f32.vlgmr.msra.gmra.mrb[12].mxu0 %vm6667_vm6, %v6914_v63 }
 0x6e9   : > { %10513 = vmatpush3.bf16.msra.mxu0 %v10512_v12  ;;  %9381 = vmatprep.mubr.msk.f32.mxu0 %vm10915_vm10, %v10906_v2  ;;  %v9131_v12 = vld [vmem:[%s14928_s7 + $0x198] sm:$0x1] }
 0x6ea   : > { %10514 = vmatprep.subr.bf16.mxu0 %v10922_v42  ;;  %v10571_v63 = vpack.c.bf16 %v9131_v12, %v9130_v23 }
 0x6ed   : > { %10517 = vmatpush3.bf16.msk.msra.mxu0 %vm14161_vm5, %v10515_v53  ;;  %v10575_v53 = vpack.c.bf16 %v9135_v37, %v9134_v7 }
 0x6ee   : > { %10518 = vmatprep.subr.bf16.mxu0 %v10922_v42 }
 0x6f0   : > { %9382 = vmatmul.mubr.msk.f32.vlgmr.msra.gmra.mrb[12].mxu0 %vm6667_vm6, %v6996_v4 }
 0x6f1   : > { %10520 = vmatpush3.bf16.msra.mxu0 %v10519_v3  ;;  %9392 = vmatprep.mubr.msk.f32.mxu0 %vm10915_vm10, %v10906_v2  ;;  %v9137_v3 = vld [vmem:[%s14928_s7 + $0x1b8] sm:$0x1] }
 0x6f2   : > { %10521 = vmatprep.subr.bf16.mxu0 %v10922_v42  ;;  %v10578_v4 = vpack.c.bf16 %v9137_v3, %v9136_v60 }
 0x6f5   : > { %10524 = vmatpush3.bf16.msk.msra.mxu0 %vm14161_vm5, %v10522_v22  ;;  %v10582_v22 = vpack.c.bf16 %v9141_v49, %v9140_v6 }
 0x6f6   : > { %10525 = vmatprep.subr.bf16.mxu0 %v10922_v42 }
 0x6f8   : > { %9393 = vmatmul.mubr.msk.f32.vlgmr.msra.gmra.mrb[12].mxu0 %vm6667_vm6, %v7078_v13 }
 0x6f9   : > { %10527 = vmatpush3.bf16.msra.mxu0 %v10526_v19  ;;  %9403 = vmatprep.mubr.msk.f32.mxu0 %vm10915_vm10, %v10906_v2  ;;  %v9143_v19 = vld [vmem:[%s14928_s7 + $0x1d8] sm:$0x1] }
 0x6fa   : > { %10528 = vmatprep.subr.bf16.mxu0 %v10922_v42  ;;  %v10585_v13 = vpack.c.bf16 %v9143_v19, %v9142_v10 }
 0x6fd   : > { %10531 = vmatpush3.bf16.msk.msra.mxu0 %vm14161_vm5, %v10529_v39  ;;  %v10589_v39 = vpack.c.bf16 %v9147_v50, %v9146_v1 }
 0x6fe   : > { %10532 = vmatprep.subr.bf16.mxu0 %v10922_v42 }
 0x700   : > { %9404 = vmatmul.mubr.msk.f32.vlgmr.msra.gmra.mrb[12].mxu0 %vm6667_vm6, %v7160_v57 }
 0x701   : > { %10534 = vmatpush3.bf16.msra.mxu0 %v10533_v15  ;;  %9414 = vmatprep.mubr.msk.f32.mxu0 %vm10915_vm10, %v10906_v2  ;;  %v9149_v15 = vld [vmem:[%s14928_s7 + $0x1f8] sm:$0x1] }
 0x702   : > { %10535 = vmatprep.subr.bf16.mxu0 %v10922_v42  ;;  %v10592_v57 = vpack.c.bf16 %v9149_v15, %v9148_v31 }
 0x705   : > { %10538 = vmatpush3.bf16.msk.msra.mxu0 %vm14161_vm5, %v10536_v18  ;;  %v7989_v18 = vld [vmem:[%s14930_s9 + $0x68] sm:$0xff] }
 0x706   : > { %10539 = vmatprep.subr.bf16.mxu0 %v10922_v42  ;;  %v10614_v21 = vpack.c.bf16 %v7989_v18, %v7988_v41 }
 0x708   : > { %9415 = vmatmul.mubr.msk.f32.vlgmr.msra.gmra.mrb[12].mxu0 %vm6667_vm6, %v7242_v54  ;;  %10615 = vmatpush3.bf16.msra.mxu1 %v10614_v21  ;;  %v8069_v54 = vld [vmem:[%s14932_s11 + $0x10] sm:$0xff] }
 0x709   : > { %10541 = vmatpush3.bf16.msra.mxu0 %v10540_v29  ;;  %9425 = vmatprep.mubr.msk.f32.mxu0 %vm10915_vm10, %v10906_v2  ;;  %v8068_v29 = vld [vmem:[%s14932_s11 + $0x8] sm:$0xff]  ;;  %v10620_v32 = vpack.c.bf16 %v8070_v30, %v8069_v54 }
 0x70a   : > { %10542 = vmatprep.subr.bf16.mxu0 %v10922_v42  ;;  %9533 = vmatprep.subr.mxu1 %v10906_v2  ;;  %v10617_v38 = vpack.c.bf16 %v8068_v29, %v8067_v0 }
 0x70c   : > { %9534 = vmatpush3.msra.mxu1 %v7990_v62 }
 0x70d   : > { %10545 = vmatpush3.bf16.msk.msra.mxu0 %vm14161_vm5, %v10543_v36  ;;  %v8071_v36 = vld [vmem:[%s14932_s11 + $0x20] sm:$0xff] }
 0x70e   : > { %10546 = vmatprep.subr.bf16.mxu0 %v10922_v42  ;;  %v10623_v48 = vpack.c.bf16 %v8072_v27, %v8071_v36 }
 0x710   : > { %9426 = vmatmul.mubr.msk.f32.vlgmr.msra.gmra.mrb[12].mxu0 %vm6667_vm6, %v14676_v34 }
 0x711   : > { %10548 = vmatpush3.bf16.msra.mxu0 %v10547_v24  ;;  %9436 = vmatprep.mubr.msk.f32.mxu0 %vm10915_vm10, %v10906_v2  ;;  %v8074_v24 = vld [vmem:[%s14932_s11 + $0x38] sm:$0xff] }
 0x712   : > { %10549 = vmatprep.subr.bf16.mxu0 %v10922_v42  ;;  %v10626_v34 = vpack.c.bf16 %v8074_v24, %v8073_v33 }
 0x715   : > { %10552 = vmatpush3.bf16.msk.msra.mxu0 %vm14161_vm5, %v10550_v28 }
 0x716   : > { %10553 = vmatprep.subr.bf16.mxu0 %v10922_v42 }
 0x718   : > { %9437 = vmatmul.mubr.msk.f32.vlgmr.msra.gmra.mrb[12].mxu0 %vm6667_vm6, %v7406_v40  ;;  %v8076_v40 = vld [vmem:[%s14932_s11 + $0x48] sm:$0xff] }
 0x719   : > { %10555 = vmatpush3.bf16.msra.mxu0 %v10554_v47  ;;  %9447 = vmatprep.mubr.msk.f32.mxu0 %vm10915_vm10, %v10906_v2  ;;  %v8075_v47 = vld [vmem:[%s14932_s11 + $0x40] sm:$0xff] }
 0x71a   : > { %10556 = vmatprep.subr.bf16.mxu0 %v10922_v42 }
 0x71d   : > { %10559 = vmatpush3.bf16.msk.msra.mxu0 %vm14161_vm5, %v10557_v51 }
 0x71e   : > { %10560 = vmatprep.subr.bf16.mxu0 %v10922_v42 }
 0x720   : > { %9448 = vmatmul.mubr.msk.f32.vlgmr.msra.gmra.mrb[12].mxu0 %vm6667_vm6, %v7488_v58 }
 0x721   : > { %10562 = vmatpush3.bf16.msra.mxu0 %v10561_v20  ;;  %9458 = vmatprep.mubr.msk.f32.mxu0 %vm10915_vm10, %v10906_v2 }
 0x722   : > { %10563 = vmatprep.subr.bf16.mxu0 %v10922_v42 }
 0x725   : > { %10566 = vmatpush3.bf16.msk.msra.mxu0 %vm14161_vm5, %v10564_v56 }
 0x726   : > { %10567 = vmatprep.subr.bf16.mxu0 %v10922_v42 }
 0x728   : > { %9459 = vmatmul.mubr.msk.f32.vlgmr.msra.gmra.mrb[12].mxu0 %vm6667_vm6, %v7570_v43 }
 0x729   : > { %10569 = vmatpush3.bf16.msra.mxu0 %v10568_v9  ;;  %9469 = vmatprep.mubr.msk.f32.mxu0 %vm10915_vm10, %v10906_v2 }
 0x72a   : > { %10570 = vmatprep.subr.bf16.mxu0 %v10922_v42 }
 0x72d   : > { %10573 = vmatpush3.bf16.msk.msra.mxu0 %vm14161_vm5, %v10571_v63 }
 0x72e   : > { %10574 = vmatprep.subr.bf16.mxu0 %v10922_v42 }
 0x730   : > { %9470 = vmatmul.mubr.msk.f32.vlgmr.msra.gmra.mrb[12].mxu0 %vm6667_vm6, %v7652_v5 }
 0x731   : > { %10576 = vmatpush3.bf16.msra.mxu0 %v10575_v53  ;;  %9480 = vmatprep.mubr.msk.f32.mxu0 %vm10915_vm10, %v10906_v2 }
 0x732   : > { %10577 = vmatprep.subr.bf16.mxu0 %v10922_v42 }
 0x735   : > { %10580 = vmatpush3.bf16.msk.msra.mxu0 %vm14161_vm5, %v10578_v4 }
 0x736   : > { %10581 = vmatprep.subr.bf16.mxu0 %v10922_v42 }
 0x738   : > { %9481 = vmatmul.mubr.msk.f32.vlgmr.msra.gmra.mrb[12].mxu0 %vm6667_vm6, %v7734_v16 }
 0x739   : > { %10583 = vmatpush3.bf16.msra.mxu0 %v10582_v22  ;;  %9491 = vmatprep.mubr.msk.f32.mxu0 %vm10915_vm10, %v10906_v2 }
 0x73a   : > { %10584 = vmatprep.subr.bf16.mxu0 %v10922_v42 }
 0x73d   : > { %10587 = vmatpush3.bf16.msk.msra.mxu0 %vm14161_vm5, %v10585_v13 }
 0x73e   : > { %10588 = vmatprep.subr.bf16.mxu0 %v10922_v42 }
 0x740   : > { %9492 = vmatmul.mubr.msk.f32.vlgmr.msra.gmra.mrb[12].mxu0 %vm6667_vm6, %v7816_v14 }
 0x741   : > { %10590 = vmatpush3.bf16.msra.mxu0 %v10589_v39  ;;  %9502 = vmatprep.mubr.msk.f32.mxu0 %vm10915_vm10, %v10906_v2 }
 0x742   : > { %10591 = vmatprep.subr.bf16.mxu0 %v10922_v42 }
 0x745   : > { %10594 = vmatpush3.bf16.msk.msra.mxu0 %vm14161_vm5, %v10592_v57 }
 0x746   : > { %10616 = vmatprep.subr.bf16.mxu0 %v10922_v42 }
 0x748   : > { %9503 = vmatmul.mubr.msk.f32.vlgmr.msra.gmra.mrb[12].mxu0 %vm6667_vm6, %v7898_v17 }
 0x749   : > { %9560 = vmatprep.mubr.msk.f32.mxu0 %vm10915_vm10, %v10906_v2  ;;  %10618 = vmatpush3.bf16.msra.mxu0 %v10617_v38  ;;  %vm8157_vm10 = vcmask 73728  }
 0x74a   : > { %10619 = vmatprep.subr.bf16.mxu0 %v10922_v42 }
 0x74d   : > { %10621 = vmatpush3.bf16.msra.mxu0 %v10620_v32 }
 0x74e   : > { %10622 = vmatprep.subr.bf16.mxu0 %v10922_v42 }
 0x751   : > { %10624 = vmatpush3.bf16.msra.mxu0 %v10623_v48 }
 0x752   : > { %10625 = vmatprep.subr.bf16.mxu0 %v10922_v42 }
 0x755   : > { %10627 = vmatpush3.bf16.msra.mxu0 %v10626_v34 }
 0x756   : > { %10628 = vmatprep.subr.bf16.mxu0 %v10922_v42  ;;  %v10629_v42 = vpack.c.bf16 %v8076_v40, %v8075_v47 }
 0x759   : > { %10630 = vmatpush3.bf16.msra.mxu0 %v10629_v42 }
 0x75a   : > { %9558 = vmatprep.subr.mxu0 %v10906_v2  ;;  %v8078_v2 = vld [vmem:[%s14933_s12] sm:$0x1] }
 0x75d   : > { %9559 = vmatpush3.msk.msra.mxu0 %vm8083_vm8, %v8077_v44 }
 0x81b   : > { %v7970_v46 = vpop.f32.mrb[12].mxu0 }
 0x81c   : > { %v10635_v28 = vadd.f32 %v7970_v46, %v6662_v8  ;;  %v9504_v35 = vpop.f32.mrb[13].mxu0 }
 0x81e   : > { %v7975_v26 = vmax.f32 %v10635_v28, 0.0 }
 0x820   : > { %9536 = vmatmul.mubr.msk.f32.vlgmr.msra.gmra.mrb[28].mxu1 %vm7992_vm7, %v7975_v26 }
 0x8f3   : > { %v8062_v51 = vpop.f32.mrb[28].mxu1 }
 0x8f4   : > { %v8063_v52 = vadd.f32 %v8062_v51, %v7991_v45  ;;  %v9537_v59 = vpop.f32.mrb[29].mxu1 }
 0x8f6   : > { %v8066_v20 = vmax.f32 %v8063_v52, 0.0 }
 0x8f8   : > { %9561 = vmatmul.mubr.msk.f32.vlgmr.msra.gmra.mrb[14].mxu0 %vm8079_vm9, %v8066_v20 }
 0x9cb   : > { %v8153_v58 = vpop.f32.mrb[14].mxu0 }
 0x9cc   : > { %v8154_v25 = vadd.f32 %v8153_v58, %v8078_v2  ;;  %v9562_v11 = vpop.f32.mrb[15].mxu0 }
 0x9ce   : > { %8158 = vst.msk [vmem:[%s430_s0] sm:$0x1] %vm8157_vm10, %v8154_v25 }
 0x9cf   : > { %10855 = shalt.err (!%p10852_p3)
}
 0x9d0   : > { %s10856_s15 = scalar_lea.hbm %s14879_s30, 16  ;;  %s10860_s0 = scalar_lea.hbm %s14934_s13, 32 }
 0x9d1   : > { %p10857_p4 = scmp.ne.s32.totalorder %s14879_s30, %s10856_s15  ;;  %p10861_p9 = scmp.lt.u32.totalorder %s14879_s30, %s14934_s13 }
 0x9d2   : > { %p10862_p10 = scmp.lt.u32.totalorder %s10860_s0, %s10856_s15  ;;  %p10864_p12 = scmp.lt.u32.totalorder %s10856_s15, %s14879_s30 }
 0x9d3   : > { %p10858_p7 = pnand %p10857_p4, %p11033_p5 }
 0x9d4   : > { %p10863_p11 = por %p10862_p10, %p10861_p9 }
 0x9d5   : > { %p10859_p8 = pneg %p10858_p7 }
 0x9d6   : > { %p10865_p13 = por %p10864_p12, %p10863_p11 }
 0x9d8   : > { %p10866_p0 = pnand %p10865_p13, %p10859_p8 }
 0x9da   : > { %10869 = shalt.err (!%p10866_p0)
}
 0x9db   : > { %10783 = dma.vmem_to_hbm [thread:$0]  (%p11033_p5), %s14881_s1, 16, %s14879_s30, %s8160_s22  }
 0x9dc PF: > { %p10789_p1 = scmp.ge.s32.totalorder %s10904_s28, 2  ;;  %s8184_s27 = sand.u32 1, %s10892_s25  }
 0x9dd   : > { %s8185_s29 = scalar_lea.sflag [#allocation3], %s8184_s27 }
 0x9de   : > { %p10786_p2 = pnand %p10789_p1, %p11037_p6 }
 0x9e0   : > { %10887 = dma.done.wait (!%p10786_p2), %s8185_s29, 16  }
 0x9e1   : > { %10889 = vsyncadd (!%p10786_p2), %s8185_s29, 4294967280  ;;  %s14955_s23 = sld [smem:[#allocation5_spill]]  ;;  %s14956_s27 = sld [smem:[#allocation6_spill]] }
 0x9e2   : > { %p23_p3 = scmp.ge.s32.totalorder %s11020_s14, 4   ;;  %s14957_s25 = smov %s10896_s26 }
 0x9e3   : > { %s14959_s28 = smov %s11020_s14 }
 0x9e4   :  { %25 = sbr.rel (!%p23_p3) target bundleno = 6 (0x6), region = 144 }
 0x9e7   : > { %s14958_s26 = smov %s14955_s23 }
 0x9eb   :  { %8189 = vsyncpa [#allocation3], 1 }
 0x9ec   :  { %8191 = vsyncpa [#allocation3 + $0x1], 1 }

</bundles_post_ra>
